<compile_context>
chip_gen: v6e
topology: v6e:2x2x1
jax: 0.10.0
libtpu: 0.0.40
codegen_flags: <defaults>
</compile_context>

<pallas_src>
import jax
import jax.numpy as jnp
from jax import lax
from jax.experimental import pallas as pl
from jax.experimental.pallas import tpu as pltpu

EPS = 1e-5   # PyTorch BatchNorm2d default eps


def _block_kernel(x_ref, dw1_ref, pw1_ref, b1_ref,
                  dw2_ref, pw2_ref, pws_ref, b2s_ref,
                  o_ref, ypad1_ref, ypad2_ref):
    """Fused Block forward for one batch element (NHWC, real channel widths).

    x_ref   : (1, H, W, Cin)   input tile, f32
    dw1_ref : (3, 3, Cin)      depthwise-1 taps, f32
    pw1_ref : (Cin, Cmid)      pointwise-1 weights, BN1 scale folded, bf16
    b1_ref  : (1, Cmid)        BN1 shift, f32
    dw2_ref : (3, 3, Cmid)     depthwise-2 taps, f32
    pw2_ref : (Cmid, Cout)     pointwise-2 weights, BN2 scale folded, bf16
    pws_ref : (Cin, Cout)      skip 1x1 weights, BNskip scale folded, bf16
    b2s_ref : (1, Cout)        BN2 shift + BNskip shift (combined), f32
    o_ref   : (1, H, W, Cout)  output tile, f32
    ypad1/2 : (H+2, W+2, C)    VMEM halo scratches for the two depthwise convs
    """
    H = o_ref.shape[1]
    W = o_ref.shape[2]
    Cin = x_ref.shape[3]
    Cmid = pw1_ref.shape[1]
    Cout = o_ref.shape[3]

    RS = 8 if H % 8 == 0 else H          # row-strip height (bounds vreg pressure)
    n_strips = H // RS

    # Zero ONLY the halo borders (interior is fully overwritten below).
    # Unconditional -> correct under megacore grid sharding.
    for ypad, c in ((ypad1_ref, Cin), (ypad2_ref, Cmid)):
        ypad[0:1, :, :] = jnp.zeros((1, W + 2, c), jnp.float32)
        ypad[H + 1:H + 2, :, :] = jnp.zeros((1, W + 2, c), jnp.float32)
        ypad[1:H + 1, 0:1, :] = jnp.zeros((H, 1, c), jnp.float32)
        ypad[1:H + 1, W + 1:W + 2, :] = jnp.zeros((H, 1, c), jnp.float32)

    # Stage relu(x) once into the unit-1 halo scratch (SAME / pad=1).
    ypad1_ref[1:H + 1, 1:W + 1, :] = jnp.maximum(x_ref[0], 0.0)

    def sep_unit(pad_ref, dw_ref, pw_ref, r0, cin):
        """Depthwise 3x3 + (BN-scale-folded) pointwise for output rows [r0, r0+RS)."""
        acc = None
        for i in range(3):
            # One full-width halo slab per dy (aligned, offset-0 load); the
            # three dx windows are register slices of it.
            slab = pad_ref[r0 + i:r0 + i + RS, :, :]          # (RS, W+2, cin)
            for j in range(3):
                tap = dw_ref[i, j].reshape(1, 1, cin)         # per-channel tap
                t = slab[:, j:j + W, :] * tap
                acc = t if acc is None else acc + t           # seeded, no zeros
        # Pointwise 1x1 conv as one MXU matmul, bf16 operands / f32 accumulate.
        return jnp.dot(acc.reshape(RS * W, cin).astype(jnp.bfloat16),
                       pw_ref[...], preferred_element_type=jnp.float32)

    # Unit 1: relu(x) -> SepConv(Cin->Cmid) -> BN1 -> relu, strip by strip,
    # written straight into unit 2's halo scratch (never materialized whole).
    for s in range(n_strips):
        r0 = s * RS
        p = sep_unit(ypad1_ref, dw1_ref, pw1_ref, r0, Cin) + b1_ref[...]
        ypad2_ref[1 + r0:1 + r0 + RS, 1:W + 1, :] = (
            jnp.maximum(p, 0.0).reshape(RS, W, Cmid))

    # Unit 2 + skip path (1x1 conv + BN on raw x), strip by strip, fused with
    # the output store; combined bias covers both BN shifts.
    for s in range(n_strips):
        r0 = s * RS
        p2 = sep_unit(ypad2_ref, dw2_ref, pw2_ref, r0, Cmid)
        xs = x_ref[0, r0:r0 + RS, :, :].reshape(RS * W, Cin)
        sk = jnp.dot(xs.astype(jnp.bfloat16), pws_ref[...],
                     preferred_element_type=jnp.float32)
        out = p2 + sk + b2s_ref[...]
        o_ref[0, r0:r0 + RS, :, :] = out.reshape(RS, W, Cout).astype(o_ref.dtype)


# ------------------------- parameter repacking helpers -------------------------

def _fold_pointwise(conv_w, gamma, beta, mean, var):
    """Fold eval-mode BN into a 1x1 conv.

    Returns ((Ci, Co) bf16 weight with the BN scale folded into each output
    column, (Co,) f32 shift)."""
    scale = gamma / jnp.sqrt(var + EPS)                        # (Co,)
    shift = beta - mean * scale                                # (Co,)
    wmat = jnp.transpose(conv_w[:, :, 0, 0], (1, 0))           # (Ci, Co)
    wmat = (wmat * scale[None, :]).astype(jnp.bfloat16)        # fold in f32, cast once
    return wmat, shift.astype(jnp.float32)


def _dw_to_kernel(w):
    """PyTorch depthwise weight (C,1,3,3) -> (3,3,C) f32 taps."""
    return jnp.transpose(w[:, 0], (1, 2, 0)).astype(jnp.float32)


# ------------------------------- forward wrapper -------------------------------

@jax.jit
def block_forward_nchw(x_nchw, p):
    """Matches PyTorch Block.forward for the config above. I/O is NCHW f32."""
    B, Cin, H, W = x_nchw.shape
    Cmid = p["pw1_w"].shape[0]
    Cout = p["pw2_w"].shape[0]

    # NCHW -> NHWC at the REAL channel width (no zero padding to 128).
    x = jnp.transpose(x_nchw, (0, 2, 3, 1)).astype(jnp.float32)

    dw1 = _dw_to_kernel(p["dw1_w"])
    dw2 = _dw_to_kernel(p["dw2_w"])
    pw1, sh1 = _fold_pointwise(p["pw1_w"], p["bn1_g"], p["bn1_b"],
                               p["bn1_m"], p["bn1_v"])
    pw2, sh2 = _fold_pointwise(p["pw2_w"], p["bn2_g"], p["bn2_b"],
                               p["bn2_m"], p["bn2_v"])
    pws, shs = _fold_pointwise(p["skip_w"], p["bns_g"], p["bns_b"],
                               p["bns_m"], p["bns_v"])
    b1 = sh1.reshape(1, Cmid)
    b2s = (sh2 + shs).reshape(1, Cout)          # unit-2 shift + skip shift combined

    out = pl.pallas_call(
        _block_kernel,
        out_shape=jax.ShapeDtypeStruct((B, H, W, Cout), jnp.float32),
        grid_spec=pltpu.PrefetchScalarGridSpec(
            num_scalar_prefetch=0,
            grid=(B,),
            in_specs=[
                pl.BlockSpec((1, H, W, Cin), lambda b: (b, 0, 0, 0)),   # x
                pl.BlockSpec((3, 3, Cin), lambda b: (0, 0, 0)),         # dw1
                pl.BlockSpec((Cin, Cmid), lambda b: (0, 0)),            # pw1
                pl.BlockSpec((1, Cmid), lambda b: (0, 0)),              # b1
                pl.BlockSpec((3, 3, Cmid), lambda b: (0, 0, 0)),        # dw2
                pl.BlockSpec((Cmid, Cout), lambda b: (0, 0)),           # pw2
                pl.BlockSpec((Cin, Cout), lambda b: (0, 0)),            # skip
                pl.BlockSpec((1, Cout), lambda b: (0, 0)),              # b2+bs
            ],
            out_specs=pl.BlockSpec((1, H, W, Cout), lambda b: (b, 0, 0, 0)),
            scratch_shapes=[
                pltpu.VMEM((H + 2, W + 2, Cin), jnp.float32),
                pltpu.VMEM((H + 2, W + 2, Cmid), jnp.float32),
            ],
        ),
        compiler_params=pltpu.CompilerParams(
            dimension_semantics=("parallel",)),
    )(x, dw1, pw1, b1, dw2, pw2, pws, b2s)

    # NHWC (already at the real Cout) -> NCHW.
    return jnp.transpose(out, (0, 3, 1, 2))


# ------------------------------ pure-JAX reference ------------------------------

def _reference_nchw(x_nchw, p):
    """Same semantics as the PyTorch Block (eval-mode BN), pure JAX, f32."""
    dn = ("NHWC", "HWIO", "NHWC")
    Cin = x_nchw.shape[1]
    Cout = p["pw1_w"].shape[0]
    x = jnp.transpose(x_nchw, (0, 2, 3, 1)).astype(jnp.float32)

    def bn(v, g, b, m, var):
        return (v - m) / jnp.sqrt(var + EPS) * g + b

    def sep(v, dw, pw, groups):
        dw_hwio = jnp.transpose(dw, (2, 3, 1, 0))            # (3,3,1,C)
        v = lax.conv_general_dilated(v, dw_hwio, (1, 1), "SAME",
                                     dimension_numbers=dn,
                                     feature_group_count=groups)
        pw_hwio = jnp.transpose(pw, (2, 3, 1, 0))            # (1,1,Ci,Co)
        return lax.conv_general_dilated(v, pw_hwio, (1, 1), "SAME",
                                        dimension_numbers=dn)

    y = jnp.maximum(x, 0.0)
    y = bn(sep(y, p["dw1_w"], p["pw1_w"], Cin),
           p["bn1_g"], p["bn1_b"], p["bn1_m"], p["bn1_v"])
    y = jnp.maximum(y, 0.0)
    y = bn(sep(y, p["dw2_w"], p["pw2_w"], Cout),
           p["bn2_g"], p["bn2_b"], p["bn2_m"], p["bn2_v"])

    sk_hwio = jnp.transpose(p["skip_w"], (2, 3, 1, 0))
    sk = lax.conv_general_dilated(x, sk_hwio, (1, 1), "SAME",
                                  dimension_numbers=dn)
    sk = bn(sk, p["bns_g"], p["bns_b"], p["bns_m"], p["bns_v"])

    return jnp.transpose(y + sk, (0, 3, 1, 2))


if __name__ == "__main__":
    B, Cin, Cout, H, W = 2, 32, 64, 16, 16

    key = jax.random.PRNGKey(0)
    ks = jax.random.split(key, 16)

    def rnd(k, shape, s=0.1):
        return jax.random.normal(k, shape, jnp.float32) * s

    x_nchw = jax.random.normal(ks[0], (B, Cin, H, W), jnp.float32)

    # Synthetic parameters in PyTorch layouts (Conv2d / BatchNorm2d of Block).
    p = {
        "dw1_w": rnd(ks[1], (Cin, 1, 3, 3)),       # SepConv1 depthwise (groups=Cin)
        "pw1_w": rnd(ks[2], (Cout, Cin, 1, 1)),    # SepConv1 pointwise
        "bn1_g": 1.0 + rnd(ks[3], (Cout,)),
        "bn1_b": rnd(ks[4], (Cout,)),
        "bn1_m": rnd(ks[5], (Cout,)),
        "bn1_v": 1.0 + jnp.abs(rnd(ks[6], (Cout,))),
        "dw2_w": rnd(ks[7], (Cout, 1, 3, 3)),      # SepConv2 depthwise (groups=Cout)
        "pw2_w": rnd(ks[8], (Cout, Cout, 1, 1)),   # SepConv2 pointwise
        "bn2_g": 1.0 + rnd(ks[9], (Cout,)),
        "bn2_b": rnd(ks[10], (Cout,)),
        "bn2_m": rnd(ks[11], (Cout,)),
        "bn2_v": 1.0 + jnp.abs(rnd(ks[12], (Cout,))),
        "skip_w": rnd(ks[13], (Cout, Cin, 1, 1)),  # skip 1x1 conv
        "bns_g": 1.0 + rnd(ks[14], (Cout,)),
        "bns_b": rnd(ks[15], (Cout,)),
        "bns_m": jnp.zeros((Cout,), jnp.float32),
        "bns_v": jnp.ones((Cout,), jnp.float32),
    }

    out = block_forward_nchw(x_nchw, p)
    out = jax.block_until_ready(out)

    ref = _reference_nchw(x_nchw, p)
    assert out.shape == (B, Cout, H, W)
    err = float(jnp.max(jnp.abs(out - ref)))
    # Tolerance accounts for bf16 MXU operands (f32 accumulation) in the kernel.
    assert err < 3e-2, f"max abs err = {err}"

    print("KERNEL_OK")
</pallas_src>

<mosaic_0001>
module attributes {stable_mosaic.version = 11 : i64} {
  func.func @_block_kernel(%arg0: i32, %arg1: memref<1x16x16x32xf32, #tpu.memory_space<vmem>>, %arg2: memref<3x3x32xf32, #tpu.memory_space<vmem>>, %arg3: memref<32x64xbf16, #tpu.memory_space<vmem>>, %arg4: memref<1x64xf32, #tpu.memory_space<vmem>>, %arg5: memref<3x3x64xf32, #tpu.memory_space<vmem>>, %arg6: memref<64x64xbf16, #tpu.memory_space<vmem>>, %arg7: memref<32x64xbf16, #tpu.memory_space<vmem>>, %arg8: memref<1x64xf32, #tpu.memory_space<vmem>>, %arg9: memref<1x16x16x64xf32, #tpu.memory_space<vmem>>, %arg10: memref<18x18x32xf32, #tpu.memory_space<vmem>>, %arg11: memref<18x18x64xf32, #tpu.memory_space<vmem>>) attributes {dimension_semantics = [#tpu.dimension_semantics<parallel>], iteration_bounds = array<i64: 2>, scalar_prefetch = 0 : i64, scratch_operands = 2 : i64, tpu.core_type = #tpu.core_type<tc>, window_params = [{transform_indices = @transform_0, window_bounds = array<i64: 1, 16, 16, 32>}, {pipeline_mode = #tpu.pipeline_mode<synchronous>, transform_indices = @transform_1, window_bounds = array<i64: 3, 3, 32>}, {pipeline_mode = #tpu.pipeline_mode<synchronous>, transform_indices = @transform_2, window_bounds = array<i64: 32, 64>}, {pipeline_mode = #tpu.pipeline_mode<synchronous>, transform_indices = @transform_3, window_bounds = array<i64: 1, 64>}, {pipeline_mode = #tpu.pipeline_mode<synchronous>, transform_indices = @transform_4, window_bounds = array<i64: 3, 3, 64>}, {pipeline_mode = #tpu.pipeline_mode<synchronous>, transform_indices = @transform_5, window_bounds = array<i64: 64, 64>}, {pipeline_mode = #tpu.pipeline_mode<synchronous>, transform_indices = @transform_6, window_bounds = array<i64: 32, 64>}, {pipeline_mode = #tpu.pipeline_mode<synchronous>, transform_indices = @transform_7, window_bounds = array<i64: 1, 64>}, {transform_indices = @transform_8, window_bounds = array<i64: 1, 16, 16, 64>}]} {
    %cst = arith.constant 0.000000e+00 : f32
    %0 = vector.broadcast %cst : f32 to vector<1x18x32xf32>
    %c0 = arith.constant 0 : index
    %c0_0 = arith.constant 0 : index
    %c0_1 = arith.constant 0 : index
    %1 = vector.load %arg10[%c0, %c0_0, %c0_1] : memref<18x18x32xf32, #tpu.memory_space<vmem>>, vector<1x18x32xf32>
    tpu.vector_store %arg10[%c0, %c0_0, %c0_1], %0 {strides = array<i32>} : memref<18x18x32xf32, #tpu.memory_space<vmem>>, vector<1x18x32xf32>,
    %cst_2 = arith.constant 0.000000e+00 : f32
    %2 = vector.broadcast %cst_2 : f32 to vector<1x18x32xf32>
    %c17 = arith.constant 17 : index
    %c0_3 = arith.constant 0 : index
    %c0_4 = arith.constant 0 : index
    %3 = vector.load %arg10[%c17, %c0_3, %c0_4] : memref<18x18x32xf32, #tpu.memory_space<vmem>>, vector<1x18x32xf32>
    tpu.vector_store %arg10[%c17, %c0_3, %c0_4], %2 {strides = array<i32>} : memref<18x18x32xf32, #tpu.memory_space<vmem>>, vector<1x18x32xf32>,
    %cst_5 = arith.constant 0.000000e+00 : f32
    %4 = vector.broadcast %cst_5 : f32 to vector<16x1x32xf32>
    %c1 = arith.constant 1 : index
    %c0_6 = arith.constant 0 : index
    %c0_7 = arith.constant 0 : index
    %5 = vector.load %arg10[%c1, %c0_6, %c0_7] : memref<18x18x32xf32, #tpu.memory_space<vmem>>, vector<16x1x32xf32>
    tpu.vector_store %arg10[%c1, %c0_6, %c0_7], %4 {strides = array<i32>} : memref<18x18x32xf32, #tpu.memory_space<vmem>>, vector<16x1x32xf32>,
    %cst_8 = arith.constant 0.000000e+00 : f32
    %6 = vector.broadcast %cst_8 : f32 to vector<16x1x32xf32>
    %c1_9 = arith.constant 1 : index
    %c17_10 = arith.constant 17 : index
    %c0_11 = arith.constant 0 : index
    %7 = vector.load %arg10[%c1_9, %c17_10, %c0_11] : memref<18x18x32xf32, #tpu.memory_space<vmem>>, vector<16x1x32xf32>
    tpu.vector_store %arg10[%c1_9, %c17_10, %c0_11], %6 {strides = array<i32>} : memref<18x18x32xf32, #tpu.memory_space<vmem>>, vector<16x1x32xf32>,
    %cst_12 = arith.constant 0.000000e+00 : f32
    %8 = vector.broadcast %cst_12 : f32 to vector<1x18x64xf32>
    %c0_13 = arith.constant 0 : index
    %c0_14 = arith.constant 0 : index
    %c0_15 = arith.constant 0 : index
    %9 = vector.load %arg11[%c0_13, %c0_14, %c0_15] : memref<18x18x64xf32, #tpu.memory_space<vmem>>, vector<1x18x64xf32>
    tpu.vector_store %arg11[%c0_13, %c0_14, %c0_15], %8 {strides = array<i32>} : memref<18x18x64xf32, #tpu.memory_space<vmem>>, vector<1x18x64xf32>,
    %cst_16 = arith.constant 0.000000e+00 : f32
    %10 = vector.broadcast %cst_16 : f32 to vector<1x18x64xf32>
    %c17_17 = arith.constant 17 : index
    %c0_18 = arith.constant 0 : index
    %c0_19 = arith.constant 0 : index
    %11 = vector.load %arg11[%c17_17, %c0_18, %c0_19] : memref<18x18x64xf32, #tpu.memory_space<vmem>>, vector<1x18x64xf32>
    tpu.vector_store %arg11[%c17_17, %c0_18, %c0_19], %10 {strides = array<i32>} : memref<18x18x64xf32, #tpu.memory_space<vmem>>, vector<1x18x64xf32>,
    %cst_20 = arith.constant 0.000000e+00 : f32
    %12 = vector.broadcast %cst_20 : f32 to vector<16x1x64xf32>
    %c1_21 = arith.constant 1 : index
    %c0_22 = arith.constant 0 : index
    %c0_23 = arith.constant 0 : index
    %13 = vector.load %arg11[%c1_21, %c0_22, %c0_23] : memref<18x18x64xf32, #tpu.memory_space<vmem>>, vector<16x1x64xf32>
    tpu.vector_store %arg11[%c1_21, %c0_22, %c0_23], %12 {strides = array<i32>} : memref<18x18x64xf32, #tpu.memory_space<vmem>>, vector<16x1x64xf32>,
    %cst_24 = arith.constant 0.000000e+00 : f32
    %14 = vector.broadcast %cst_24 : f32 to vector<16x1x64xf32>
    %c1_25 = arith.constant 1 : index
    %c17_26 = arith.constant 17 : index
    %c0_27 = arith.constant 0 : index
    %15 = vector.load %arg11[%c1_25, %c17_26, %c0_27] : memref<18x18x64xf32, #tpu.memory_space<vmem>>, vector<16x1x64xf32>
    tpu.vector_store %arg11[%c1_25, %c17_26, %c0_27], %14 {strides = array<i32>} : memref<18x18x64xf32, #tpu.memory_space<vmem>>, vector<16x1x64xf32>,
    %c0_28 = arith.constant 0 : index
    %c0_29 = arith.constant 0 : index
    %c0_30 = arith.constant 0 : index
    %c0_31 = arith.constant 0 : index
    %16 = vector.load %arg1[%c0_28, %c0_29, %c0_30, %c0_31] : memref<1x16x16x32xf32, #tpu.memory_space<vmem>>, vector<1x16x16x32xf32>
    %17 = vector.shape_cast %16 : vector<1x16x16x32xf32> to vector<16x16x32xf32>
    %cst_32 = arith.constant 0.000000e+00 : f32
    %18 = vector.broadcast %cst_32 : f32 to vector<16x16x32xf32>
    %19 = arith.maximumf %17, %18 : vector<16x16x32xf32>
    %c1_33 = arith.constant 1 : index
    %c1_34 = arith.constant 1 : index
    %c0_35 = arith.constant 0 : index
    %20 = vector.load %arg10[%c1_33, %c1_34, %c0_35] : memref<18x18x32xf32, #tpu.memory_space<vmem>>, vector<16x16x32xf32>
    tpu.vector_store %arg10[%c1_33, %c1_34, %c0_35], %19 {strides = array<i32>} : memref<18x18x32xf32, #tpu.memory_space<vmem>>, vector<16x16x32xf32>,
    %c0_36 = arith.constant 0 : index
    %c0_37 = arith.constant 0 : index
    %c0_38 = arith.constant 0 : index
    %21 = vector.load %arg10[%c0_36, %c0_37, %c0_38] : memref<18x18x32xf32, #tpu.memory_space<vmem>>, vector<8x18x32xf32>
    %c0_39 = arith.constant 0 : index
    %c0_40 = arith.constant 0 : index
    %c0_41 = arith.constant 0 : index
    %22 = vector.load %arg2[%c0_39, %c0_40, %c0_41] : memref<3x3x32xf32, #tpu.memory_space<vmem>>, vector<1x1x32xf32>
    %23 = vector.shape_cast %22 : vector<1x1x32xf32> to vector<32xf32>
    %24 = vector.shape_cast %23 : vector<32xf32> to vector<1x1x32xf32>
    %25 = vector.extract_strided_slice %21 {offsets = [0, 0, 0], sizes = [8, 16, 32], strides = [1, 1, 1]} : vector<8x18x32xf32> to vector<8x16x32xf32>
    %26 = vector.broadcast %24 : vector<1x1x32xf32> to vector<8x16x32xf32>
    %27 = arith.mulf %25, %26 : vector<8x16x32xf32>
    %c0_42 = arith.constant 0 : index
    %c1_43 = arith.constant 1 : index
    %c0_44 = arith.constant 0 : index
    %28 = vector.load %arg2[%c0_42, %c1_43, %c0_44] : memref<3x3x32xf32, #tpu.memory_space<vmem>>, vector<1x1x32xf32>
    %29 = vector.shape_cast %28 : vector<1x1x32xf32> to vector<32xf32>
    %30 = vector.shape_cast %29 : vector<32xf32> to vector<1x1x32xf32>
    %31 = vector.extract_strided_slice %21 {offsets = [0, 1, 0], sizes = [8, 16, 32], strides = [1, 1, 1]} : vector<8x18x32xf32> to vector<8x16x32xf32>
    %32 = vector.broadcast %30 : vector<1x1x32xf32> to vector<8x16x32xf32>
    %33 = arith.mulf %31, %32 : vector<8x16x32xf32>
    %34 = arith.addf %27, %33 : vector<8x16x32xf32>
    %c0_45 = arith.constant 0 : index
    %c2 = arith.constant 2 : index
    %c0_46 = arith.constant 0 : index
    %35 = vector.load %arg2[%c0_45, %c2, %c0_46] : memref<3x3x32xf32, #tpu.memory_space<vmem>>, vector<1x1x32xf32>
    %36 = vector.shape_cast %35 : vector<1x1x32xf32> to vector<32xf32>
    %37 = vector.shape_cast %36 : vector<32xf32> to vector<1x1x32xf32>
    %38 = vector.extract_strided_slice %21 {offsets = [0, 2, 0], sizes = [8, 16, 32], strides = [1, 1, 1]} : vector<8x18x32xf32> to vector<8x16x32xf32>
    %39 = vector.broadcast %37 : vector<1x1x32xf32> to vector<8x16x32xf32>
    %40 = arith.mulf %38, %39 : vector<8x16x32xf32>
    %41 = arith.addf %34, %40 : vector<8x16x32xf32>
    %c1_47 = arith.constant 1 : index
    %c0_48 = arith.constant 0 : index
    %c0_49 = arith.constant 0 : index
    %42 = vector.load %arg10[%c1_47, %c0_48, %c0_49] : memref<18x18x32xf32, #tpu.memory_space<vmem>>, vector<8x18x32xf32>
    %c1_50 = arith.constant 1 : index
    %c0_51 = arith.constant 0 : index
    %c0_52 = arith.constant 0 : index
    %43 = vector.load %arg2[%c1_50, %c0_51, %c0_52] : memref<3x3x32xf32, #tpu.memory_space<vmem>>, vector<1x1x32xf32>
    %44 = vector.shape_cast %43 : vector<1x1x32xf32> to vector<32xf32>
    %45 = vector.shape_cast %44 : vector<32xf32> to vector<1x1x32xf32>
    %46 = vector.extract_strided_slice %42 {offsets = [0, 0, 0], sizes = [8, 16, 32], strides = [1, 1, 1]} : vector<8x18x32xf32> to vector<8x16x32xf32>
    %47 = vector.broadcast %45 : vector<1x1x32xf32> to vector<8x16x32xf32>
    %48 = arith.mulf %46, %47 : vector<8x16x32xf32>
    %49 = arith.addf %41, %48 : vector<8x16x32xf32>
    %c1_53 = arith.constant 1 : index
    %c1_54 = arith.constant 1 : index
    %c0_55 = arith.constant 0 : index
    %50 = vector.load %arg2[%c1_53, %c1_54, %c0_55] : memref<3x3x32xf32, #tpu.memory_space<vmem>>, vector<1x1x32xf32>
    %51 = vector.shape_cast %50 : vector<1x1x32xf32> to vector<32xf32>
    %52 = vector.shape_cast %51 : vector<32xf32> to vector<1x1x32xf32>
    %53 = vector.extract_strided_slice %42 {offsets = [0, 1, 0], sizes = [8, 16, 32], strides = [1, 1, 1]} : vector<8x18x32xf32> to vector<8x16x32xf32>
    %54 = vector.broadcast %52 : vector<1x1x32xf32> to vector<8x16x32xf32>
    %55 = arith.mulf %53, %54 : vector<8x16x32xf32>
    %56 = arith.addf %49, %55 : vector<8x16x32xf32>
    %c1_56 = arith.constant 1 : index
    %c2_57 = arith.constant 2 : index
    %c0_58 = arith.constant 0 : index
    %57 = vector.load %arg2[%c1_56, %c2_57, %c0_58] : memref<3x3x32xf32, #tpu.memory_space<vmem>>, vector<1x1x32xf32>
    %58 = vector.shape_cast %57 : vector<1x1x32xf32> to vector<32xf32>
    %59 = vector.shape_cast %58 : vector<32xf32> to vector<1x1x32xf32>
    %60 = vector.extract_strided_slice %42 {offsets = [0, 2, 0], sizes = [8, 16, 32], strides = [1, 1, 1]} : vector<8x18x32xf32> to vector<8x16x32xf32>
    %61 = vector.broadcast %59 : vector<1x1x32xf32> to vector<8x16x32xf32>
    %62 = arith.mulf %60, %61 : vector<8x16x32xf32>
    %63 = arith.addf %56, %62 : vector<8x16x32xf32>
    %c2_59 = arith.constant 2 : index
    %c0_60 = arith.constant 0 : index
    %c0_61 = arith.constant 0 : index
    %64 = vector.load %arg10[%c2_59, %c0_60, %c0_61] : memref<18x18x32xf32, #tpu.memory_space<vmem>>, vector<8x18x32xf32>
    %c2_62 = arith.constant 2 : index
    %c0_63 = arith.constant 0 : index
    %c0_64 = arith.constant 0 : index
    %65 = vector.load %arg2[%c2_62, %c0_63, %c0_64] : memref<3x3x32xf32, #tpu.memory_space<vmem>>, vector<1x1x32xf32>
    %66 = vector.shape_cast %65 : vector<1x1x32xf32> to vector<32xf32>
    %67 = vector.shape_cast %66 : vector<32xf32> to vector<1x1x32xf32>
    %68 = vector.extract_strided_slice %64 {offsets = [0, 0, 0], sizes = [8, 16, 32], strides = [1, 1, 1]} : vector<8x18x32xf32> to vector<8x16x32xf32>
    %69 = vector.broadcast %67 : vector<1x1x32xf32> to vector<8x16x32xf32>
    %70 = arith.mulf %68, %69 : vector<8x16x32xf32>
    %71 = arith.addf %63, %70 : vector<8x16x32xf32>
    %c2_65 = arith.constant 2 : index
    %c1_66 = arith.constant 1 : index
    %c0_67 = arith.constant 0 : index
    %72 = vector.load %arg2[%c2_65, %c1_66, %c0_67] : memref<3x3x32xf32, #tpu.memory_space<vmem>>, vector<1x1x32xf32>
    %73 = vector.shape_cast %72 : vector<1x1x32xf32> to vector<32xf32>
    %74 = vector.shape_cast %73 : vector<32xf32> to vector<1x1x32xf32>
    %75 = vector.extract_strided_slice %64 {offsets = [0, 1, 0], sizes = [8, 16, 32], strides = [1, 1, 1]} : vector<8x18x32xf32> to vector<8x16x32xf32>
    %76 = vector.broadcast %74 : vector<1x1x32xf32> to vector<8x16x32xf32>
    %77 = arith.mulf %75, %76 : vector<8x16x32xf32>
    %78 = arith.addf %71, %77 : vector<8x16x32xf32>
    %c2_68 = arith.constant 2 : index
    %c2_69 = arith.constant 2 : index
    %c0_70 = arith.constant 0 : index
    %79 = vector.load %arg2[%c2_68, %c2_69, %c0_70] : memref<3x3x32xf32, #tpu.memory_space<vmem>>, vector<1x1x32xf32>
    %80 = vector.shape_cast %79 : vector<1x1x32xf32> to vector<32xf32>
    %81 = vector.shape_cast %80 : vector<32xf32> to vector<1x1x32xf32>
    %82 = vector.extract_strided_slice %64 {offsets = [0, 2, 0], sizes = [8, 16, 32], strides = [1, 1, 1]} : vector<8x18x32xf32> to vector<8x16x32xf32>
    %83 = vector.broadcast %81 : vector<1x1x32xf32> to vector<8x16x32xf32>
    %84 = arith.mulf %82, %83 : vector<8x16x32xf32>
    %85 = arith.addf %78, %84 : vector<8x16x32xf32>
    %86 = vector.shape_cast %85 : vector<8x16x32xf32> to vector<128x32xf32>
    %87 = arith.truncf %86 : vector<128x32xf32> to vector<128x32xbf16>
    %c0_71 = arith.constant 0 : index
    %c0_72 = arith.constant 0 : index
    %88 = vector.load %arg3[%c0_71, %c0_72] : memref<32x64xbf16, #tpu.memory_space<vmem>>, vector<32x64xbf16>
    %cst_73 = arith.constant dense<0.000000e+00> : vector<128x64xf32>
    %89 = tpu.matmul %87, %88, %cst_73 {dimension_numbers = #tpu.dot_dimension_numbers<[1], [0], [0], [1], [0, 0, 1, 1], [], []>} : vector<128x32xbf16>, vector<32x64xbf16>, vector<128x64xf32> -> vector<128x64xf32>
    %c0_74 = arith.constant 0 : index
    %c0_75 = arith.constant 0 : index
    %90 = vector.load %arg4[%c0_74, %c0_75] : memref<1x64xf32, #tpu.memory_space<vmem>>, vector<1x64xf32>
    %91 = vector.broadcast %90 : vector<1x64xf32> to vector<128x64xf32>
    %92 = arith.addf %89, %91 : vector<128x64xf32>
    %cst_76 = arith.constant 0.000000e+00 : f32
    %93 = vector.broadcast %cst_76 : f32 to vector<128x64xf32>
    %94 = arith.maximumf %92, %93 : vector<128x64xf32>
    %95 = vector.shape_cast %94 : vector<128x64xf32> to vector<8x16x64xf32>
    %c1_77 = arith.constant 1 : index
    %c1_78 = arith.constant 1 : index
    %c0_79 = arith.constant 0 : index
    %96 = vector.load %arg11[%c1_77, %c1_78, %c0_79] : memref<18x18x64xf32, #tpu.memory_space<vmem>>, vector<8x16x64xf32>
    tpu.vector_store %arg11[%c1_77, %c1_78, %c0_79], %95 {strides = array<i32>} : memref<18x18x64xf32, #tpu.memory_space<vmem>>, vector<8x16x64xf32>,
    %c8 = arith.constant 8 : index
    %c0_80 = arith.constant 0 : index
    %c0_81 = arith.constant 0 : index
    %97 = vector.load %arg10[%c8, %c0_80, %c0_81] : memref<18x18x32xf32, #tpu.memory_space<vmem>>, vector<8x18x32xf32>
    %c0_82 = arith.constant 0 : index
    %c0_83 = arith.constant 0 : index
    %c0_84 = arith.constant 0 : index
    %98 = vector.load %arg2[%c0_82, %c0_83, %c0_84] : memref<3x3x32xf32, #tpu.memory_space<vmem>>, vector<1x1x32xf32>
    %99 = vector.shape_cast %98 : vector<1x1x32xf32> to vector<32xf32>
    %100 = vector.shape_cast %99 : vector<32xf32> to vector<1x1x32xf32>
    %101 = vector.extract_strided_slice %97 {offsets = [0, 0, 0], sizes = [8, 16, 32], strides = [1, 1, 1]} : vector<8x18x32xf32> to vector<8x16x32xf32>
    %102 = vector.broadcast %100 : vector<1x1x32xf32> to vector<8x16x32xf32>
    %103 = arith.mulf %101, %102 : vector<8x16x32xf32>
    %c0_85 = arith.constant 0 : index
    %c1_86 = arith.constant 1 : index
    %c0_87 = arith.constant 0 : index
    %104 = vector.load %arg2[%c0_85, %c1_86, %c0_87] : memref<3x3x32xf32, #tpu.memory_space<vmem>>, vector<1x1x32xf32>
    %105 = vector.shape_cast %104 : vector<1x1x32xf32> to vector<32xf32>
    %106 = vector.shape_cast %105 : vector<32xf32> to vector<1x1x32xf32>
    %107 = vector.extract_strided_slice %97 {offsets = [0, 1, 0], sizes = [8, 16, 32], strides = [1, 1, 1]} : vector<8x18x32xf32> to vector<8x16x32xf32>
    %108 = vector.broadcast %106 : vector<1x1x32xf32> to vector<8x16x32xf32>
    %109 = arith.mulf %107, %108 : vector<8x16x32xf32>
    %110 = arith.addf %103, %109 : vector<8x16x32xf32>
    %c0_88 = arith.constant 0 : index
    %c2_89 = arith.constant 2 : index
    %c0_90 = arith.constant 0 : index
    %111 = vector.load %arg2[%c0_88, %c2_89, %c0_90] : memref<3x3x32xf32, #tpu.memory_space<vmem>>, vector<1x1x32xf32>
    %112 = vector.shape_cast %111 : vector<1x1x32xf32> to vector<32xf32>
    %113 = vector.shape_cast %112 : vector<32xf32> to vector<1x1x32xf32>
    %114 = vector.extract_strided_slice %97 {offsets = [0, 2, 0], sizes = [8, 16, 32], strides = [1, 1, 1]} : vector<8x18x32xf32> to vector<8x16x32xf32>
    %115 = vector.broadcast %113 : vector<1x1x32xf32> to vector<8x16x32xf32>
    %116 = arith.mulf %114, %115 : vector<8x16x32xf32>
    %117 = arith.addf %110, %116 : vector<8x16x32xf32>
    %c9 = arith.constant 9 : index
    %c0_91 = arith.constant 0 : index
    %c0_92 = arith.constant 0 : index
    %118 = vector.load %arg10[%c9, %c0_91, %c0_92] : memref<18x18x32xf32, #tpu.memory_space<vmem>>, vector<8x18x32xf32>
    %c1_93 = arith.constant 1 : index
    %c0_94 = arith.constant 0 : index
    %c0_95 = arith.constant 0 : index
    %119 = vector.load %arg2[%c1_93, %c0_94, %c0_95] : memref<3x3x32xf32, #tpu.memory_space<vmem>>, vector<1x1x32xf32>
    %120 = vector.shape_cast %119 : vector<1x1x32xf32> to vector<32xf32>
    %121 = vector.shape_cast %120 : vector<32xf32> to vector<1x1x32xf32>
    %122 = vector.extract_strided_slice %118 {offsets = [0, 0, 0], sizes = [8, 16, 32], strides = [1, 1, 1]} : vector<8x18x32xf32> to vector<8x16x32xf32>
    %123 = vector.broadcast %121 : vector<1x1x32xf32> to vector<8x16x32xf32>
    %124 = arith.mulf %122, %123 : vector<8x16x32xf32>
    %125 = arith.addf %117, %124 : vector<8x16x32xf32>
    %c1_96 = arith.constant 1 : index
    %c1_97 = arith.constant 1 : index
    %c0_98 = arith.constant 0 : index
    %126 = vector.load %arg2[%c1_96, %c1_97, %c0_98] : memref<3x3x32xf32, #tpu.memory_space<vmem>>, vector<1x1x32xf32>
    %127 = vector.shape_cast %126 : vector<1x1x32xf32> to vector<32xf32>
    %128 = vector.shape_cast %127 : vector<32xf32> to vector<1x1x32xf32>
    %129 = vector.extract_strided_slice %118 {offsets = [0, 1, 0], sizes = [8, 16, 32], strides = [1, 1, 1]} : vector<8x18x32xf32> to vector<8x16x32xf32>
    %130 = vector.broadcast %128 : vector<1x1x32xf32> to vector<8x16x32xf32>
    %131 = arith.mulf %129, %130 : vector<8x16x32xf32>
    %132 = arith.addf %125, %131 : vector<8x16x32xf32>
    %c1_99 = arith.constant 1 : index
    %c2_100 = arith.constant 2 : index
    %c0_101 = arith.constant 0 : index
    %133 = vector.load %arg2[%c1_99, %c2_100, %c0_101] : memref<3x3x32xf32, #tpu.memory_space<vmem>>, vector<1x1x32xf32>
    %134 = vector.shape_cast %133 : vector<1x1x32xf32> to vector<32xf32>
    %135 = vector.shape_cast %134 : vector<32xf32> to vector<1x1x32xf32>
    %136 = vector.extract_strided_slice %118 {offsets = [0, 2, 0], sizes = [8, 16, 32], strides = [1, 1, 1]} : vector<8x18x32xf32> to vector<8x16x32xf32>
    %137 = vector.broadcast %135 : vector<1x1x32xf32> to vector<8x16x32xf32>
    %138 = arith.mulf %136, %137 : vector<8x16x32xf32>
    %139 = arith.addf %132, %138 : vector<8x16x32xf32>
    %c10 = arith.constant 10 : index
    %c0_102 = arith.constant 0 : index
    %c0_103 = arith.constant 0 : index
    %140 = vector.load %arg10[%c10, %c0_102, %c0_103] : memref<18x18x32xf32, #tpu.memory_space<vmem>>, vector<8x18x32xf32>
    %c2_104 = arith.constant 2 : index
    %c0_105 = arith.constant 0 : index
    %c0_106 = arith.constant 0 : index
    %141 = vector.load %arg2[%c2_104, %c0_105, %c0_106] : memref<3x3x32xf32, #tpu.memory_space<vmem>>, vector<1x1x32xf32>
    %142 = vector.shape_cast %141 : vector<1x1x32xf32> to vector<32xf32>
    %143 = vector.shape_cast %142 : vector<32xf32> to vector<1x1x32xf32>
    %144 = vector.extract_strided_slice %140 {offsets = [0, 0, 0], sizes = [8, 16, 32], strides = [1, 1, 1]} : vector<8x18x32xf32> to vector<8x16x32xf32>
    %145 = vector.broadcast %143 : vector<1x1x32xf32> to vector<8x16x32xf32>
    %146 = arith.mulf %144, %145 : vector<8x16x32xf32>
    %147 = arith.addf %139, %146 : vector<8x16x32xf32>
    %c2_107 = arith.constant 2 : index
    %c1_108 = arith.constant 1 : index
    %c0_109 = arith.constant 0 : index
    %148 = vector.load %arg2[%c2_107, %c1_108, %c0_109] : memref<3x3x32xf32, #tpu.memory_space<vmem>>, vector<1x1x32xf32>
    %149 = vector.shape_cast %148 : vector<1x1x32xf32> to vector<32xf32>
    %150 = vector.shape_cast %149 : vector<32xf32> to vector<1x1x32xf32>
    %151 = vector.extract_strided_slice %140 {offsets = [0, 1, 0], sizes = [8, 16, 32], strides = [1, 1, 1]} : vector<8x18x32xf32> to vector<8x16x32xf32>
    %152 = vector.broadcast %150 : vector<1x1x32xf32> to vector<8x16x32xf32>
    %153 = arith.mulf %151, %152 : vector<8x16x32xf32>
    %154 = arith.addf %147, %153 : vector<8x16x32xf32>
    %c2_110 = arith.constant 2 : index
    %c2_111 = arith.constant 2 : index
    %c0_112 = arith.constant 0 : index
    %155 = vector.load %arg2[%c2_110, %c2_111, %c0_112] : memref<3x3x32xf32, #tpu.memory_space<vmem>>, vector<1x1x32xf32>
    %156 = vector.shape_cast %155 : vector<1x1x32xf32> to vector<32xf32>
    %157 = vector.shape_cast %156 : vector<32xf32> to vector<1x1x32xf32>
    %158 = vector.extract_strided_slice %140 {offsets = [0, 2, 0], sizes = [8, 16, 32], strides = [1, 1, 1]} : vector<8x18x32xf32> to vector<8x16x32xf32>
    %159 = vector.broadcast %157 : vector<1x1x32xf32> to vector<8x16x32xf32>
    %160 = arith.mulf %158, %159 : vector<8x16x32xf32>
    %161 = arith.addf %154, %160 : vector<8x16x32xf32>
    %162 = vector.shape_cast %161 : vector<8x16x32xf32> to vector<128x32xf32>
    %163 = arith.truncf %162 : vector<128x32xf32> to vector<128x32xbf16>
    %c0_113 = arith.constant 0 : index
    %c0_114 = arith.constant 0 : index
    %164 = vector.load %arg3[%c0_113, %c0_114] : memref<32x64xbf16, #tpu.memory_space<vmem>>, vector<32x64xbf16>
    %cst_115 = arith.constant dense<0.000000e+00> : vector<128x64xf32>
    %165 = tpu.matmul %163, %164, %cst_115 {dimension_numbers = #tpu.dot_dimension_numbers<[1], [0], [0], [1], [0, 0, 1, 1], [], []>} : vector<128x32xbf16>, vector<32x64xbf16>, vector<128x64xf32> -> vector<128x64xf32>
    %c0_116 = arith.constant 0 : index
    %c0_117 = arith.constant 0 : index
    %166 = vector.load %arg4[%c0_116, %c0_117] : memref<1x64xf32, #tpu.memory_space<vmem>>, vector<1x64xf32>
    %167 = vector.broadcast %166 : vector<1x64xf32> to vector<128x64xf32>
    %168 = arith.addf %165, %167 : vector<128x64xf32>
    %cst_118 = arith.constant 0.000000e+00 : f32
    %169 = vector.broadcast %cst_118 : f32 to vector<128x64xf32>
    %170 = arith.maximumf %168, %169 : vector<128x64xf32>
    %171 = vector.shape_cast %170 : vector<128x64xf32> to vector<8x16x64xf32>
    %c9_119 = arith.constant 9 : index
    %c1_120 = arith.constant 1 : index
    %c0_121 = arith.constant 0 : index
    %172 = vector.load %arg11[%c9_119, %c1_120, %c0_121] : memref<18x18x64xf32, #tpu.memory_space<vmem>>, vector<8x16x64xf32>
    tpu.vector_store %arg11[%c9_119, %c1_120, %c0_121], %171 {strides = array<i32>} : memref<18x18x64xf32, #tpu.memory_space<vmem>>, vector<8x16x64xf32>,
    %c0_122 = arith.constant 0 : index
    %c0_123 = arith.constant 0 : index
    %c0_124 = arith.constant 0 : index
    %173 = vector.load %arg11[%c0_122, %c0_123, %c0_124] : memref<18x18x64xf32, #tpu.memory_space<vmem>>, vector<8x18x64xf32>
    %c0_125 = arith.constant 0 : index
    %c0_126 = arith.constant 0 : index
    %c0_127 = arith.constant 0 : index
    %174 = vector.load %arg5[%c0_125, %c0_126, %c0_127] : memref<3x3x64xf32, #tpu.memory_space<vmem>>, vector<1x1x64xf32>
    %175 = vector.shape_cast %174 : vector<1x1x64xf32> to vector<64xf32>
    %176 = vector.shape_cast %175 : vector<64xf32> to vector<1x1x64xf32>
    %177 = vector.extract_strided_slice %173 {offsets = [0, 0, 0], sizes = [8, 16, 64], strides = [1, 1, 1]} : vector<8x18x64xf32> to vector<8x16x64xf32>
    %178 = vector.broadcast %176 : vector<1x1x64xf32> to vector<8x16x64xf32>
    %179 = arith.mulf %177, %178 : vector<8x16x64xf32>
    %c0_128 = arith.constant 0 : index
    %c1_129 = arith.constant 1 : index
    %c0_130 = arith.constant 0 : index
    %180 = vector.load %arg5[%c0_128, %c1_129, %c0_130] : memref<3x3x64xf32, #tpu.memory_space<vmem>>, vector<1x1x64xf32>
    %181 = vector.shape_cast %180 : vector<1x1x64xf32> to vector<64xf32>
    %182 = vector.shape_cast %181 : vector<64xf32> to vector<1x1x64xf32>
    %183 = vector.extract_strided_slice %173 {offsets = [0, 1, 0], sizes = [8, 16, 64], strides = [1, 1, 1]} : vector<8x18x64xf32> to vector<8x16x64xf32>
    %184 = vector.broadcast %182 : vector<1x1x64xf32> to vector<8x16x64xf32>
    %185 = arith.mulf %183, %184 : vector<8x16x64xf32>
    %186 = arith.addf %179, %185 : vector<8x16x64xf32>
    %c0_131 = arith.constant 0 : index
    %c2_132 = arith.constant 2 : index
    %c0_133 = arith.constant 0 : index
    %187 = vector.load %arg5[%c0_131, %c2_132, %c0_133] : memref<3x3x64xf32, #tpu.memory_space<vmem>>, vector<1x1x64xf32>
    %188 = vector.shape_cast %187 : vector<1x1x64xf32> to vector<64xf32>
    %189 = vector.shape_cast %188 : vector<64xf32> to vector<1x1x64xf32>
    %190 = vector.extract_strided_slice %173 {offsets = [0, 2, 0], sizes = [8, 16, 64], strides = [1, 1, 1]} : vector<8x18x64xf32> to vector<8x16x64xf32>
    %191 = vector.broadcast %189 : vector<1x1x64xf32> to vector<8x16x64xf32>
    %192 = arith.mulf %190, %191 : vector<8x16x64xf32>
    %193 = arith.addf %186, %192 : vector<8x16x64xf32>
    %c1_134 = arith.constant 1 : index
    %c0_135 = arith.constant 0 : index
    %c0_136 = arith.constant 0 : index
    %194 = vector.load %arg11[%c1_134, %c0_135, %c0_136] : memref<18x18x64xf32, #tpu.memory_space<vmem>>, vector<8x18x64xf32>
    %c1_137 = arith.constant 1 : index
    %c0_138 = arith.constant 0 : index
    %c0_139 = arith.constant 0 : index
    %195 = vector.load %arg5[%c1_137, %c0_138, %c0_139] : memref<3x3x64xf32, #tpu.memory_space<vmem>>, vector<1x1x64xf32>
    %196 = vector.shape_cast %195 : vector<1x1x64xf32> to vector<64xf32>
    %197 = vector.shape_cast %196 : vector<64xf32> to vector<1x1x64xf32>
    %198 = vector.extract_strided_slice %194 {offsets = [0, 0, 0], sizes = [8, 16, 64], strides = [1, 1, 1]} : vector<8x18x64xf32> to vector<8x16x64xf32>
    %199 = vector.broadcast %197 : vector<1x1x64xf32> to vector<8x16x64xf32>
    %200 = arith.mulf %198, %199 : vector<8x16x64xf32>
    %201 = arith.addf %193, %200 : vector<8x16x64xf32>
    %c1_140 = arith.constant 1 : index
    %c1_141 = arith.constant 1 : index
    %c0_142 = arith.constant 0 : index
    %202 = vector.load %arg5[%c1_140, %c1_141, %c0_142] : memref<3x3x64xf32, #tpu.memory_space<vmem>>, vector<1x1x64xf32>
    %203 = vector.shape_cast %202 : vector<1x1x64xf32> to vector<64xf32>
    %204 = vector.shape_cast %203 : vector<64xf32> to vector<1x1x64xf32>
    %205 = vector.extract_strided_slice %194 {offsets = [0, 1, 0], sizes = [8, 16, 64], strides = [1, 1, 1]} : vector<8x18x64xf32> to vector<8x16x64xf32>
    %206 = vector.broadcast %204 : vector<1x1x64xf32> to vector<8x16x64xf32>
    %207 = arith.mulf %205, %206 : vector<8x16x64xf32>
    %208 = arith.addf %201, %207 : vector<8x16x64xf32>
    %c1_143 = arith.constant 1 : index
    %c2_144 = arith.constant 2 : index
    %c0_145 = arith.constant 0 : index
    %209 = vector.load %arg5[%c1_143, %c2_144, %c0_145] : memref<3x3x64xf32, #tpu.memory_space<vmem>>, vector<1x1x64xf32>
    %210 = vector.shape_cast %209 : vector<1x1x64xf32> to vector<64xf32>
    %211 = vector.shape_cast %210 : vector<64xf32> to vector<1x1x64xf32>
    %212 = vector.extract_strided_slice %194 {offsets = [0, 2, 0], sizes = [8, 16, 64], strides = [1, 1, 1]} : vector<8x18x64xf32> to vector<8x16x64xf32>
    %213 = vector.broadcast %211 : vector<1x1x64xf32> to vector<8x16x64xf32>
    %214 = arith.mulf %212, %213 : vector<8x16x64xf32>
    %215 = arith.addf %208, %214 : vector<8x16x64xf32>
    %c2_146 = arith.constant 2 : index
    %c0_147 = arith.constant 0 : index
    %c0_148 = arith.constant 0 : index
    %216 = vector.load %arg11[%c2_146, %c0_147, %c0_148] : memref<18x18x64xf32, #tpu.memory_space<vmem>>, vector<8x18x64xf32>
    %c2_149 = arith.constant 2 : index
    %c0_150 = arith.constant 0 : index
    %c0_151 = arith.constant 0 : index
    %217 = vector.load %arg5[%c2_149, %c0_150, %c0_151] : memref<3x3x64xf32, #tpu.memory_space<vmem>>, vector<1x1x64xf32>
    %218 = vector.shape_cast %217 : vector<1x1x64xf32> to vector<64xf32>
    %219 = vector.shape_cast %218 : vector<64xf32> to vector<1x1x64xf32>
    %220 = vector.extract_strided_slice %216 {offsets = [0, 0, 0], sizes = [8, 16, 64], strides = [1, 1, 1]} : vector<8x18x64xf32> to vector<8x16x64xf32>
    %221 = vector.broadcast %219 : vector<1x1x64xf32> to vector<8x16x64xf32>
    %222 = arith.mulf %220, %221 : vector<8x16x64xf32>
    %223 = arith.addf %215, %222 : vector<8x16x64xf32>
    %c2_152 = arith.constant 2 : index
    %c1_153 = arith.constant 1 : index
    %c0_154 = arith.constant 0 : index
    %224 = vector.load %arg5[%c2_152, %c1_153, %c0_154] : memref<3x3x64xf32, #tpu.memory_space<vmem>>, vector<1x1x64xf32>
    %225 = vector.shape_cast %224 : vector<1x1x64xf32> to vector<64xf32>
    %226 = vector.shape_cast %225 : vector<64xf32> to vector<1x1x64xf32>
    %227 = vector.extract_strided_slice %216 {offsets = [0, 1, 0], sizes = [8, 16, 64], strides = [1, 1, 1]} : vector<8x18x64xf32> to vector<8x16x64xf32>
    %228 = vector.broadcast %226 : vector<1x1x64xf32> to vector<8x16x64xf32>
    %229 = arith.mulf %227, %228 : vector<8x16x64xf32>
    %230 = arith.addf %223, %229 : vector<8x16x64xf32>
    %c2_155 = arith.constant 2 : index
    %c2_156 = arith.constant 2 : index
    %c0_157 = arith.constant 0 : index
    %231 = vector.load %arg5[%c2_155, %c2_156, %c0_157] : memref<3x3x64xf32, #tpu.memory_space<vmem>>, vector<1x1x64xf32>
    %232 = vector.shape_cast %231 : vector<1x1x64xf32> to vector<64xf32>
    %233 = vector.shape_cast %232 : vector<64xf32> to vector<1x1x64xf32>
    %234 = vector.extract_strided_slice %216 {offsets = [0, 2, 0], sizes = [8, 16, 64], strides = [1, 1, 1]} : vector<8x18x64xf32> to vector<8x16x64xf32>
    %235 = vector.broadcast %233 : vector<1x1x64xf32> to vector<8x16x64xf32>
    %236 = arith.mulf %234, %235 : vector<8x16x64xf32>
    %237 = arith.addf %230, %236 : vector<8x16x64xf32>
    %238 = vector.shape_cast %237 : vector<8x16x64xf32> to vector<128x64xf32>
    %239 = arith.truncf %238 : vector<128x64xf32> to vector<128x64xbf16>
    %c0_158 = arith.constant 0 : index
    %c0_159 = arith.constant 0 : index
    %240 = vector.load %arg6[%c0_158, %c0_159] : memref<64x64xbf16, #tpu.memory_space<vmem>>, vector<64x64xbf16>
    %cst_160 = arith.constant dense<0.000000e+00> : vector<128x64xf32>
    %241 = tpu.matmul %239, %240, %cst_160 {dimension_numbers = #tpu.dot_dimension_numbers<[1], [0], [0], [1], [0, 0, 1, 1], [], []>} : vector<128x64xbf16>, vector<64x64xbf16>, vector<128x64xf32> -> vector<128x64xf32>
    %c0_161 = arith.constant 0 : index
    %c0_162 = arith.constant 0 : index
    %c0_163 = arith.constant 0 : index
    %c0_164 = arith.constant 0 : index
    %242 = vector.load %arg1[%c0_161, %c0_162, %c0_163, %c0_164] : memref<1x16x16x32xf32, #tpu.memory_space<vmem>>, vector<1x8x16x32xf32>
    %243 = vector.shape_cast %242 : vector<1x8x16x32xf32> to vector<8x16x32xf32>
    %244 = vector.shape_cast %243 : vector<8x16x32xf32> to vector<128x32xf32>
    %245 = arith.truncf %244 : vector<128x32xf32> to vector<128x32xbf16>
    %c0_165 = arith.constant 0 : index
    %c0_166 = arith.constant 0 : index
    %246 = vector.load %arg7[%c0_165, %c0_166] : memref<32x64xbf16, #tpu.memory_space<vmem>>, vector<32x64xbf16>
    %cst_167 = arith.constant dense<0.000000e+00> : vector<128x64xf32>
    %247 = tpu.matmul %245, %246, %cst_167 {dimension_numbers = #tpu.dot_dimension_numbers<[1], [0], [0], [1], [0, 0, 1, 1], [], []>} : vector<128x32xbf16>, vector<32x64xbf16>, vector<128x64xf32> -> vector<128x64xf32>
    %248 = arith.addf %241, %247 : vector<128x64xf32>
    %c0_168 = arith.constant 0 : index
    %c0_169 = arith.constant 0 : index
    %249 = vector.load %arg8[%c0_168, %c0_169] : memref<1x64xf32, #tpu.memory_space<vmem>>, vector<1x64xf32>
    %250 = vector.broadcast %249 : vector<1x64xf32> to vector<128x64xf32>
    %251 = arith.addf %248, %250 : vector<128x64xf32>
    %252 = vector.shape_cast %251 : vector<128x64xf32> to vector<8x16x64xf32>
    %c0_170 = arith.constant 0 : index
    %c0_171 = arith.constant 0 : index
    %c0_172 = arith.constant 0 : index
    %c0_173 = arith.constant 0 : index
    %253 = vector.load %arg9[%c0_170, %c0_171, %c0_172, %c0_173] : memref<1x16x16x64xf32, #tpu.memory_space<vmem>>, vector<1x8x16x64xf32>
    %254 = vector.shape_cast %253 : vector<1x8x16x64xf32> to vector<8x16x64xf32>
    %255 = vector.shape_cast %252 : vector<8x16x64xf32> to vector<1x8x16x64xf32>
    tpu.vector_store %arg9[%c0_170, %c0_171, %c0_172, %c0_173], %255 {strides = array<i32>} : memref<1x16x16x64xf32, #tpu.memory_space<vmem>>, vector<1x8x16x64xf32>,
    %c8_174 = arith.constant 8 : index
    %c0_175 = arith.constant 0 : index
    %c0_176 = arith.constant 0 : index
    %256 = vector.load %arg11[%c8_174, %c0_175, %c0_176] : memref<18x18x64xf32, #tpu.memory_space<vmem>>, vector<8x18x64xf32>
    %c0_177 = arith.constant 0 : index
    %c0_178 = arith.constant 0 : index
    %c0_179 = arith.constant 0 : index
    %257 = vector.load %arg5[%c0_177, %c0_178, %c0_179] : memref<3x3x64xf32, #tpu.memory_space<vmem>>, vector<1x1x64xf32>
    %258 = vector.shape_cast %257 : vector<1x1x64xf32> to vector<64xf32>
    %259 = vector.shape_cast %258 : vector<64xf32> to vector<1x1x64xf32>
    %260 = vector.extract_strided_slice %256 {offsets = [0, 0, 0], sizes = [8, 16, 64], strides = [1, 1, 1]} : vector<8x18x64xf32> to vector<8x16x64xf32>
    %261 = vector.broadcast %259 : vector<1x1x64xf32> to vector<8x16x64xf32>
    %262 = arith.mulf %260, %261 : vector<8x16x64xf32>
    %c0_180 = arith.constant 0 : index
    %c1_181 = arith.constant 1 : index
    %c0_182 = arith.constant 0 : index
    %263 = vector.load %arg5[%c0_180, %c1_181, %c0_182] : memref<3x3x64xf32, #tpu.memory_space<vmem>>, vector<1x1x64xf32>
    %264 = vector.shape_cast %263 : vector<1x1x64xf32> to vector<64xf32>
    %265 = vector.shape_cast %264 : vector<64xf32> to vector<1x1x64xf32>
    %266 = vector.extract_strided_slice %256 {offsets = [0, 1, 0], sizes = [8, 16, 64], strides = [1, 1, 1]} : vector<8x18x64xf32> to vector<8x16x64xf32>
    %267 = vector.broadcast %265 : vector<1x1x64xf32> to vector<8x16x64xf32>
    %268 = arith.mulf %266, %267 : vector<8x16x64xf32>
    %269 = arith.addf %262, %268 : vector<8x16x64xf32>
    %c0_183 = arith.constant 0 : index
    %c2_184 = arith.constant 2 : index
    %c0_185 = arith.constant 0 : index
    %270 = vector.load %arg5[%c0_183, %c2_184, %c0_185] : memref<3x3x64xf32, #tpu.memory_space<vmem>>, vector<1x1x64xf32>
    %271 = vector.shape_cast %270 : vector<1x1x64xf32> to vector<64xf32>
    %272 = vector.shape_cast %271 : vector<64xf32> to vector<1x1x64xf32>
    %273 = vector.extract_strided_slice %256 {offsets = [0, 2, 0], sizes = [8, 16, 64], strides = [1, 1, 1]} : vector<8x18x64xf32> to vector<8x16x64xf32>
    %274 = vector.broadcast %272 : vector<1x1x64xf32> to vector<8x16x64xf32>
    %275 = arith.mulf %273, %274 : vector<8x16x64xf32>
    %276 = arith.addf %269, %275 : vector<8x16x64xf32>
    %c9_186 = arith.constant 9 : index
    %c0_187 = arith.constant 0 : index
    %c0_188 = arith.constant 0 : index
    %277 = vector.load %arg11[%c9_186, %c0_187, %c0_188] : memref<18x18x64xf32, #tpu.memory_space<vmem>>, vector<8x18x64xf32>
    %c1_189 = arith.constant 1 : index
    %c0_190 = arith.constant 0 : index
    %c0_191 = arith.constant 0 : index
    %278 = vector.load %arg5[%c1_189, %c0_190, %c0_191] : memref<3x3x64xf32, #tpu.memory_space<vmem>>, vector<1x1x64xf32>
    %279 = vector.shape_cast %278 : vector<1x1x64xf32> to vector<64xf32>
    %280 = vector.shape_cast %279 : vector<64xf32> to vector<1x1x64xf32>
    %281 = vector.extract_strided_slice %277 {offsets = [0, 0, 0], sizes = [8, 16, 64], strides = [1, 1, 1]} : vector<8x18x64xf32> to vector<8x16x64xf32>
    %282 = vector.broadcast %280 : vector<1x1x64xf32> to vector<8x16x64xf32>
    %283 = arith.mulf %281, %282 : vector<8x16x64xf32>
    %284 = arith.addf %276, %283 : vector<8x16x64xf32>
    %c1_192 = arith.constant 1 : index
    %c1_193 = arith.constant 1 : index
    %c0_194 = arith.constant 0 : index
    %285 = vector.load %arg5[%c1_192, %c1_193, %c0_194] : memref<3x3x64xf32, #tpu.memory_space<vmem>>, vector<1x1x64xf32>
    %286 = vector.shape_cast %285 : vector<1x1x64xf32> to vector<64xf32>
    %287 = vector.shape_cast %286 : vector<64xf32> to vector<1x1x64xf32>
    %288 = vector.extract_strided_slice %277 {offsets = [0, 1, 0], sizes = [8, 16, 64], strides = [1, 1, 1]} : vector<8x18x64xf32> to vector<8x16x64xf32>
    %289 = vector.broadcast %287 : vector<1x1x64xf32> to vector<8x16x64xf32>
    %290 = arith.mulf %288, %289 : vector<8x16x64xf32>
    %291 = arith.addf %284, %290 : vector<8x16x64xf32>
    %c1_195 = arith.constant 1 : index
    %c2_196 = arith.constant 2 : index
    %c0_197 = arith.constant 0 : index
    %292 = vector.load %arg5[%c1_195, %c2_196, %c0_197] : memref<3x3x64xf32, #tpu.memory_space<vmem>>, vector<1x1x64xf32>
    %293 = vector.shape_cast %292 : vector<1x1x64xf32> to vector<64xf32>
    %294 = vector.shape_cast %293 : vector<64xf32> to vector<1x1x64xf32>
    %295 = vector.extract_strided_slice %277 {offsets = [0, 2, 0], sizes = [8, 16, 64], strides = [1, 1, 1]} : vector<8x18x64xf32> to vector<8x16x64xf32>
    %296 = vector.broadcast %294 : vector<1x1x64xf32> to vector<8x16x64xf32>
    %297 = arith.mulf %295, %296 : vector<8x16x64xf32>
    %298 = arith.addf %291, %297 : vector<8x16x64xf32>
    %c10_198 = arith.constant 10 : index
    %c0_199 = arith.constant 0 : index
    %c0_200 = arith.constant 0 : index
    %299 = vector.load %arg11[%c10_198, %c0_199, %c0_200] : memref<18x18x64xf32, #tpu.memory_space<vmem>>, vector<8x18x64xf32>
    %c2_201 = arith.constant 2 : index
    %c0_202 = arith.constant 0 : index
    %c0_203 = arith.constant 0 : index
    %300 = vector.load %arg5[%c2_201, %c0_202, %c0_203] : memref<3x3x64xf32, #tpu.memory_space<vmem>>, vector<1x1x64xf32>
    %301 = vector.shape_cast %300 : vector<1x1x64xf32> to vector<64xf32>
    %302 = vector.shape_cast %301 : vector<64xf32> to vector<1x1x64xf32>
    %303 = vector.extract_strided_slice %299 {offsets = [0, 0, 0], sizes = [8, 16, 64], strides = [1, 1, 1]} : vector<8x18x64xf32> to vector<8x16x64xf32>
    %304 = vector.broadcast %302 : vector<1x1x64xf32> to vector<8x16x64xf32>
    %305 = arith.mulf %303, %304 : vector<8x16x64xf32>
    %306 = arith.addf %298, %305 : vector<8x16x64xf32>
    %c2_204 = arith.constant 2 : index
    %c1_205 = arith.constant 1 : index
    %c0_206 = arith.constant 0 : index
    %307 = vector.load %arg5[%c2_204, %c1_205, %c0_206] : memref<3x3x64xf32, #tpu.memory_space<vmem>>, vector<1x1x64xf32>
    %308 = vector.shape_cast %307 : vector<1x1x64xf32> to vector<64xf32>
    %309 = vector.shape_cast %308 : vector<64xf32> to vector<1x1x64xf32>
    %310 = vector.extract_strided_slice %299 {offsets = [0, 1, 0], sizes = [8, 16, 64], strides = [1, 1, 1]} : vector<8x18x64xf32> to vector<8x16x64xf32>
    %311 = vector.broadcast %309 : vector<1x1x64xf32> to vector<8x16x64xf32>
    %312 = arith.mulf %310, %311 : vector<8x16x64xf32>
    %313 = arith.addf %306, %312 : vector<8x16x64xf32>
    %c2_207 = arith.constant 2 : index
    %c2_208 = arith.constant 2 : index
    %c0_209 = arith.constant 0 : index
    %314 = vector.load %arg5[%c2_207, %c2_208, %c0_209] : memref<3x3x64xf32, #tpu.memory_space<vmem>>, vector<1x1x64xf32>
    %315 = vector.shape_cast %314 : vector<1x1x64xf32> to vector<64xf32>
    %316 = vector.shape_cast %315 : vector<64xf32> to vector<1x1x64xf32>
    %317 = vector.extract_strided_slice %299 {offsets = [0, 2, 0], sizes = [8, 16, 64], strides = [1, 1, 1]} : vector<8x18x64xf32> to vector<8x16x64xf32>
    %318 = vector.broadcast %316 : vector<1x1x64xf32> to vector<8x16x64xf32>
    %319 = arith.mulf %317, %318 : vector<8x16x64xf32>
    %320 = arith.addf %313, %319 : vector<8x16x64xf32>
    %321 = vector.shape_cast %320 : vector<8x16x64xf32> to vector<128x64xf32>
    %322 = arith.truncf %321 : vector<128x64xf32> to vector<128x64xbf16>
    %c0_210 = arith.constant 0 : index
    %c0_211 = arith.constant 0 : index
    %323 = vector.load %arg6[%c0_210, %c0_211] : memref<64x64xbf16, #tpu.memory_space<vmem>>, vector<64x64xbf16>
    %cst_212 = arith.constant dense<0.000000e+00> : vector<128x64xf32>
    %324 = tpu.matmul %322, %323, %cst_212 {dimension_numbers = #tpu.dot_dimension_numbers<[1], [0], [0], [1], [0, 0, 1, 1], [], []>} : vector<128x64xbf16>, vector<64x64xbf16>, vector<128x64xf32> -> vector<128x64xf32>
    %c0_213 = arith.constant 0 : index
    %c8_214 = arith.constant 8 : index
    %c0_215 = arith.constant 0 : index
    %c0_216 = arith.constant 0 : index
    %325 = vector.load %arg1[%c0_213, %c8_214, %c0_215, %c0_216] : memref<1x16x16x32xf32, #tpu.memory_space<vmem>>, vector<1x8x16x32xf32>
    %326 = vector.shape_cast %325 : vector<1x8x16x32xf32> to vector<8x16x32xf32>
    %327 = vector.shape_cast %326 : vector<8x16x32xf32> to vector<128x32xf32>
    %328 = arith.truncf %327 : vector<128x32xf32> to vector<128x32xbf16>
    %c0_217 = arith.constant 0 : index
    %c0_218 = arith.constant 0 : index
    %329 = vector.load %arg7[%c0_217, %c0_218] : memref<32x64xbf16, #tpu.memory_space<vmem>>, vector<32x64xbf16>
    %cst_219 = arith.constant dense<0.000000e+00> : vector<128x64xf32>
    %330 = tpu.matmul %328, %329, %cst_219 {dimension_numbers = #tpu.dot_dimension_numbers<[1], [0], [0], [1], [0, 0, 1, 1], [], []>} : vector<128x32xbf16>, vector<32x64xbf16>, vector<128x64xf32> -> vector<128x64xf32>
    %331 = arith.addf %324, %330 : vector<128x64xf32>
    %c0_220 = arith.constant 0 : index
    %c0_221 = arith.constant 0 : index
    %332 = vector.load %arg8[%c0_220, %c0_221] : memref<1x64xf32, #tpu.memory_space<vmem>>, vector<1x64xf32>
    %333 = vector.broadcast %332 : vector<1x64xf32> to vector<128x64xf32>
    %334 = arith.addf %331, %333 : vector<128x64xf32>
    %335 = vector.shape_cast %334 : vector<128x64xf32> to vector<8x16x64xf32>
    %c0_222 = arith.constant 0 : index
    %c8_223 = arith.constant 8 : index
    %c0_224 = arith.constant 0 : index
    %c0_225 = arith.constant 0 : index
    %336 = vector.load %arg9[%c0_222, %c8_223, %c0_224, %c0_225] : memref<1x16x16x64xf32, #tpu.memory_space<vmem>>, vector<1x8x16x64xf32>
    %337 = vector.shape_cast %336 : vector<1x8x16x64xf32> to vector<8x16x64xf32>
    %338 = vector.shape_cast %335 : vector<8x16x64xf32> to vector<1x8x16x64xf32>
    tpu.vector_store %arg9[%c0_222, %c8_223, %c0_224, %c0_225], %338 {strides = array<i32>} : memref<1x16x16x64xf32, #tpu.memory_space<vmem>>, vector<1x8x16x64xf32>,
    return
  }
  func.func @transform_0(%arg0: i32) -> (i32, i32, i32, i32) {
    %c0_i32 = arith.constant 0 : i32
    %c0_i32_0 = arith.constant 0 : i32
    %c0_i32_1 = arith.constant 0 : i32
    %c0_i32_2 = arith.constant 0 : i32
    return %arg0, %c0_i32, %c0_i32_0, %c0_i32_1 : i32, i32, i32, i32
  }
  func.func @transform_1(%arg0: i32) -> (i32, i32, i32) {
    %c0_i32 = arith.constant 0 : i32
    %c0_i32_0 = arith.constant 0 : i32
    %c0_i32_1 = arith.constant 0 : i32
    %c0_i32_2 = arith.constant 0 : i32
    return %c0_i32, %c0_i32_0, %c0_i32_1 : i32, i32, i32
  }
  func.func @transform_2(%arg0: i32) -> (i32, i32) {
    %c0_i32 = arith.constant 0 : i32
    %c0_i32_0 = arith.constant 0 : i32
    %c0_i32_1 = arith.constant 0 : i32
    return %c0_i32, %c0_i32_0 : i32, i32
  }
  func.func @transform_3(%arg0: i32) -> (i32, i32) {
    %c0_i32 = arith.constant 0 : i32
    %c0_i32_0 = arith.constant 0 : i32
    %c0_i32_1 = arith.constant 0 : i32
    return %c0_i32, %c0_i32_0 : i32, i32
  }
  func.func @transform_4(%arg0: i32) -> (i32, i32, i32) {
    %c0_i32 = arith.constant 0 : i32
    %c0_i32_0 = arith.constant 0 : i32
    %c0_i32_1 = arith.constant 0 : i32
    %c0_i32_2 = arith.constant 0 : i32
    return %c0_i32, %c0_i32_0, %c0_i32_1 : i32, i32, i32
  }
  func.func @transform_5(%arg0: i32) -> (i32, i32) {
    %c0_i32 = arith.constant 0 : i32
    %c0_i32_0 = arith.constant 0 : i32
    %c0_i32_1 = arith.constant 0 : i32
    return %c0_i32, %c0_i32_0 : i32, i32
  }
  func.func @transform_6(%arg0: i32) -> (i32, i32) {
    %c0_i32 = arith.constant 0 : i32
    %c0_i32_0 = arith.constant 0 : i32
    %c0_i32_1 = arith.constant 0 : i32
    return %c0_i32, %c0_i32_0 : i32, i32
  }
  func.func @transform_7(%arg0: i32) -> (i32, i32) {
    %c0_i32 = arith.constant 0 : i32
    %c0_i32_0 = arith.constant 0 : i32
    %c0_i32_1 = arith.constant 0 : i32
    return %c0_i32, %c0_i32_0 : i32, i32
  }
  func.func @transform_8(%arg0: i32) -> (i32, i32, i32, i32) {
    %c0_i32 = arith.constant 0 : i32
    %c0_i32_0 = arith.constant 0 : i32
    %c0_i32_1 = arith.constant 0 : i32
    %c0_i32_2 = arith.constant 0 : i32
    return %arg0, %c0_i32, %c0_i32_0, %c0_i32_1 : i32, i32, i32, i32
  }
}

</mosaic_0001>

<bundles_post_ra>
// kernel: block_forward_nchw.1
= control target key start
LH: loop header
LB: loop body
LE: loop exit
PB: predicated region body
PF: predicated region fallthrough
CT: control target
= control target key end

     0   :  { %13 = vsyncpa [#allocation5], 0  ;;  %s8935_s0 = inlined_call_operand.hbm [shape: f32[2,16,16,32], index: 0, kind: input, shape index: {}]   ;;  %s8936_s1 = inlined_call_operand.vmem [shape: f32[3,3,32], index: 1, kind: input, shape index: {}]   ;;  %s8937_s2 = inlined_call_operand.vmem [shape: bf16[32,64], index: 2, kind: input, shape index: {}]   ;;  %s8938_s3 = inlined_call_operand.vmem [shape: f32[1,64], index: 3, kind: input, shape index: {}]   ;;  %s8939_s4 = inlined_call_operand.vmem [shape: f32[3,3,64], index: 4, kind: input, shape index: {}]   ;;  %s8940_s5 = inlined_call_operand.vmem [shape: bf16[64,64], index: 5, kind: input, shape index: {}]   ;;  %s8941_s6 = inlined_call_operand.vmem [shape: bf16[32,64], index: 6, kind: input, shape index: {}]   ;;  %s8942_s7 = inlined_call_operand.vmem [shape: f32[1,64], index: 7, kind: input, shape index: {}]   ;;  %s8943_s8 = inlined_call_operand.hbm [shape: f32[2,16,16,64], index: 8, kind: output, shape index: {}]  }
   0x1   :  { %15 = vsyncpa [#allocation5 + $0x1], 0 }
   0x2   :  { %16 = vsyncpa [#allocation6], 0 }
   0x3   :  { %18 = vsyncpa [#allocation6 + $0x1], 0  ;;  %s5987_s27 = smov 0   ;;  %s5989_s28 = smov 0  }
   0x4   :  { %s5991_s29 = smov 0   ;;  %s5993_s30 = smov 0  }
   0x5 LB: > { %s6008_s9 = sadd.s32 4294967295, %s5933_s30   ;;  %s5368_s10 = sadd.s32 4294967294, %s5933_s30   ;;  %s5933_s30 = sphi %s5993_s30, %s8960_s30   ;;  %s5929_s29 = sphi %s5991_s29, %s8959_s29   ;;  %s5925_s28 = sphi %s5989_s28, %s8958_s28   ;;  %s5921_s27 = sphi %s5987_s27, %s8957_s27  }
   0x6   : > { %s6012_s11 = sadd.s32 1, %s5933_s30   ;;  %s31_s12 = sadd.s32 1, %s5929_s29 }
   0x7   : > { %s28_s13 = ssub.s32 %s5933_s30, %s6012_s11  ;;  %p38_p0 = scmp.ne.s32.totalorder %s5929_s29, %s5925_s28 }
   0x8   : > { %p29_p1 = scmp.eq.s32.totalorder %s28_s13, 0  ;;  %p39_p2 = scmp.eq.s32.totalorder %s5933_s30, 0 }
   0x9   : > { %p44_p3 = scmp.ne.s32.totalorder %s5925_s28, %s5921_s27  ;;  %p45_p4 = scmp.eq.s32.totalorder %s6008_s9, 0 }
   0xa   : > { %s6024_s14 = scalar_select %p29_p1, %s5929_s29, %s31_s12  }
   0xb   : > { %p6026_p5 = por %p39_p2, %p38_p0  ;;  %p6030_p6 = por %p45_p4, %p44_p3 }
   0xc   : > { %8946 = sst [smem:[#allocation10_spill]] %s6024_s14  ;;  %p215_p7 = scmp.eq.s32.totalorder %s6008_s9, 1 }
   0xd   : > { %s8948_s16 = scalar_select %p6030_p6, 1, 0 }
   0xe   : > { %p221_p8 = scmp.eq.s32.totalorder %s5368_s10, 1  ;;  %p5748_p10 = scmp.lt.s32.totalorder %s5933_s30, 2 }
   0xf   : > { %p6037_p11 = por %p215_p7, %p38_p0  ;;  %s262_s19 = sand.u32 1, %s5929_s29  }
  0x10   : > { %p6041_p12 = por %p221_p8, %p44_p3  ;;  %s5542_s20 = sshll.u32 %s5933_s30, 12 }
  0x11   : > { %s8949_s17 = scalar_select %p6037_p11, 1, 0 }
  0x12   : > { %s8950_s18 = scalar_select %p6041_p12, 1, 0 }
  0x13   : > { %s5371_s21 = sshll.u32 %s262_s19, 8  ;;  %s6050_s24 = scalar_lea.hbm %s8935_s0, %s5542_s20 }
  0x14   : > { %s266_s25 = scalar_lea.vmem [#allocation4], %s5371_s21  ;;  %p6054_p13 = pnand %p5748_p10, %p6026_p5 }
  0x15   : > { %s273_s26 = sshll.u32 %s266_s25, 4  ;;  %s6060_s12 = scalar_lea.sflag [#allocation5], %s262_s19  ;;  %s6058_s26 = int_to_ptr.vmem [resolvable:$true] %s273_s26 }
  0x16   : > { %s5841_s13 = scalar_lea.hbm %s6050_s24, 4096  ;;  %p5843_p1 = pneg %p6054_p13 }
  0x17   : > { %p5842_p0 = scmp.ne.s32.totalorder %s6050_s24, %s5841_s13  ;;  %s5846_s21 = scalar_lea.hbm %s8935_s0, 8192 }
  0x18   : > { %p5847_p4 = scmp.lt.s32.totalorder %s6050_s24, %s8935_s0  ;;  %p5848_p5 = scmp.lt.s32.totalorder %s5846_s21, %s5841_s13 }
  0x19   : > { %p5844_p2 = pnand %p5843_p1, %p5842_p0 }
  0x1a   : > { %p5849_p7 = por %p5848_p5, %p5847_p4 }
  0x1b   : > { %p5845_p3 = pneg %p5844_p2 }
  0x1d   : > { %p5850_p8 = pnand %p5849_p7, %p5845_p3 }
  0x1f   : > { %5853 = shalt.err (!%p5850_p8)
}
  0x20   : > { %s5854_s19 = scalar_lea.vmem %s6058_s26, 4096  ;;  %s5935_s25 = smov [#allocation4]  }
  0x21   : > { %p5855_p10 = scmp.ne.s32.totalorder %s6058_s26, %s5854_s19  ;;  %s5859_s14 = sshll.u32 %s5935_s25, 4  ;;  %s5860_s14 = int_to_ptr.vmem [resolvable:$false] %s5859_s14 }
  0x22   : > { %s5861_s20 = scalar_lea.vmem %s5860_s14, 8192  ;;  %p5862_p2 = scmp.lt.s32.totalorder %s6058_s26, %s5860_s14 }
  0x23   : > { %p5857_p9 = pnand %p5855_p10, %p5843_p1  ;;  %p5863_p12 = scmp.lt.s32.totalorder %s5861_s20, %s5854_s19 }
  0x25   : > { %p5858_p0 = pneg %p5857_p9  ;;  %p5864_p11 = por %p5863_p12, %p5862_p2 }
  0x27   : > { %p5865_p6 = pnand %p5864_p11, %p5858_p0 }
  0x29   : > { %5868 = shalt.err (!%p5865_p6)
}
  0x2a   : > { %s5936_s13 = smov 128   ;;  %s5937_s22 = smov 8  }
  0x2b   : > { %5743 = dma.hbm_to_vmem [thread:$0]  (!%p6054_p13), %s6050_s24, 4096, %s6058_s26, %s6060_s12, %s5936_s13, %s5936_s13, %s5937_s22  }
  0x2c   : > { %p5374_p9 = scmp.ge.s32.totalorder %s5933_s30, 1  ;;  %p281_p1 = scmp.lt.s32.totalorder %s5933_s30, 3 }
  0x2e   : > { %p282_p3 = pnand %p5374_p9, %p281_p1 }
  0x2f   : > { %s6084_s14 = sand.u32 (!%p282_p3), 1, %s5925_s28   ;;  %p8952_p6 = scmp.ne.s32.totalorder (!%p282_p3), %s8948_s16, 0 }
  0x30   : > { %285 = sbr.rel (%p282_p3) target bundleno = 915 (0x393), region = 52  ;;  %s5375_s21 = sshll.u32 (!%p282_p3), %s6084_s14, 8 }
  0x31   : > { %s288_s15 = scalar_lea.sflag (!%p282_p3), [#allocation5], %s6084_s14  ;;  %s6090_s23 = scalar_lea.vmem (!%p282_p3), [#allocation4], %s5375_s21 }
  0x35   : > { %5912 = dma.done.wait (%p8952_p6), %s288_s15, 4096  }
  0x36   : > { %5914 = vsyncadd (%p8952_p6), %s288_s15, 4294963200  ;;  %vm325_vm0 = vcmask 261120   ;;  %vm328_vm1 = vcmask 254976   ;;  %vm335_vm2 = vcmask 253952   ;;  %v5938_v0 = vmov 0.0   ;;  %v5787_v1 = vld [vmem:[%s8937_s2 + $0x8] sm:$0xff]  }
  0x37   : > { %326 = vst.msk [vmem:[#allocation2] sm:$0xff] %vm325_vm0, %v5938_v0  ;;  %327 = vst.msk [vmem:[#allocation2 + $0x8] sm:$0xff] %vm325_vm0, %v5938_v0  ;;  %v5788_v2 = vld [vmem:[%s8937_s2] sm:$0xff]   ;;  %5608 = vmatprep.subr.bf16.mxu0 %v5787_v1  ;;  %v412_v4 = vld [vmem:[%s6090_s23 + $0x8] sm:$0xff]  ;;  %vm605_vm3 = vcmask 1046528   ;;  %vm731_vm4 = vcmask 1045504  }
  0x38   : > { %329 = vst.msk [vmem:[#allocation2 + $0x10] sm:$0x3] %vm328_vm1, %v5938_v0  ;;  %333 = vst.msk [vmem:[#allocation2 + $0x1a8] sm:$0x3] %vm328_vm1, %v5938_v0  ;;  %v411_v3 = vld [vmem:[%s6090_s23] sm:$0xff]  ;;  %v413_v5 = vld [vmem:[%s6090_s23 + $0x10] sm:$0xff]  ;;  %5609 = vmatpush3.bf16.msra.mxu0 %v5787_v1 }
  0x39   : > { %336 = vst.msk [vmem:[#allocation2 + $0x18] sm:$0x1] %vm335_vm2, %v5938_v0  ;;  %337 = vst.msk [vmem:[#allocation2 + $0x30] sm:$0x1] %vm335_vm2, %v5938_v0  ;;  %v414_v6 = vld [vmem:[%s6090_s23 + $0x18] sm:$0xff]  ;;  %v443_v7 = vmax.f32 %v411_v3, 0.0  ;;  %5610 = vmatprep.subr.bf16.mxu0 %v5788_v2 }
  0x3a   : > { %352 = vst.msk [vmem:[#allocation2 + $0x29] sm:$0x1] %vm335_vm2, %v5938_v0  ;;  %353 = vst.msk [vmem:[#allocation2 + $0x41] sm:$0x1] %vm335_vm2, %v5938_v0  ;;  %v444_v8 = vmax.f32 %v412_v4, 0.0  ;;  %v445_v9 = vmax.f32 %v413_v5, 0.0 }
  0x3b   : > { %331 = vst.msk [vmem:[#allocation2 + $0x198] sm:$0xff] %vm325_vm0, %v5938_v0  ;;  %332 = vst.msk [vmem:[#allocation2 + $0x1a0] sm:$0xff] %vm325_vm0, %v5938_v0  ;;  %v446_v12 = vmax.f32 %v414_v6, 0.0  ;;  %v6183_v14 = vld [vmem:[%s8936_s1] ss:$0 sm:$0xff]  ;;  %v416_v26 = vld [vmem:[%s6090_s23 + $0x28] sm:$0xff] }
  0x3c   : > { %338 = vst.msk [vmem:[#allocation2 + $0x48] sm:$0x1] %vm335_vm2, %v5938_v0  ;;  %339 = vst.msk [vmem:[#allocation2 + $0x60] sm:$0x1] %vm335_vm2, %v5938_v0  ;;  %v415_v15 = vld [vmem:[%s6090_s23 + $0x20] sm:$0xff]  ;;  %5611 = vmatpush3.bf16.msra.mxu0 %v5788_v2  ;;  %v417_v33 = vld [vmem:[%s6090_s23 + $0x30] sm:$0xff] }
  0x3d   : > { %340 = vst.msk [vmem:[#allocation2 + $0x78] sm:$0x1] %vm335_vm2, %v5938_v0  ;;  %341 = vst.msk [vmem:[#allocation2 + $0x90] sm:$0x1] %vm335_vm2, %v5938_v0  ;;  %v6193_v17 = vld [vmem:[%s8936_s1 + $0x1] ss:$0 sm:$0xff] }
  0x3e   : > { %342 = vst.msk [vmem:[#allocation2 + $0xa8] sm:$0x1] %vm335_vm2, %v5938_v0  ;;  %343 = vst.msk [vmem:[#allocation2 + $0xc0] sm:$0x1] %vm335_vm2, %v5938_v0  ;;  %v507_v10 = vld [vmem:[#allocation2] sm:$0xff]  ;;  %v508_v11 = vld [vmem:[#allocation2 + $0x8] sm:$0xff] }
  0x3f   : > { %344 = vst.msk [vmem:[#allocation2 + $0xd8] sm:$0x1] %vm335_vm2, %v5938_v0  ;;  %345 = vst.msk [vmem:[#allocation2 + $0xf0] sm:$0x1] %vm335_vm2, %v5938_v0  ;;  %v509_v13 = vld [vmem:[#allocation2 + $0x10] sm:$0x3]  ;;  %v536_v16 = vmul.f32 %v6183_v14, %v507_v10  ;;  %v557_v19 = vmul.f32 %v6193_v17, %v507_v10  ;;  %v558_v20 = vmul.f32 %v6193_v17, %v508_v11 }
  0x40   : > { %346 = vst.msk [vmem:[#allocation2 + $0x108] sm:$0x1] %vm335_vm2, %v5938_v0  ;;  %347 = vst.msk [vmem:[#allocation2 + $0x120] sm:$0x1] %vm335_vm2, %v5938_v0  ;;  %v6198_v18 = vld [vmem:[%s8936_s1 + $0x2] ss:$0 sm:$0xff]  ;;  %v559_v21 = vmul.f32 %v6193_v17, %v509_v13  ;;  %v537_v23 = vmul.f32 %v6183_v14, %v508_v11 }
  0x41   : > { %348 = vst.msk [vmem:[#allocation2 + $0x138] sm:$0x1] %vm335_vm2, %v5938_v0  ;;  %349 = vst.msk [vmem:[#allocation2 + $0x150] sm:$0x1] %vm335_vm2, %v5938_v0  ;;  %v683_v22 = vmul.f32 %v6198_v18, %v507_v10  ;;  %v684_v24 = vmul.f32 %v6198_v18, %v508_v11  ;;  %v685_v25 = vmul.f32 %v6198_v18, %v509_v13  ;;  %v447_v27 = vmax.f32 %v415_v15, 0.0  ;;  %v418_v34 = vld [vmem:[%s6090_s23 + $0x38] sm:$0xff] }
  0x42   : > { %350 = vst.msk [vmem:[#allocation2 + $0x168] sm:$0x1] %vm335_vm2, %v5938_v0  ;;  %351 = vst.msk [vmem:[#allocation2 + $0x180] sm:$0x1] %vm335_vm2, %v5938_v0  ;;  %v606_v28 = vrot.slane %v557_v19, 1  ;;  %v607_v29 = vrot.slane %v558_v20, 1 }
  0x43   : > { %354 = vst.msk [vmem:[#allocation2 + $0x59] sm:$0x1] %vm335_vm2, %v5938_v0  ;;  %355 = vst.msk [vmem:[#allocation2 + $0x71] sm:$0x1] %vm335_vm2, %v5938_v0  ;;  %v609_v30 = vrot.slane %v559_v21, 1  ;;  %v732_v31 = vrot.slane %v683_v22, 2 }
  0x44   : > { %356 = vst.msk [vmem:[#allocation2 + $0x89] sm:$0x1] %vm335_vm2, %v5938_v0  ;;  %357 = vst.msk [vmem:[#allocation2 + $0xa1] sm:$0x1] %vm335_vm2, %v5938_v0  ;;  %v6212_v32 = vld [vmem:[%s8936_s1 + $0x4] ss:$0 sm:$0xff]  ;;  %v608_v43 = vsel %vm605_vm3, %v606_v28, %v607_v29 }
  0x45   : > { %358 = vst.msk [vmem:[#allocation2 + $0xb9] sm:$0x1] %vm335_vm2, %v5938_v0  ;;  %359 = vst.msk [vmem:[#allocation2 + $0xd1] sm:$0x1] %vm335_vm2, %v5938_v0  ;;  %v733_v35 = vrot.slane %v684_v24, 2  ;;  %v735_v36 = vrot.slane %v685_v25, 2  ;;  %v610_v44 = vsel %vm605_vm3, %v607_v29, %v609_v30  ;;  %v662_v47 = vadd.f32 %v608_v43, %v536_v16 }
  0x46   : > { %360 = vst.msk [vmem:[#allocation2 + $0xe9] sm:$0x1] %vm335_vm2, %v5938_v0  ;;  %361 = vst.msk [vmem:[#allocation2 + $0x101] sm:$0x1] %vm335_vm2, %v5938_v0  ;;  %v6219_v37 = vld [vmem:[%s8936_s1 + $0x5] ss:$0 sm:$0xff]  ;;  %v663_v48 = vadd.f32 %v610_v44, %v537_v23 }
  0x47   : > { %362 = vst.msk [vmem:[#allocation2 + $0x119] sm:$0x1] %vm335_vm2, %v5938_v0  ;;  %363 = vst.msk [vmem:[#allocation2 + $0x131] sm:$0x1] %vm335_vm2, %v5938_v0  ;;  %v6224_v38 = vld [vmem:[%s8936_s1 + $0x6] ss:$0 sm:$0xff]  ;;  %v734_v49 = vsel %vm731_vm4, %v732_v31, %v733_v35  ;;  %v736_v50 = vsel %vm731_vm4, %v733_v35, %v735_v36 }
  0x48   : > { %364 = vst.msk [vmem:[#allocation2 + $0x149] sm:$0x1] %vm335_vm2, %v5938_v0  ;;  %365 = vst.msk [vmem:[#allocation2 + $0x161] sm:$0x1] %vm335_vm2, %v5938_v0  ;;  %v448_v39 = vmax.f32 %v416_v26, 0.0  ;;  %v449_v40 = vmax.f32 %v417_v33, 0.0  ;;  %v788_v56 = vadd.f32 %v734_v49, %v662_v47  ;;  %v789_v57 = vadd.f32 %v736_v50, %v663_v48 }
  0x49   : > { %366 = vst.msk [vmem:[#allocation2 + $0x179] sm:$0x1] %vm335_vm2, %v5938_v0  ;;  %367 = vst.msk [vmem:[#allocation2 + $0x191] sm:$0x1] %vm335_vm2, %v5938_v0  ;;  %v419_v41 = vld [vmem:[%s6090_s23 + $0x40] sm:$0xff]  ;;  %v420_v42 = vld [vmem:[%s6090_s23 + $0x48] sm:$0xff] }
  0x4a   : > { %475 = vst.msk [vmem:[#allocation2 + $0x19] sm:$0xff] %vm325_vm0, %v443_v7  ;;  %476 = vst.msk [vmem:[#allocation2 + $0x21] sm:$0xff] %vm325_vm0, %v444_v8  ;;  %v450_v45 = vmax.f32 %v418_v34, 0.0  ;;  %v451_v46 = vmax.f32 %v419_v41, 0.0  ;;  %v5789_v51 = vld [vmem:[%s8937_s2 + $0x8] sm:$0xff]   ;;  %v452_v55 = vmax.f32 %v420_v42, 0.0 }
  0x4b   : > { %477 = vst.msk [vmem:[#allocation2 + $0x31] sm:$0xff] %vm325_vm0, %v445_v9  ;;  %478 = vst.msk [vmem:[#allocation2 + $0x39] sm:$0xff] %vm325_vm0, %v446_v12  ;;  %5628 = vmatprep.subr.bf16.mxu1 %v5789_v51  ;;  %v6258_v1 = vld [vmem:[%s8936_s1 + $0x8] ss:$0 sm:$0xff]  ;;  %v6267_v6 = vld [vmem:[%s8936_s1 + $0x9] ss:$0 sm:$0xff] }
  0x4c   : > { %479 = vst.msk [vmem:[#allocation2 + $0x49] sm:$0xff] %vm325_vm0, %v447_v27  ;;  %480 = vst.msk [vmem:[#allocation2 + $0x51] sm:$0xff] %vm325_vm0, %v448_v39  ;;  %5629 = vmatpush3.bf16.msra.mxu1 %v5789_v51  ;;  %v5790_v7 = vld [vmem:[%s8937_s2] sm:$0xff]   ;;  %v6283_v22 = vld [vmem:[%s8936_s1 + $0xa] ss:$0 sm:$0xff]  ;;  %vm368_vm5 = vcmask 523264  }
  0x4d   : > { %481 = vst.msk [vmem:[#allocation2 + $0x61] sm:$0xff] %vm325_vm0, %v449_v40  ;;  %482 = vst.msk [vmem:[#allocation2 + $0x69] sm:$0xff] %vm325_vm0, %v450_v45  ;;  %5630 = vmatprep.subr.bf16.mxu1 %v5790_v7  ;;  %vm378_vm6 = vcmask 516096   ;;  %vm371_vm7 = vcmask 517120   ;;  %s8784_s10 = scalar_lea.vmem [#allocation7], %s5375_s21  ;;  %s5543_s21 = sshll.u32 %s6008_s9, 12 }
  0x4e   : > { %483 = vst.msk [vmem:[#allocation2 + $0x79] sm:$0xff] %vm325_vm0, %v451_v46  ;;  %484 = vst.msk [vmem:[#allocation2 + $0x81] sm:$0xff] %vm325_vm0, %v452_v55  ;;  %s5295_s12 = sshll.u32 %s8784_s10, 4  ;;  %s8885_s20 = scalar_lea.hbm %s8943_s8, %s5543_s21  ;;  %s8887_s12 = int_to_ptr.vmem [resolvable:$true] %s5295_s12 }
  0x4f   : > { %369 = vst.msk [vmem:[#allocation3] sm:$0xff] %vm368_vm5, %v5938_v0  ;;  %370 = vst.msk [vmem:[#allocation3 + $0x8] sm:$0xff] %vm368_vm5, %v5938_v0  ;;  %s5282_s9 = scalar_lea.sflag [#allocation6], %s6084_s14  ;;  %s5869_s13 = scalar_lea.vmem %s8887_s12, 4096 }
  0x50   : > { %5631 = vmatpush3.bf16.msra.mxu1 %v5790_v7  ;;  %374 = vst.msk [vmem:[#allocation3 + $0x198] sm:$0xff] %vm368_vm5, %v5938_v0  ;;  %375 = vst.msk [vmem:[#allocation3 + $0x1a0] sm:$0xff] %vm368_vm5, %v5938_v0  ;;  %p5870_p11 = scmp.ne.s32.totalorder %s8887_s12, %s5869_s13  ;;  %p8953_p12 = scmp.ne.s32.totalorder %s8949_s17, 0 }
  0x51   : > { %v6238_v52 = vld [vmem:[#allocation2 + $0x18] sm:$0xff]  ;;  %v6240_v53 = vld [vmem:[#allocation2 + $0x20] sm:$0xff]  ;;  %v806_v54 = vld [vmem:[#allocation2 + $0x28] sm:$0x3]  ;;  %379 = vst.msk [vmem:[#allocation3 + $0x18] sm:$0x1] %vm378_vm6, %v5938_v0 }
  0x52   : > { %v834_v58 = vmul.f32 %v6212_v32, %v6238_v52  ;;  %v835_v59 = vmul.f32 %v6212_v32, %v6240_v53  ;;  %v871_v60 = vmul.f32 %v6219_v37, %v6238_v52  ;;  %v872_v61 = vmul.f32 %v6219_v37, %v6240_v53  ;;  %v6272_v12 = vld [vmem:[#allocation2 + $0x30] sm:$0xff]  ;;  %v6274_v13 = vld [vmem:[#allocation2 + $0x38] sm:$0xff]  ;;  %v1119_v19 = vld [vmem:[#allocation2 + $0x40] sm:$0x3]  ;;  %380 = vst.msk [vmem:[#allocation3 + $0x30] sm:$0x1] %vm378_vm6, %v5938_v0  ;;  %p5871_p13 = pnand %p5870_p11, %p8953_p12 }
  0x53   : > { %v873_v62 = vmul.f32 %v6219_v37, %v806_v54  ;;  %v996_v63 = vmul.f32 %v6224_v38, %v6238_v52  ;;  %v997_v4 = vmul.f32 %v6224_v38, %v6240_v53  ;;  %v998_v5 = vmul.f32 %v6224_v38, %v806_v54  ;;  %v512_v50 = vld [vmem:[#allocation2 + $0x28] sm:$0x3]  ;;  %381 = vst.msk [vmem:[#allocation3 + $0x48] sm:$0x1] %vm378_vm6, %v5938_v0  ;;  %s5939_s22 = smov [#allocation7]  }
  0x54   : > { %v850_v2 = vadd.f32 %v834_v58, %v788_v56  ;;  %v851_v3 = vadd.f32 %v835_v59, %v789_v57  ;;  %v919_v8 = vrot.slane %v871_v60, 1  ;;  %v920_v9 = vrot.slane %v872_v61, 1  ;;  %382 = vst.msk [vmem:[#allocation3 + $0x60] sm:$0x1] %vm378_vm6, %v5938_v0  ;;  %383 = vst.msk [vmem:[#allocation3 + $0x78] sm:$0x1] %vm378_vm6, %v5938_v0  ;;  %p5872_p4 = pneg %p5871_p13 }
  0x55   : > { %v922_v10 = vrot.slane %v873_v62, 1  ;;  %v1044_v11 = vrot.slane %v996_v63, 2  ;;  %v1045_v15 = vrot.slane %v997_v4, 2  ;;  %v1047_v16 = vrot.slane %v998_v5, 2  ;;  %384 = vst.msk [vmem:[#allocation3 + $0x90] sm:$0x1] %vm378_vm6, %v5938_v0 }
  0x56   : > { %v1147_v20 = vmul.f32 %v6258_v1, %v6272_v12  ;;  %v1148_v21 = vmul.f32 %v6258_v1, %v6274_v13  ;;  %v921_v23 = vsel %vm605_vm3, %v919_v8, %v920_v9  ;;  %v1184_v25 = vmul.f32 %v6267_v6, %v6272_v12  ;;  %385 = vst.msk [vmem:[#allocation3 + $0xa8] sm:$0x1] %vm378_vm6, %v5938_v0  ;;  %s5873_s15 = sshll.u32 %s5939_s22, 4  ;;  %s5874_s15 = int_to_ptr.vmem [resolvable:$false] %s5873_s15 }
  0x57   : > { %v923_v24 = vsel %vm605_vm3, %v920_v9, %v922_v10  ;;  %v1185_v26 = vmul.f32 %v6267_v6, %v6274_v13  ;;  %v975_v27 = vadd.f32 %v921_v23, %v850_v2  ;;  %v1046_v29 = vsel %vm731_vm4, %v1044_v11, %v1045_v15  ;;  %v809_v11 = vld [vmem:[#allocation2 + $0x40] sm:$0x3]  ;;  %386 = vst.msk [vmem:[#allocation3 + $0xc0] sm:$0x1] %vm378_vm6, %v5938_v0  ;;  %s5875_s16 = scalar_lea.vmem %s5874_s15, 8192  ;;  %p5876_p5 = scmp.lt.s32.totalorder %s8887_s12, %s5874_s15 }
  0x58   : > { %v976_v28 = vadd.f32 %v923_v24, %v851_v3  ;;  %v1048_v30 = vsel %vm731_vm4, %v1045_v15, %v1047_v16  ;;  %v1186_v31 = vmul.f32 %v6267_v6, %v1119_v19  ;;  %v1232_v33 = vrot.slane %v1184_v25, 1  ;;  %387 = vst.msk [vmem:[#allocation3 + $0xd8] sm:$0x1] %vm378_vm6, %v5938_v0  ;;  %388 = vst.msk [vmem:[#allocation3 + $0xf0] sm:$0x1] %vm378_vm6, %v5938_v0  ;;  %p5877_p7 = scmp.lt.s32.totalorder %s5875_s16, %s5869_s13 }
  0x59   : > { %v1233_v34 = vrot.slane %v1185_v26, 1  ;;  %v1309_v35 = vmul.f32 %v6283_v22, %v6272_v12  ;;  %v1100_v36 = vadd.f32 %v1046_v29, %v975_v27  ;;  %v1310_v40 = vmul.f32 %v6283_v22, %v6274_v13  ;;  %389 = vst.msk [vmem:[#allocation3 + $0x108] sm:$0x1] %vm378_vm6, %v5938_v0  ;;  %390 = vst.msk [vmem:[#allocation3 + $0x120] sm:$0x1] %vm378_vm6, %v5938_v0 }
  0x5a   : > { %v1101_v39 = vadd.f32 %v1048_v30, %v976_v28  ;;  %v1311_v41 = vmul.f32 %v6283_v22, %v1119_v19  ;;  %v1235_v43 = vrot.slane %v1186_v31, 1  ;;  %v538_v45 = vmul.f32 %v6183_v14, %v6238_v52  ;;  %391 = vst.msk [vmem:[#allocation3 + $0x138] sm:$0x1] %vm378_vm6, %v5938_v0  ;;  %392 = vst.msk [vmem:[#allocation3 + $0x150] sm:$0x1] %vm378_vm6, %v5938_v0  ;;  %p5878_p8 = por %p5877_p7, %p5876_p5 }
  0x5b   : > { %v1234_v42 = vsel %vm605_vm3, %v1232_v33, %v1233_v34  ;;  %v1357_v44 = vrot.slane %v1309_v35, 2  ;;  %v1163_v46 = vadd.f32 %v1147_v20, %v1100_v36  ;;  %v1358_v48 = vrot.slane %v1310_v40, 2  ;;  %393 = vst.msk [vmem:[#allocation3 + $0x168] sm:$0x1] %vm378_vm6, %v5938_v0  ;;  %394 = vst.msk [vmem:[#allocation3 + $0x180] sm:$0x1] %vm378_vm6, %v5938_v0 }
  0x5c   : > { %v1164_v47 = vadd.f32 %v1148_v21, %v1101_v39  ;;  %v1360_v49 = vrot.slane %v1311_v41, 2  ;;  %v1236_v51 = vsel %vm605_vm3, %v1233_v34, %v1235_v43  ;;  %v539_v54 = vmul.f32 %v6183_v14, %v6240_v53  ;;  %v1122_v34 = vld [vmem:[#allocation2 + $0x58] sm:$0x3]  ;;  %v6336_v41 = vld [vmem:[#allocation2 + $0x48] sm:$0xff]  ;;  %395 = vst.msk [vmem:[#allocation3 + $0x29] sm:$0x1] %vm378_vm6, %v5938_v0  ;;  %p5879_p10 = pnand %p5878_p8, %p5872_p4 }
  0x5d   : > { %v560_v55 = vmul.f32 %v6193_v17, %v6238_v52  ;;  %v561_v56 = vmul.f32 %v6193_v17, %v6240_v53  ;;  %v1288_v57 = vadd.f32 %v1234_v42, %v1163_v46  ;;  %v1359_v59 = vsel %vm731_vm4, %v1357_v44, %v1358_v48  ;;  %396 = vst.msk [vmem:[#allocation3 + $0x41] sm:$0x1] %vm378_vm6, %v5938_v0 }
  0x5e   : > { %v1289_v58 = vadd.f32 %v1236_v51, %v1164_v47  ;;  %v1361_v60 = vsel %vm731_vm4, %v1358_v48, %v1360_v49  ;;  %v562_v61 = vmul.f32 %v6193_v17, %v512_v50  ;;  %v686_v2 = vmul.f32 %v6198_v18, %v6238_v52  ;;  %397 = vst.msk [vmem:[#allocation3 + $0x59] sm:$0x1] %vm378_vm6, %v5938_v0 }
  0x5f   : > { %v611_v62 = vrot.slane %v560_v55, 1  ;;  %v612_v63 = vrot.slane %v561_v56, 1  ;;  %v1413_v3 = vadd.f32 %v1359_v59, %v1288_v57  ;;  %v687_v5 = vmul.f32 %v6198_v18, %v6240_v53  ;;  %398 = vst.msk [vmem:[#allocation3 + $0x71] sm:$0x1] %vm378_vm6, %v5938_v0  ;;  %399 = vst.msk [vmem:[#allocation3 + $0x89] sm:$0x1] %vm378_vm6, %v5938_v0 }
  0x60   : > { %v1414_v4 = vadd.f32 %v1361_v60, %v1289_v58  ;;  %v688_v7 = vmul.f32 %v6198_v18, %v512_v50  ;;  %v614_v9 = vrot.slane %v562_v61, 1  ;;  %v737_v10 = vrot.slane %v686_v2, 2  ;;  %400 = vst.msk [vmem:[#allocation3 + $0xa1] sm:$0x1] %vm378_vm6, %v5938_v0  ;;  %401 = vst.msk [vmem:[#allocation3 + $0xb9] sm:$0x1] %vm378_vm6, %v5938_v0 }
  0x61   : > { %v613_v8 = vsel %vm605_vm3, %v611_v62, %v612_v63  ;;  %v836_v15 = vmul.f32 %v6212_v32, %v6272_v12  ;;  %v738_v20 = vrot.slane %v687_v5, 2  ;;  %v837_v23 = vmul.f32 %v6212_v32, %v6274_v13  ;;  %402 = vst.msk [vmem:[#allocation3 + $0xd1] sm:$0x1] %vm378_vm6, %v5938_v0  ;;  %403 = vst.msk [vmem:[#allocation3 + $0xe9] sm:$0x1] %vm378_vm6, %v5938_v0 }
  0x62   : > { %v1429_v16 = vpack.c.bf16 %v1414_v4, %v1413_v3  ;;  %v664_v19 = vadd.f32 %v613_v8, %v538_v45  ;;  %v740_v21 = vrot.slane %v688_v7, 2  ;;  %v615_v52 = vsel %vm605_vm3, %v612_v63, %v614_v9  ;;  %v6339_v45 = vld [vmem:[#allocation2 + $0x50] sm:$0xff]  ;;  %404 = vst.msk [vmem:[#allocation3 + $0x101] sm:$0x1] %vm378_vm6, %v5938_v0  ;;  %405 = vst.msk [vmem:[#allocation3 + $0x119] sm:$0x1] %vm378_vm6, %v5938_v0 }
  0x63   : > { %v874_v53 = vmul.f32 %v6219_v37, %v6272_v12  ;;  %v875_v24 = vmul.f32 %v6219_v37, %v6274_v13  ;;  %v665_v25 = vadd.f32 %v615_v52, %v539_v54  ;;  %v739_v26 = vsel %vm731_vm4, %v737_v10, %v738_v20  ;;  %406 = vst.msk [vmem:[#allocation3 + $0x131] sm:$0x1] %vm378_vm6, %v5938_v0 }
  0x64   : > { %5612 = vmatprep.mubr.msk.bf16.mxu0 %vm325_vm0, %v1429_v16  ;;  %v741_v27 = vsel %vm731_vm4, %v738_v20, %v740_v21  ;;  %v876_v28 = vmul.f32 %v6219_v37, %v809_v11  ;;  %v790_v29 = vadd.f32 %v739_v26, %v664_v19  ;;  %v999_v33 = vmul.f32 %v6224_v38, %v6272_v12 }
  0x65   : > { %v924_v30 = vrot.slane %v874_v53, 1  ;;  %v925_v31 = vrot.slane %v875_v24, 1  ;;  %v791_v35 = vadd.f32 %v741_v27, %v665_v25  ;;  %v1000_v39 = vmul.f32 %v6224_v38, %v6274_v13  ;;  %407 = vst.msk [vmem:[#allocation3 + $0x149] sm:$0x1] %vm378_vm6, %v5938_v0  ;;  %408 = vst.msk [vmem:[#allocation3 + $0x161] sm:$0x1] %vm378_vm6, %v5938_v0 }
  0x66   : > { %v927_v36 = vrot.slane %v876_v28, 1  ;;  %v1001_v40 = vmul.f32 %v6224_v38, %v809_v11  ;;  %v852_v42 = vadd.f32 %v836_v15, %v790_v29  ;;  %v1049_v44 = vrot.slane %v999_v33, 2  ;;  %v515_v11 = vld [vmem:[#allocation2 + $0x40] sm:$0x3]  ;;  %409 = vst.msk [vmem:[#allocation3 + $0x179] sm:$0x1] %vm378_vm6, %v5938_v0 }
  0x67   : > { %v926_v43 = vsel %vm605_vm3, %v924_v30, %v925_v31  ;;  %v1149_v46 = vmul.f32 %v6258_v1, %v6336_v41  ;;  %v853_v47 = vadd.f32 %v837_v23, %v791_v35  ;;  %v1050_v49 = vrot.slane %v1000_v39, 2  ;;  %410 = vst.msk [vmem:[#allocation3 + $0x191] sm:$0x1] %vm378_vm6, %v5938_v0 }
  0x68   : > { %v928_v48 = vsel %vm605_vm3, %v925_v31, %v927_v36  ;;  %v1052_v50 = vrot.slane %v1001_v40, 2  ;;  %v977_v51 = vadd.f32 %v926_v43, %v852_v42  ;;  %v1150_v54 = vmul.f32 %v6258_v1, %v6339_v45  ;;  %v812_v43 = vld [vmem:[#allocation2 + $0x58] sm:$0x3]  ;;  %372 = vst.msk [vmem:[#allocation3 + $0x10] sm:$0x3] %vm371_vm7, %v5938_v0 }
  0x69   : > { %v1187_v55 = vmul.f32 %v6267_v6, %v6336_v41  ;;  %v1188_v56 = vmul.f32 %v6267_v6, %v6339_v45  ;;  %v978_v57 = vadd.f32 %v928_v48, %v853_v47  ;;  %v1051_v58 = vsel %vm731_vm4, %v1049_v44, %v1050_v49  ;;  %376 = vst.msk [vmem:[#allocation3 + $0x1a8] sm:$0x3] %vm371_vm7, %v5938_v0 }
  0x6a   : > { %v1053_v59 = vsel %vm731_vm4, %v1050_v49, %v1052_v50  ;;  %v1189_v60 = vmul.f32 %v6267_v6, %v1122_v34  ;;  %v1102_v61 = vadd.f32 %v1051_v58, %v977_v51  ;;  %v1312_v2 = vmul.f32 %v6283_v22, %v6336_v41 }
  0x6b   : > { %v1237_v62 = vrot.slane %v1187_v55, 1  ;;  %v1238_v63 = vrot.slane %v1188_v56, 1  ;;  %v1103_v3 = vadd.f32 %v1053_v59, %v978_v57  ;;  %v1313_v5 = vmul.f32 %v6283_v22, %v6339_v45 }
  0x6c   : > { %v1240_v4 = vrot.slane %v1189_v60, 1  ;;  %v1314_v7 = vmul.f32 %v6283_v22, %v1122_v34  ;;  %v1165_v8 = vadd.f32 %v1149_v46, %v1102_v61  ;;  %v1362_v10 = vrot.slane %v1312_v2, 2 }
  0x6d   : > { %v1239_v9 = vsel %vm605_vm3, %v1237_v62, %v1238_v63  ;;  %v540_v15 = vmul.f32 %v6183_v14, %v6272_v12  ;;  %v1166_v16 = vadd.f32 %v1150_v54, %v1103_v3  ;;  %v1363_v20 = vrot.slane %v1313_v5, 2  ;;  %v6395_v5 = vld [vmem:[#allocation2 + $0x60] sm:$0xff] }
  0x6e   : > { %v1241_v19 = vsel %vm605_vm3, %v1238_v63, %v1240_v4  ;;  %v1365_v21 = vrot.slane %v1314_v7, 2  ;;  %v1290_v52 = vadd.f32 %v1239_v9, %v1165_v8  ;;  %v541_v23 = vmul.f32 %v6183_v14, %v6274_v13 }
  0x6f   : > { %v563_v53 = vmul.f32 %v6193_v17, %v6272_v12  ;;  %v564_v24 = vmul.f32 %v6193_v17, %v6274_v13  ;;  %v1291_v25 = vadd.f32 %v1241_v19, %v1166_v16  ;;  %v1364_v26 = vsel %vm731_vm4, %v1362_v10, %v1363_v20  ;;  %v6398_v10 = vld [vmem:[#allocation2 + $0x68] sm:$0xff] }
  0x70   : > { %v1366_v27 = vsel %vm731_vm4, %v1363_v20, %v1365_v21  ;;  %v565_v28 = vmul.f32 %v6193_v17, %v515_v11  ;;  %v1415_v29 = vadd.f32 %v1364_v26, %v1290_v52  ;;  %v689_v33 = vmul.f32 %v6198_v18, %v6272_v12 }
  0x71   : > { %v616_v30 = vrot.slane %v563_v53, 1  ;;  %v617_v31 = vrot.slane %v564_v24, 1  ;;  %v1416_v34 = vadd.f32 %v1366_v27, %v1291_v25  ;;  %v690_v36 = vmul.f32 %v6198_v18, %v6274_v13 }
  0x72   : > { %v619_v35 = vrot.slane %v565_v28, 1  ;;  %v691_v39 = vmul.f32 %v6198_v18, %v515_v11  ;;  %v742_v42 = vrot.slane %v689_v33, 2  ;;  %v838_v44 = vmul.f32 %v6212_v32, %v6336_v41  ;;  %v1125_v11 = vld [vmem:[#allocation2 + $0x70] sm:$0x3] }
  0x73   : > { %v618_v40 = vsel %vm605_vm3, %v616_v30, %v617_v31  ;;  %v839_v46 = vmul.f32 %v6212_v32, %v6339_v45  ;;  %v1430_v47 = vpack.c.bf16 %v1416_v34, %v1415_v29  ;;  %v743_v49 = vrot.slane %v690_v36, 2 }
  0x74   : > { %v620_v12 = vsel %vm605_vm3, %v617_v31, %v619_v35  ;;  %v666_v48 = vadd.f32 %v618_v40, %v540_v15  ;;  %v745_v51 = vrot.slane %v691_v39, 2  ;;  %v877_v13 = vmul.f32 %v6219_v37, %v6336_v41 }
  0x75   : > { %v667_v50 = vadd.f32 %v620_v12, %v541_v23  ;;  %v878_v54 = vmul.f32 %v6219_v37, %v6339_v45  ;;  %5613 = vmatmul.mubr.msk.bf16.vlgmr.msra.gmra.mxu0 %vm325_vm0, %v1430_v47  ;;  %v744_v55 = vsel %vm731_vm4, %v742_v42, %v743_v49  ;;  %v879_v56 = vmul.f32 %v6219_v37, %v812_v43 }
  0x76   : > { %v1002_v57 = vmul.f32 %v6224_v38, %v6336_v41  ;;  %v1003_v58 = vmul.f32 %v6224_v38, %v6339_v45  ;;  %v746_v59 = vsel %vm731_vm4, %v743_v49, %v745_v51  ;;  %v792_v60 = vadd.f32 %v744_v55, %v666_v48 }
  0x77   : > { %v929_v61 = vrot.slane %v877_v13, 1  ;;  %v930_v62 = vrot.slane %v878_v54, 1  ;;  %v793_v63 = vadd.f32 %v746_v59, %v667_v50  ;;  %v932_v2 = vrot.slane %v879_v56, 1 }
  0x78   : > { %v1004_v3 = vmul.f32 %v6224_v38, %v812_v43  ;;  %v1054_v4 = vrot.slane %v1002_v57, 2  ;;  %v854_v7 = vadd.f32 %v838_v44, %v792_v60  ;;  %v1055_v9 = vrot.slane %v1003_v58, 2  ;;  %v518_v44 = vld [vmem:[#allocation2 + $0x58] sm:$0x3] }
  0x79   : > { %v931_v8 = vsel %vm605_vm3, %v929_v61, %v930_v62  ;;  %v1151_v15 = vmul.f32 %v6258_v1, %v6395_v5  ;;  %v855_v16 = vadd.f32 %v839_v46, %v793_v63  ;;  %v933_v19 = vsel %vm605_vm3, %v930_v62, %v932_v2 }
  0x7a   : > { %v1057_v20 = vrot.slane %v1004_v3, 2  ;;  %v1152_v21 = vmul.f32 %v6258_v1, %v6398_v10  ;;  %v979_v52 = vadd.f32 %v931_v8, %v854_v7  ;;  %v1056_v23 = vsel %vm731_vm4, %v1054_v4, %v1055_v9 }
  0x7b   : > { %v1190_v53 = vmul.f32 %v6267_v6, %v6395_v5  ;;  %v1191_v24 = vmul.f32 %v6267_v6, %v6398_v10  ;;  %v980_v25 = vadd.f32 %v933_v19, %v855_v16  ;;  %v1192_v27 = vmul.f32 %v6267_v6, %v1125_v11 }
  0x7c   : > { %v1058_v26 = vsel %vm731_vm4, %v1055_v9, %v1057_v20  ;;  %v1315_v28 = vmul.f32 %v6283_v22, %v6395_v5  ;;  %v1104_v29 = vadd.f32 %v1056_v23, %v979_v52  ;;  %v1316_v33 = vmul.f32 %v6283_v22, %v6398_v10  ;;  %v815_v9 = vld [vmem:[#allocation2 + $0x70] sm:$0x3] }
  0x7d   : > { %v1242_v30 = vrot.slane %v1190_v53, 1  ;;  %v1243_v31 = vrot.slane %v1191_v24, 1  ;;  %v1105_v34 = vadd.f32 %v1058_v26, %v980_v25  ;;  %v1245_v35 = vrot.slane %v1192_v27, 1 }
  0x7e   : > { %v1317_v36 = vmul.f32 %v6283_v22, %v1125_v11  ;;  %v1367_v39 = vrot.slane %v1315_v28, 2  ;;  %v1167_v40 = vadd.f32 %v1151_v15, %v1104_v29  ;;  %v1368_v43 = vrot.slane %v1316_v33, 2 }
  0x7f   : > { %v1244_v42 = vsel %vm605_vm3, %v1242_v30, %v1243_v31  ;;  %v542_v46 = vmul.f32 %v6183_v14, %v6336_v41  ;;  %v1168_v47 = vadd.f32 %v1152_v21, %v1105_v34  ;;  %v1246_v12 = vsel %vm605_vm3, %v1243_v31, %v1245_v35 }
  0x80   : > { %v1370_v48 = vrot.slane %v1317_v36, 2  ;;  %v543_v49 = vmul.f32 %v6183_v14, %v6339_v45  ;;  %v1292_v50 = vadd.f32 %v1244_v42, %v1167_v40  ;;  %v1369_v51 = vsel %vm731_vm4, %v1367_v39, %v1368_v43  ;;  %v6454_v36 = vld [vmem:[#allocation2 + $0x78] sm:$0xff] }
  0x81   : > { %v566_v13 = vmul.f32 %v6193_v17, %v6336_v41  ;;  %v567_v54 = vmul.f32 %v6193_v17, %v6339_v45  ;;  %v1293_v55 = vadd.f32 %v1246_v12, %v1168_v47  ;;  %v568_v57 = vmul.f32 %v6193_v17, %v518_v44 }
  0x82   : > { %v1371_v56 = vsel %vm731_vm4, %v1368_v43, %v1370_v48  ;;  %v692_v58 = vmul.f32 %v6198_v18, %v6336_v41  ;;  %v1417_v59 = vadd.f32 %v1369_v51, %v1292_v50  ;;  %v693_v62 = vmul.f32 %v6198_v18, %v6339_v45  ;;  %v6457_v43 = vld [vmem:[#allocation2 + $0x80] sm:$0xff] }
  0x83   : > { %v621_v60 = vrot.slane %v566_v13, 1  ;;  %v622_v61 = vrot.slane %v567_v54, 1  ;;  %v1418_v63 = vadd.f32 %v1371_v56, %v1293_v55  ;;  %v624_v2 = vrot.slane %v568_v57, 1 }
  0x84   : > { %v694_v3 = vmul.f32 %v6198_v18, %v518_v44  ;;  %v747_v4 = vrot.slane %v692_v58, 2  ;;  %v748_v8 = vrot.slane %v693_v62, 2  ;;  %v840_v11 = vmul.f32 %v6212_v32, %v6395_v5  ;;  %v1128_v44 = vld [vmem:[#allocation2 + $0x88] sm:$0x3] }
  0x85   : > { %v623_v7 = vsel %vm605_vm3, %v621_v60, %v622_v61  ;;  %v841_v41 = vmul.f32 %v6212_v32, %v6398_v10  ;;  %v1431_v15 = vpack.c.bf16 %v1418_v63, %v1417_v59  ;;  %v625_v16 = vsel %vm605_vm3, %v622_v61, %v624_v2  ;;  %v421_v59 = vld [vmem:[%s6090_s23 + $0x50] sm:$0xff]  ;;  %v422_v2 = vld [vmem:[%s6090_s23 + $0x58] sm:$0xff] }
  0x86   : > { %v668_v19 = vadd.f32 %v623_v7, %v542_v46  ;;  %v750_v45 = vrot.slane %v694_v3, 2  ;;  %v669_v20 = vadd.f32 %v625_v16, %v543_v49  ;;  %v749_v21 = vsel %vm731_vm4, %v747_v4, %v748_v8 }
  0x87   : > { %v880_v52 = vmul.f32 %v6219_v37, %v6395_v5  ;;  %v881_v23 = vmul.f32 %v6219_v37, %v6398_v10  ;;  %5616 = vmatprep.mubr.msk.bf16.mxu0 %vm325_vm0, %v1431_v15  ;;  %v882_v25 = vmul.f32 %v6219_v37, %v815_v9  ;;  %v1005_v26 = vmul.f32 %v6224_v38, %v6395_v5 }
  0x88   : > { %v751_v53 = vsel %vm731_vm4, %v748_v8, %v750_v45  ;;  %v794_v24 = vadd.f32 %v749_v21, %v668_v19  ;;  %v1006_v30 = vmul.f32 %v6224_v38, %v6398_v10  ;;  %v1007_v34 = vmul.f32 %v6224_v38, %v815_v9  ;;  %v521_v21 = vld [vmem:[#allocation2 + $0x70] sm:$0x3] }
  0x89   : > { %v795_v27 = vadd.f32 %v751_v53, %v669_v20  ;;  %v934_v28 = vrot.slane %v880_v52, 1  ;;  %v935_v29 = vrot.slane %v881_v23, 1  ;;  %v937_v33 = vrot.slane %v882_v25, 1 }
  0x8a   : > { %v856_v31 = vadd.f32 %v840_v11, %v794_v24  ;;  %v1059_v35 = vrot.slane %v1005_v26, 2  ;;  %v1060_v42 = vrot.slane %v1006_v30, 2  ;;  %v1153_v46 = vmul.f32 %v6258_v1, %v6454_v36 }
  0x8b   : > { %v857_v39 = vadd.f32 %v841_v41, %v795_v27  ;;  %v936_v40 = vsel %vm605_vm3, %v934_v28, %v935_v29  ;;  %v938_v47 = vsel %vm605_vm3, %v935_v29, %v937_v33  ;;  %v1062_v48 = vrot.slane %v1007_v34, 2 }
  0x8c   : > { %v981_v12 = vadd.f32 %v936_v40, %v856_v31  ;;  %v1154_v49 = vmul.f32 %v6258_v1, %v6457_v43  ;;  %v1061_v51 = vsel %vm731_vm4, %v1059_v35, %v1060_v42  ;;  %v1193_v13 = vmul.f32 %v6267_v6, %v6454_v36 }
  0x8d   : > { %v982_v50 = vadd.f32 %v938_v47, %v857_v39  ;;  %v1194_v54 = vmul.f32 %v6267_v6, %v6457_v43  ;;  %v1063_v55 = vsel %vm731_vm4, %v1060_v42, %v1062_v48  ;;  %v1195_v57 = vmul.f32 %v6267_v6, %v1128_v44 }
  0x8e   : > { %v1106_v56 = vadd.f32 %v1061_v51, %v981_v12  ;;  %v1318_v58 = vmul.f32 %v6283_v22, %v6454_v36  ;;  %v1247_v61 = vrot.slane %v1193_v13, 1  ;;  %v1319_v63 = vmul.f32 %v6283_v22, %v6457_v43  ;;  %v818_v12 = vld [vmem:[#allocation2 + $0x88] sm:$0x3] }
  0x8f   : > { %v1107_v60 = vadd.f32 %v1063_v55, %v982_v50  ;;  %v1248_v62 = vrot.slane %v1194_v54, 1  ;;  %v1250_v4 = vrot.slane %v1195_v57, 1  ;;  %v1320_v7 = vmul.f32 %v6283_v22, %v1128_v44 }
  0x90   : > { %v1169_v3 = vadd.f32 %v1153_v46, %v1106_v56  ;;  %v1372_v8 = vrot.slane %v1318_v58, 2  ;;  %v1373_v41 = vrot.slane %v1319_v63, 2  ;;  %v453_v15 = vmax.f32 %v421_v59, 0.0 }
  0x91   : > { %v1170_v9 = vadd.f32 %v1154_v49, %v1107_v60  ;;  %v1249_v11 = vsel %vm605_vm3, %v1247_v61, %v1248_v62  ;;  %v1251_v16 = vsel %vm605_vm3, %v1248_v62, %v1250_v4  ;;  %v1375_v45 = vrot.slane %v1320_v7, 2 }
  0x92   : > { %v1294_v19 = vadd.f32 %v1249_v11, %v1169_v3  ;;  %v454_v20 = vmax.f32 %v422_v2, 0.0  ;;  %v1374_v23 = vsel %vm731_vm4, %v1372_v8, %v1373_v41  ;;  %485 = vst.msk [vmem:[#allocation2 + $0x91] sm:$0xff] %vm325_vm0, %v453_v15  ;;  %v544_v53 = vmul.f32 %v6183_v14, %v6395_v5 }
  0x93   : > { %v1295_v52 = vadd.f32 %v1251_v16, %v1170_v9  ;;  %v545_v24 = vmul.f32 %v6183_v14, %v6398_v10  ;;  %v1376_v25 = vsel %vm731_vm4, %v1373_v41, %v1375_v45  ;;  %v569_v27 = vmul.f32 %v6193_v17, %v6395_v5 }
  0x94   : > { %v1419_v26 = vadd.f32 %v1374_v23, %v1294_v19  ;;  %486 = vst.msk [vmem:[#allocation2 + $0x99] sm:$0xff] %vm325_vm0, %v454_v20  ;;  %v570_v28 = vmul.f32 %v6193_v17, %v6398_v10  ;;  %v571_v30 = vmul.f32 %v6193_v17, %v521_v21  ;;  %v695_v31 = vmul.f32 %v6198_v18, %v6395_v5 }
  0x95   : > { %v1420_v29 = vadd.f32 %v1376_v25, %v1295_v52  ;;  %v696_v33 = vmul.f32 %v6198_v18, %v6398_v10  ;;  %v626_v34 = vrot.slane %v569_v27, 1  ;;  %v697_v39 = vmul.f32 %v6198_v18, %v521_v21 }
  0x96   : > { %v627_v35 = vrot.slane %v570_v28, 1  ;;  %v842_v40 = vmul.f32 %v6212_v32, %v6454_v36  ;;  %v629_v44 = vrot.slane %v571_v30, 1  ;;  %v752_v46 = vrot.slane %v695_v31, 2 }
  0x97   : > { %v1432_v42 = vpack.c.bf16 %v1420_v29, %v1419_v26  ;;  %v753_v47 = vrot.slane %v696_v33, 2  ;;  %v755_v49 = vrot.slane %v697_v39, 2  ;;  %v843_v5 = vmul.f32 %v6212_v32, %v6457_v43  ;;  %v423_v29 = vld [vmem:[%s6090_s23 + $0x60] sm:$0xff] }
  0x98   : > { %v628_v48 = vsel %vm605_vm3, %v626_v34, %v627_v35  ;;  %v883_v10 = vmul.f32 %v6219_v37, %v6454_v36  ;;  %v630_v50 = vsel %vm605_vm3, %v627_v35, %v629_v44  ;;  %v884_v54 = vmul.f32 %v6219_v37, %v6457_v43  ;;  %v424_v35 = vld [vmem:[%s6090_s23 + $0x68] sm:$0xff] }
  0x99   : > { %5617 = vmatmul.mubr.msk.bf16.gmra.mxu0 %vm325_vm0, %v1432_v42  ;;  %v670_v51 = vadd.f32 %v628_v48, %v544_v53  ;;  %v754_v13 = vsel %vm731_vm4, %v752_v46, %v753_v47  ;;  %v671_v55 = vadd.f32 %v630_v50, %v545_v24  ;;  %v756_v56 = vsel %vm731_vm4, %v753_v47, %v755_v49  ;;  %v6516_v63 = vld [vmem:[#allocation2 + $0x90] sm:$0xff] }
  0x9a   : > { %v885_v57 = vmul.f32 %v6219_v37, %v818_v12  ;;  %v939_v58 = vrot.slane %v883_v10, 1  ;;  %v940_v60 = vrot.slane %v884_v54, 1  ;;  %v1008_v61 = vmul.f32 %v6224_v38, %v6454_v36 }
  0x9b   : > { %v796_v59 = vadd.f32 %v754_v13, %v670_v51  ;;  %v1009_v62 = vmul.f32 %v6224_v38, %v6457_v43  ;;  %v797_v2 = vadd.f32 %v756_v56, %v671_v55  ;;  %v1010_v4 = vmul.f32 %v6224_v38, %v818_v12  ;;  %v6522_v15 = vld [vmem:[#allocation2 + $0x98] sm:$0xff]  ;;  %v1131_v16 = vld [vmem:[#allocation2 + $0xa0] sm:$0x3]  ;;  %v524_v51 = vld [vmem:[#allocation2 + $0x88] sm:$0x3] }
  0x9c   : > { %v942_v3 = vrot.slane %v885_v57, 1  ;;  %v1155_v7 = vmul.f32 %v6258_v1, %v6516_v63  ;;  %v941_v9 = vsel %vm605_vm3, %v939_v58, %v940_v60  ;;  %v1064_v11 = vrot.slane %v1008_v61, 2 }
  0x9d   : > { %v858_v8 = vadd.f32 %v842_v40, %v796_v59  ;;  %v1065_v41 = vrot.slane %v1009_v62, 2  ;;  %v859_v19 = vadd.f32 %v843_v5, %v797_v2  ;;  %v1067_v20 = vrot.slane %v1010_v4, 2 }
  0x9e   : > { %v943_v45 = vsel %vm605_vm3, %v940_v60, %v942_v3  ;;  %v1156_v21 = vmul.f32 %v6258_v1, %v6522_v15  ;;  %v1196_v53 = vmul.f32 %v6267_v6, %v6516_v63  ;;  %v1197_v24 = vmul.f32 %v6267_v6, %v6522_v15 }
  0x9f   : > { %v983_v52 = vadd.f32 %v941_v9, %v858_v8  ;;  %v1066_v23 = vsel %vm731_vm4, %v1064_v11, %v1065_v41  ;;  %v984_v25 = vadd.f32 %v943_v45, %v859_v19  ;;  %v1068_v26 = vsel %vm731_vm4, %v1065_v41, %v1067_v20 }
  0xa0   : > { %v1198_v27 = vmul.f32 %v6267_v6, %v1131_v16  ;;  %v1321_v28 = vmul.f32 %v6283_v22, %v6516_v63  ;;  %v1252_v31 = vrot.slane %v1196_v53, 1  ;;  %v1253_v33 = vrot.slane %v1197_v24, 1 }
  0xa1   : > { %v1108_v30 = vadd.f32 %v1066_v23, %v983_v52  ;;  %v1322_v34 = vmul.f32 %v6283_v22, %v6522_v15  ;;  %v1109_v39 = vadd.f32 %v1068_v26, %v984_v25  ;;  %v1323_v42 = vmul.f32 %v6283_v22, %v1131_v16  ;;  %v821_v16 = vld [vmem:[#allocation2 + $0xa0] sm:$0x3] }
  0xa2   : > { %v1255_v40 = vrot.slane %v1198_v27, 1  ;;  %v1377_v44 = vrot.slane %v1321_v28, 2  ;;  %v1254_v47 = vsel %vm605_vm3, %v1252_v31, %v1253_v33  ;;  %v455_v48 = vmax.f32 %v423_v29, 0.0 }
  0xa3   : > { %v1171_v46 = vadd.f32 %v1155_v7, %v1108_v30  ;;  %v1378_v12 = vrot.slane %v1322_v34, 2  ;;  %v1172_v49 = vadd.f32 %v1156_v21, %v1109_v39  ;;  %v1380_v10 = vrot.slane %v1323_v42, 2 }
  0xa4   : > { %v1256_v5 = vsel %vm605_vm3, %v1253_v33, %v1255_v40  ;;  %v456_v50 = vmax.f32 %v424_v35, 0.0  ;;  %487 = vst.msk [vmem:[#allocation2 + $0xa9] sm:$0xff] %vm325_vm0, %v455_v48  ;;  %v546_v55 = vmul.f32 %v6183_v14, %v6454_v36  ;;  %v547_v56 = vmul.f32 %v6183_v14, %v6457_v43 }
  0xa5   : > { %v1296_v13 = vadd.f32 %v1254_v47, %v1171_v46  ;;  %v1379_v54 = vsel %vm731_vm4, %v1377_v44, %v1378_v12  ;;  %v1297_v57 = vadd.f32 %v1256_v5, %v1172_v49  ;;  %v1381_v58 = vsel %vm731_vm4, %v1378_v12, %v1380_v10 }
  0xa6   : > { %488 = vst.msk [vmem:[#allocation2 + $0xb1] sm:$0xff] %vm325_vm0, %v456_v50  ;;  %v572_v59 = vmul.f32 %v6193_v17, %v6454_v36  ;;  %v573_v60 = vmul.f32 %v6193_v17, %v6457_v43  ;;  %v574_v62 = vmul.f32 %v6193_v17, %v524_v51  ;;  %v698_v2 = vmul.f32 %v6198_v18, %v6454_v36 }
  0xa7   : > { %v1421_v61 = vadd.f32 %v1379_v54, %v1296_v13  ;;  %v699_v14 = vmul.f32 %v6198_v18, %v6457_v43  ;;  %v1422_v3 = vadd.f32 %v1381_v58, %v1297_v57  ;;  %v700_v8 = vmul.f32 %v6198_v18, %v524_v51 }
  0xa8   : > { %v631_v4 = vrot.slane %v572_v59, 1  ;;  %v632_v7 = vrot.slane %v573_v60, 1  ;;  %v634_v9 = vrot.slane %v574_v62, 1  ;;  %v757_v11 = vrot.slane %v698_v2, 2  ;;  %v426_v2 = vld [vmem:[%s6090_s23 + $0x78] sm:$0xff] }
  0xa9   : > { %v758_v41 = vrot.slane %v699_v14, 2  ;;  %v844_v19 = vmul.f32 %v6212_v32, %v6516_v63  ;;  %v1433_v45 = vpack.c.bf16 %v1422_v3, %v1421_v61  ;;  %v760_v20 = vrot.slane %v700_v8, 2  ;;  %v429_v8 = vld [vmem:[%s6090_s23 + $0x90] sm:$0xff] }
  0xaa   : > { %v633_v17 = vsel %vm605_vm3, %v631_v4, %v632_v7  ;;  %v845_v36 = vmul.f32 %v6212_v32, %v6522_v15  ;;  %v635_v43 = vsel %vm605_vm3, %v632_v7, %v634_v9  ;;  %v886_v18 = vmul.f32 %v6219_v37, %v6516_v63  ;;  %v428_v7 = vld [vmem:[%s6090_s23 + $0x88] sm:$0xff] }
  0xab   : > { %v672_v21 = vadd.f32 %v633_v17, %v546_v55  ;;  %v759_v52 = vsel %vm731_vm4, %v757_v11, %v758_v41  ;;  %5620 = vmatprep.mubr.msk.bf16.mxu0 %vm325_vm0, %v1433_v45  ;;  %v673_v23 = vadd.f32 %v635_v43, %v547_v56  ;;  %v761_v53 = vsel %vm731_vm4, %v758_v41, %v760_v20  ;;  %v6580_v34 = vld [vmem:[#allocation2 + $0xa8] sm:$0xff]  ;;  %v425_v55 = vld [vmem:[%s6090_s23 + $0x70] sm:$0xff]  ;;  %v430_v45 = vld [vmem:[%s6090_s23 + $0x98] sm:$0xff] }
  0xac   : > { %v887_v24 = vmul.f32 %v6219_v37, %v6522_v15  ;;  %v888_v25 = vmul.f32 %v6219_v37, %v821_v16  ;;  %v944_v32 = vrot.slane %v886_v18, 1  ;;  %v1011_v27 = vmul.f32 %v6224_v38, %v6516_v63  ;;  %v431_v17 = vld [vmem:[%s6090_s23 + $0xa0] sm:$0xff]  ;;  %v432_v20 = vld [vmem:[%s6090_s23 + $0xa8] sm:$0xff] }
  0xad   : > { %v798_v26 = vadd.f32 %v759_v52, %v672_v21  ;;  %v1012_v28 = vmul.f32 %v6224_v38, %v6522_v15  ;;  %v799_v29 = vadd.f32 %v761_v53, %v673_v23  ;;  %v1013_v33 = vmul.f32 %v6224_v38, %v821_v16  ;;  %v1134_v37 = vld [vmem:[#allocation2 + $0xb8] sm:$0x3]  ;;  %v6586_v48 = vld [vmem:[#allocation2 + $0xb0] sm:$0xff] }
  0xae   : > { %v945_v30 = vrot.slane %v887_v24, 1  ;;  %v947_v31 = vrot.slane %v888_v25, 1  ;;  %v1069_v39 = vrot.slane %v1011_v27, 2  ;;  %v1157_v42 = vmul.f32 %v6258_v1, %v6580_v34  ;;  %v527_v24 = vld [vmem:[#allocation2 + $0xa0] sm:$0x3] }
  0xaf   : > { %v860_v35 = vadd.f32 %v844_v19, %v798_v26  ;;  %v1070_v40 = vrot.slane %v1012_v28, 2  ;;  %v861_v44 = vadd.f32 %v845_v36, %v799_v29  ;;  %v1072_v12 = vrot.slane %v1013_v33, 2  ;;  %v6622_v29 = vld [vmem:[%s8936_s1] ss:$0 sm:$0xff]  ;;  %v6633_v33 = vld [vmem:[%s8936_s1 + $0x1] ss:$0 sm:$0xff] }
  0xb0   : > { %v946_v46 = vsel %vm605_vm3, %v944_v32, %v945_v30  ;;  %v948_v47 = vsel %vm605_vm3, %v945_v30, %v947_v31  ;;  %v1158_v5 = vmul.f32 %v6258_v1, %v6586_v48  ;;  %v1199_v10 = vmul.f32 %v6267_v6, %v6580_v34 }
  0xb1   : > { %v985_v49 = vadd.f32 %v946_v46, %v860_v35  ;;  %v1071_v38 = vsel %vm731_vm4, %v1069_v39, %v1070_v40  ;;  %v986_v50 = vadd.f32 %v948_v47, %v861_v44  ;;  %v1073_v51 = vsel %vm731_vm4, %v1070_v40, %v1072_v12  ;;  %v6641_v39 = vld [vmem:[%s8936_s1] ss:$0 sm:$0xff]  ;;  %v6660_v12 = vld [vmem:[%s8936_s1 + $0x1] ss:$0 sm:$0xff] }
  0xb2   : > { %v1200_v13 = vmul.f32 %v6267_v6, %v6586_v48  ;;  %v1201_v54 = vmul.f32 %v6267_v6, %v1134_v37  ;;  %v1257_v57 = vrot.slane %v1199_v10, 1  ;;  %v1324_v1 = vmul.f32 %v6283_v22, %v6580_v34  ;;  %v427_v6 = vld [vmem:[%s6090_s23 + $0x80] sm:$0xff] }
  0xb3   : > { %v1110_v56 = vadd.f32 %v1071_v38, %v985_v49  ;;  %v1325_v58 = vmul.f32 %v6283_v22, %v6586_v48  ;;  %v1111_v59 = vadd.f32 %v1073_v51, %v986_v50  ;;  %v1326_v62 = vmul.f32 %v6283_v22, %v1134_v37  ;;  %v6665_v49 = vld [vmem:[%s8936_s1 + $0x2] ss:$0 sm:$0xff] }
  0xb4   : > { %v1258_v60 = vrot.slane %v1200_v13, 1  ;;  %v1260_v61 = vrot.slane %v1201_v54, 1  ;;  %v1382_v3 = vrot.slane %v1324_v1, 2  ;;  %v457_v9 = vmax.f32 %v425_v55, 0.0 }
  0xb5   : > { %v1173_v14 = vadd.f32 %v1157_v42, %v1110_v56  ;;  %v1383_v4 = vrot.slane %v1325_v58, 2  ;;  %v1174_v11 = vadd.f32 %v1158_v5, %v1111_v59  ;;  %v1385_v19 = vrot.slane %v1326_v62, 2  ;;  %v6651_v42 = vld [vmem:[%s8936_s1 + $0x2] ss:$0 sm:$0xff]  ;;  %v6706_v62 = vld [vmem:[%s8936_s1 + $0x4] ss:$0 sm:$0xff] }
  0xb6   : > { %v1259_v41 = vsel %vm605_vm3, %v1257_v57, %v1258_v60  ;;  %v1261_v16 = vsel %vm605_vm3, %v1258_v60, %v1260_v61  ;;  %v458_v43 = vmax.f32 %v426_v2, 0.0  ;;  %v459_v21 = vmax.f32 %v427_v6, 0.0  ;;  %489 = vst.msk [vmem:[#allocation2 + $0xc1] sm:$0xff] %vm325_vm0, %v457_v9  ;;  %v6687_v57 = vld [vmem:[%s8936_s1 + $0x5] ss:$0 sm:$0xff] }
  0xb7   : > { %v1298_v36 = vadd.f32 %v1259_v41, %v1173_v14  ;;  %v1384_v22 = vsel %vm731_vm4, %v1382_v3, %v1383_v4  ;;  %v1299_v52 = vadd.f32 %v1261_v16, %v1174_v11  ;;  %v1386_v18 = vsel %vm731_vm4, %v1383_v4, %v1385_v19  ;;  %v6714_v3 = vld [vmem:[%s8936_s1 + $0x5] ss:$0 sm:$0xff] }
  0xb8   : > { %v460_v23 = vmax.f32 %v428_v7, 0.0  ;;  %v461_v53 = vmax.f32 %v429_v8, 0.0  ;;  %v462_v26 = vmax.f32 %v430_v45, 0.0  ;;  %490 = vst.msk [vmem:[#allocation2 + $0xc9] sm:$0xff] %vm325_vm0, %v458_v43  ;;  %491 = vst.msk [vmem:[#allocation2 + $0xd9] sm:$0xff] %vm325_vm0, %v459_v21  ;;  %v463_v32 = vmax.f32 %v431_v17, 0.0 }
  0xb9   : > { %v1423_v25 = vadd.f32 %v1384_v22, %v1298_v36  ;;  %v464_v27 = vmax.f32 %v432_v20, 0.0  ;;  %v1424_v28 = vadd.f32 %v1386_v18, %v1299_v52  ;;  %v548_v30 = vmul.f32 %v6622_v29, %v6516_v63  ;;  %v6744_v52 = vld [vmem:[%s8936_s1 + $0x6] ss:$0 sm:$0xff] }
  0xba   : > { %492 = vst.msk [vmem:[#allocation2 + $0xe1] sm:$0xff] %vm325_vm0, %v460_v23  ;;  %493 = vst.msk [vmem:[#allocation2 + $0xf1] sm:$0xff] %vm325_vm0, %v461_v53  ;;  %v6628_v31 = vmul.f32 %v6622_v29, %v6522_v15  ;;  %v575_v35 = vmul.f32 %v6633_v33, %v6516_v63  ;;  %v576_v40 = vmul.f32 %v6633_v33, %v6522_v15 }
  0xbb   : > { %494 = vst.msk [vmem:[#allocation2 + $0xf9] sm:$0xff] %vm325_vm0, %v462_v26  ;;  %495 = vst.msk [vmem:[#allocation2 + $0x109] sm:$0xff] %vm325_vm0, %v463_v32  ;;  %v577_v37 = vmul.f32 %v6633_v33, %v527_v24  ;;  %v701_v44 = vmul.f32 %v6651_v42, %v6516_v63  ;;  %v702_v46 = vmul.f32 %v6651_v42, %v6522_v15  ;;  %v6671_v63 = vld [vmem:[%s8936_s1 + $0x4] ss:$0 sm:$0xff] }
  0xbc   : > { %496 = vst.msk [vmem:[#allocation2 + $0x111] sm:$0xff] %vm325_vm0, %v464_v27  ;;  %v1434_v47 = vpack.c.bf16 %v1424_v28, %v1423_v25  ;;  %v636_v38 = vrot.slane %v575_v35, 1  ;;  %v703_v5 = vmul.f32 %v6651_v42, %v527_v24  ;;  %v6675_v15 = vmul.f32 %v6671_v63, %v6580_v34 }
  0xbd   : > { %v637_v10 = vrot.slane %v576_v40, 1  ;;  %v639_v50 = vrot.slane %v577_v37, 1  ;;  %v762_v51 = vrot.slane %v701_v44, 2  ;;  %v763_v13 = vrot.slane %v702_v46, 2  ;;  %v6678_v54 = vld [vmem:[#allocation2 + $0xc0] sm:$0xff] }
  0xbe   : > { %5621 = vmatmul.mubr.msk.bf16.gmra.mxu0 %vm325_vm0, %v1434_v47  ;;  %v765_v55 = vrot.slane %v703_v5, 2  ;;  %v6682_v56 = vmul.f32 %v6671_v63, %v6586_v48  ;;  %v6691_v1 = vmul.f32 %v6687_v57, %v6580_v34  ;;  %v6695_v58 = vmul.f32 %v6687_v57, %v6586_v48  ;;  %v6760_v37 = vld [vmem:[%s8936_s1 + $0x8] ss:$0 sm:$0xff] }
  0xbf   : > { %v1643_v59 = vmul.f32 %v6641_v39, %v6678_v54  ;;  %v1664_v60 = vmul.f32 %v6660_v12, %v6678_v54  ;;  %v1789_v61 = vmul.f32 %v6665_v49, %v6678_v54  ;;  %v638_v2 = vsel %vm605_vm3, %v636_v38, %v637_v10  ;;  %v6709_v6 = vld [vmem:[#allocation2 + $0xc8] sm:$0xff]  ;;  %v1616_v14 = vld [vmem:[#allocation2 + $0xd0] sm:$0x3]  ;;  %v6732_v45 = vld [vmem:[#allocation2 + $0xd8] sm:$0xff] }
  0xc0   : > { %v6717_v4 = vsel %vm605_vm3, %v637_v10, %v639_v50  ;;  %v6719_v7 = vadd.f32 %v638_v2, %v548_v30  ;;  %v6722_v8 = vsel %vm731_vm4, %v762_v51, %v763_v13  ;;  %v6725_v9 = vsel %vm731_vm4, %v763_v13, %v765_v55  ;;  %v6772_v55 = vld [vmem:[%s8936_s1 + $0x9] ss:$0 sm:$0xff] }
  0xc1   : > { %v1644_v11 = vmul.f32 %v6641_v39, %v6709_v6  ;;  %v1665_v41 = vmul.f32 %v6660_v12, %v6709_v6  ;;  %v1666_v16 = vmul.f32 %v6660_v12, %v1616_v14  ;;  %v1712_v19 = vrot.slane %v1664_v60, 1  ;;  %v1912_v17 = vld [vmem:[#allocation2 + $0xe8] sm:$0x3]  ;;  %v6737_v43 = vld [vmem:[#allocation2 + $0xe0] sm:$0xff]  ;;  %v6767_v13 = vld [vmem:[#allocation2 + $0xf0] sm:$0xff] }
  0xc2   : > { %v1790_v20 = vmul.f32 %v6665_v49, %v6709_v6  ;;  %v1791_v36 = vmul.f32 %v6665_v49, %v1616_v14  ;;  %v1837_v22 = vrot.slane %v1789_v61, 2  ;;  %v1939_v21 = vmul.f32 %v6706_v62, %v6732_v45  ;;  %v2224_v2 = vld [vmem:[#allocation2 + $0x100] sm:$0x3] }
  0xc3   : > { %v1713_v18 = vrot.slane %v1665_v41, 1  ;;  %v1715_v23 = vrot.slane %v1666_v16, 1  ;;  %v1940_v53 = vmul.f32 %v6706_v62, %v6737_v43  ;;  %v1976_v24 = vmul.f32 %v6714_v3, %v6732_v45 }
  0xc4   : > { %v1838_v25 = vrot.slane %v1790_v20, 2  ;;  %v1840_v26 = vrot.slane %v1791_v36, 2  ;;  %v1977_v32 = vmul.f32 %v6714_v3, %v6737_v43  ;;  %v1978_v27 = vmul.f32 %v6714_v3, %v1912_v17  ;;  %v6783_v20 = vld [vmem:[%s8936_s1 + $0xa] ss:$0 sm:$0xff] }
  0xc5   : > { %v1714_v28 = vsel %vm605_vm3, %v1712_v19, %v1713_v18  ;;  %v1716_v30 = vsel %vm605_vm3, %v1713_v18, %v1715_v23  ;;  %v2024_v35 = vrot.slane %v1976_v24, 1  ;;  %v2101_v40 = vmul.f32 %v6744_v52, %v6732_v45 }
  0xc6   : > { %v1768_v44 = vadd.f32 %v1714_v28, %v1643_v59  ;;  %v1769_v46 = vadd.f32 %v1716_v30, %v1644_v11  ;;  %v1839_v47 = vsel %vm731_vm4, %v1837_v22, %v1838_v25  ;;  %v1841_v38 = vsel %vm731_vm4, %v1838_v25, %v1840_v26 }
  0xc7   : > { %v2025_v5 = vrot.slane %v1977_v32, 1  ;;  %v2027_v10 = vrot.slane %v1978_v27, 1  ;;  %v2102_v50 = vmul.f32 %v6744_v52, %v6737_v43  ;;  %v2103_v51 = vmul.f32 %v6744_v52, %v1912_v17  ;;  %v6778_v17 = vld [vmem:[#allocation2 + $0xf8] sm:$0xff] }
  0xc8   : > { %v1893_v59 = vadd.f32 %v1839_v47, %v1768_v44  ;;  %v1894_v60 = vadd.f32 %v1841_v38, %v1769_v46  ;;  %v2149_v61 = vrot.slane %v2101_v40, 2  ;;  %v2251_v14 = vmul.f32 %v6760_v37, %v6767_v13 }
  0xc9   : > { %v2026_v11 = vsel %vm605_vm3, %v2024_v35, %v2025_v5  ;;  %v2028_v41 = vsel %vm605_vm3, %v2025_v5, %v2027_v10  ;;  %v2150_v16 = vrot.slane %v2102_v50, 2  ;;  %v2152_v19 = vrot.slane %v2103_v51, 2  ;;  %v1619_v5 = vld [vmem:[#allocation2 + $0xe8] sm:$0x3] }
  0xca   : > { %v1955_v36 = vadd.f32 %v1939_v21, %v1893_v59  ;;  %v1956_v22 = vadd.f32 %v1940_v53, %v1894_v60  ;;  %v2252_v18 = vmul.f32 %v6760_v37, %v6778_v17  ;;  %v2288_v23 = vmul.f32 %v6772_v55, %v6767_v13 }
  0xcb   : > { %v2151_v24 = vsel %vm731_vm4, %v2149_v61, %v2150_v16  ;;  %v2153_v25 = vsel %vm731_vm4, %v2150_v16, %v2152_v19  ;;  %v2289_v26 = vmul.f32 %v6772_v55, %v6778_v17  ;;  %v2290_v32 = vmul.f32 %v6772_v55, %v2224_v2 }
  0xcc   : > { %v2080_v27 = vadd.f32 %v2026_v11, %v1955_v36  ;;  %v2081_v28 = vadd.f32 %v2028_v41, %v1956_v22  ;;  %v2336_v30 = vrot.slane %v2288_v23, 1  ;;  %v2413_v21 = vmul.f32 %v6783_v20, %v6767_v13 }
  0xcd   : > { %v2337_v53 = vrot.slane %v2289_v26, 1  ;;  %v2339_v35 = vrot.slane %v2290_v32, 1  ;;  %v2414_v40 = vmul.f32 %v6783_v20, %v6778_v17  ;;  %v2415_v44 = vmul.f32 %v6783_v20, %v2224_v2 }
  0xce   : > { %v2205_v46 = vadd.f32 %v2151_v24, %v2080_v27  ;;  %v2206_v47 = vadd.f32 %v2153_v25, %v2081_v28  ;;  %v2461_v38 = vrot.slane %v2413_v21, 2  ;;  %v1645_v10 = vmul.f32 %v6641_v39, %v6732_v45 }
  0xcf   : > { %v2338_v50 = vsel %vm605_vm3, %v2336_v30, %v2337_v53  ;;  %v2340_v51 = vsel %vm605_vm3, %v2337_v53, %v2339_v35  ;;  %v2462_v59 = vrot.slane %v2414_v40, 2  ;;  %v2464_v60 = vrot.slane %v2415_v44, 2 }
  0xd0   : > { %v2267_v61 = vadd.f32 %v2251_v14, %v2205_v46  ;;  %v2268_v11 = vadd.f32 %v2252_v18, %v2206_v47  ;;  %v1646_v41 = vmul.f32 %v6641_v39, %v6737_v43  ;;  %v1667_v2 = vmul.f32 %v6660_v12, %v6732_v45  ;;  %v1915_v47 = vld [vmem:[#allocation2 + $0x100] sm:$0x3] }
  0xd1   : > { %v2463_v16 = vsel %vm731_vm4, %v2461_v38, %v2462_v59  ;;  %v2465_v19 = vsel %vm731_vm4, %v2462_v59, %v2464_v60  ;;  %v1668_v36 = vmul.f32 %v6660_v12, %v6737_v43  ;;  %v1669_v22 = vmul.f32 %v6660_v12, %v1619_v5 }
  0xd2   : > { %v2392_v23 = vadd.f32 %v2338_v50, %v2267_v61  ;;  %v2393_v24 = vadd.f32 %v2340_v51, %v2268_v11  ;;  %v1717_v25 = vrot.slane %v1667_v2, 1  ;;  %v1792_v14 = vmul.f32 %v6665_v49, %v6732_v45 }
  0xd3   : > { %v1718_v18 = vrot.slane %v1668_v36, 1  ;;  %v1720_v26 = vrot.slane %v1669_v22, 1  ;;  %v1793_v32 = vmul.f32 %v6665_v49, %v6737_v43  ;;  %v1794_v27 = vmul.f32 %v6665_v49, %v1619_v5 }
  0xd4   : > { %v2517_v28 = vadd.f32 %v2463_v16, %v2392_v23  ;;  %v2518_v30 = vadd.f32 %v2465_v19, %v2393_v24  ;;  %v1842_v21 = vrot.slane %v1792_v14, 2  ;;  %v1941_v53 = vmul.f32 %v6706_v62, %v6767_v13 }
  0xd5   : > { %v1719_v35 = vsel %vm605_vm3, %v1717_v25, %v1718_v18  ;;  %v1721_v40 = vsel %vm605_vm3, %v1718_v18, %v1720_v26  ;;  %v1843_v44 = vrot.slane %v1793_v32, 2  ;;  %v1845_v46 = vrot.slane %v1794_v27, 2  ;;  %v6836_v26 = vld [vmem:[#allocation2 + $0x108] sm:$0xff] }
  0xd6   : > { %v2533_v38 = vpack.c.bf16 %v2518_v30, %v2517_v28  ;;  %v1770_v50 = vadd.f32 %v1719_v35, %v1645_v10  ;;  %v1771_v51 = vadd.f32 %v1721_v40, %v1646_v41  ;;  %v1942_v59 = vmul.f32 %v6706_v62, %v6778_v17  ;;  %v6839_v30 = vld [vmem:[#allocation2 + $0x110] sm:$0xff] }
  0xd7   : > { %v1844_v5 = vsel %vm731_vm4, %v1842_v21, %v1843_v44  ;;  %v1846_v60 = vsel %vm731_vm4, %v1843_v44, %v1845_v46  ;;  %v1979_v61 = vmul.f32 %v6714_v3, %v6767_v13  ;;  %v1980_v11 = vmul.f32 %v6714_v3, %v6778_v17  ;;  %v2227_v21 = vld [vmem:[#allocation2 + $0x118] sm:$0x3] }
  0xd8   : > { %5632 = vmatprep.mubr.msk.bf16.mxu1 %vm325_vm0, %v2533_v38  ;;  %v1895_v2 = vadd.f32 %v1844_v5, %v1770_v50  ;;  %v1896_v16 = vadd.f32 %v1846_v60, %v1771_v51  ;;  %v1981_v10 = vmul.f32 %v6714_v3, %v1915_v47  ;;  %v2104_v41 = vmul.f32 %v6744_v52, %v6767_v13 }
  0xd9   : > { %v2029_v19 = vrot.slane %v1979_v61, 1  ;;  %v2030_v36 = vrot.slane %v1980_v11, 1  ;;  %v2105_v22 = vmul.f32 %v6744_v52, %v6778_v17  ;;  %v2106_v23 = vmul.f32 %v6744_v52, %v1915_v47 }
  0xda   : > { %v1957_v24 = vadd.f32 %v1941_v53, %v1895_v2  ;;  %v1958_v25 = vadd.f32 %v1942_v59, %v1896_v16  ;;  %v2032_v14 = vrot.slane %v1981_v10, 1  ;;  %v2154_v18 = vrot.slane %v2104_v41, 2 }
  0xdb   : > { %v2031_v32 = vsel %vm605_vm3, %v2029_v19, %v2030_v36  ;;  %v2155_v27 = vrot.slane %v2105_v22, 2  ;;  %v2157_v28 = vrot.slane %v2106_v23, 2  ;;  %v2253_v35 = vmul.f32 %v6760_v37, %v6836_v26  ;;  %v824_v23 = vld [vmem:[#allocation2 + $0xb8] sm:$0x3] }
  0xdc   : > { %v2033_v40 = vsel %vm605_vm3, %v2030_v36, %v2032_v14  ;;  %v2082_v44 = vadd.f32 %v2031_v32, %v1957_v24  ;;  %v2254_v53 = vmul.f32 %v6760_v37, %v6839_v30  ;;  %v2291_v46 = vmul.f32 %v6772_v55, %v6836_v26 }
  0xdd   : > { %v2083_v47 = vadd.f32 %v2033_v40, %v1958_v25  ;;  %v2156_v38 = vsel %vm731_vm4, %v2154_v18, %v2155_v27  ;;  %v2158_v50 = vsel %vm731_vm4, %v2155_v27, %v2157_v28  ;;  %v2292_v51 = vmul.f32 %v6772_v55, %v6839_v30 }
  0xde   : > { %v2207_v59 = vadd.f32 %v2156_v38, %v2082_v44  ;;  %v2293_v5 = vmul.f32 %v6772_v55, %v2227_v21  ;;  %v2341_v60 = vrot.slane %v2291_v46, 1  ;;  %v2416_v61 = vmul.f32 %v6783_v20, %v6836_v26 }
  0xdf   : > { %v2208_v11 = vadd.f32 %v2158_v50, %v2083_v47  ;;  %v2342_v2 = vrot.slane %v2292_v51, 1  ;;  %v2417_v16 = vmul.f32 %v6783_v20, %v6839_v30  ;;  %v2418_v10 = vmul.f32 %v6783_v20, %v2227_v21 }
  0xe0   : > { %v2269_v41 = vadd.f32 %v2253_v35, %v2207_v59  ;;  %v2344_v19 = vrot.slane %v2293_v5, 1  ;;  %v2466_v36 = vrot.slane %v2416_v61, 2  ;;  %v675_v22 = vadd.f32 %v6717_v4, %v6628_v31 }
  0xe1   : > { %v2270_v24 = vadd.f32 %v2254_v53, %v2208_v11  ;;  %v2343_v25 = vsel %vm605_vm3, %v2341_v60, %v2342_v2  ;;  %v2467_v14 = vrot.slane %v2417_v16, 2  ;;  %v2469_v18 = vrot.slane %v2418_v10, 2 }
  0xe2   : > { %v2345_v32 = vsel %vm605_vm3, %v2342_v2, %v2344_v19  ;;  %v2394_v27 = vadd.f32 %v2343_v25, %v2269_v41  ;;  %v800_v28 = vadd.f32 %v6722_v8, %v6719_v7  ;;  %v801_v21 = vadd.f32 %v6725_v9, %v675_v22  ;;  %v6875_v8 = vld [vmem:[%s8936_s1 + $0x6] ss:$0 sm:$0xff]  ;;  %v6897_v19 = vld [vmem:[%s8936_s1 + $0x9] ss:$0 sm:$0xff] }
  0xe3   : > { %v2395_v35 = vadd.f32 %v2345_v32, %v2270_v24  ;;  %v2468_v40 = vsel %vm731_vm4, %v2466_v36, %v2467_v14  ;;  %v2470_v44 = vsel %vm731_vm4, %v2467_v14, %v2469_v18  ;;  %v891_v31 = vmul.f32 %v6687_v57, %v824_v23  ;;  %v6907_v24 = vld [vmem:[%s8936_s1 + $0xa] ss:$0 sm:$0xff] }
  0xe4   : > { %v2519_v4 = vadd.f32 %v2468_v40, %v2394_v27  ;;  %v862_v53 = vadd.f32 %v6675_v15, %v800_v28  ;;  %v863_v46 = vadd.f32 %v6682_v56, %v801_v21  ;;  %v949_v47 = vrot.slane %v6691_v1, 1  ;;  %v1137_v56 = vld [vmem:[#allocation2 + $0xd0] sm:$0x3]  ;;  %v6885_v1 = vld [vmem:[%s8936_s1 + $0x8] ss:$0 sm:$0xff] }
  0xe5   : > { %v2520_v38 = vadd.f32 %v2470_v44, %v2395_v35  ;;  %v950_v50 = vrot.slane %v6695_v58, 1  ;;  %v952_v7 = vrot.slane %v891_v31, 1  ;;  %v1014_v9 = vmul.f32 %v6875_v8, %v6580_v34 }
  0xe6   : > { %v1015_v51 = vmul.f32 %v6875_v8, %v6586_v48  ;;  %v1016_v15 = vmul.f32 %v6875_v8, %v824_v23  ;;  %v1159_v58 = vmul.f32 %v6885_v1, %v6678_v54  ;;  %v1160_v59 = vmul.f32 %v6885_v1, %v6709_v6 }
  0xe7   : > { %v2534_v5 = vpack.c.bf16 %v2520_v38, %v2519_v4  ;;  %v951_v60 = vsel %vm605_vm3, %v949_v47, %v950_v50  ;;  %v953_v61 = vsel %vm605_vm3, %v950_v50, %v952_v7  ;;  %v1074_v11 = vrot.slane %v1014_v9, 2  ;;  %v530_v50 = vld [vmem:[#allocation2 + $0xb8] sm:$0x3] }
  0xe8   : > { %v987_v2 = vadd.f32 %v951_v60, %v862_v53  ;;  %v988_v16 = vadd.f32 %v953_v61, %v863_v46  ;;  %v1075_v10 = vrot.slane %v1015_v51, 2  ;;  %v1077_v41 = vrot.slane %v1016_v15, 2 }
  0xe9   : > { %5633 = vmatmul.mubr.msk.bf16.vlgmr.msra.gmra.mxu1 %vm325_vm0, %v2534_v5  ;;  %v1202_v36 = vmul.f32 %v6897_v19, %v6678_v54  ;;  %v1203_v22 = vmul.f32 %v6897_v19, %v6709_v6  ;;  %v1204_v23 = vmul.f32 %v6897_v19, %v1137_v56  ;;  %v1327_v25 = vmul.f32 %v6907_v24, %v6678_v54 }
  0xea   : > { %v1076_v14 = vsel %vm731_vm4, %v1074_v11, %v1075_v10  ;;  %v1078_v18 = vsel %vm731_vm4, %v1075_v10, %v1077_v41  ;;  %v1328_v32 = vmul.f32 %v6907_v24, %v6709_v6  ;;  %v1329_v27 = vmul.f32 %v6907_v24, %v1137_v56 }
  0xeb   : > { %v1112_v28 = vadd.f32 %v1076_v14, %v987_v2  ;;  %v1113_v21 = vadd.f32 %v1078_v18, %v988_v16  ;;  %v1262_v35 = vrot.slane %v1202_v36, 1  ;;  %v1263_v40 = vrot.slane %v1203_v22, 1  ;;  %v827_v18 = vld [vmem:[#allocation2 + $0xd0] sm:$0x3] }
  0xec   : > { %v1265_v44 = vrot.slane %v1204_v23, 1  ;;  %v1387_v31 = vrot.slane %v1327_v25, 2  ;;  %v1388_v4 = vrot.slane %v1328_v32, 2  ;;  %v1390_v53 = vrot.slane %v1329_v27, 2 }
  0xed   : > { %v1175_v46 = vadd.f32 %v1159_v58, %v1112_v28  ;;  %v1176_v47 = vadd.f32 %v1160_v59, %v1113_v21  ;;  %v1264_v38 = vsel %vm605_vm3, %v1262_v35, %v1263_v40  ;;  %v550_v7 = vmul.f32 %v6622_v29, %v6580_v34 }
  0xee   : > { %v1266_v9 = vsel %vm605_vm3, %v1263_v40, %v1265_v44  ;;  %v1389_v51 = vsel %vm731_vm4, %v1387_v31, %v1388_v4  ;;  %v1391_v15 = vsel %vm731_vm4, %v1388_v4, %v1390_v53  ;;  %v551_v56 = vmul.f32 %v6622_v29, %v6586_v48 }
  0xef   : > { %v1300_v5 = vadd.f32 %v1264_v38, %v1175_v46  ;;  %v1301_v60 = vadd.f32 %v1266_v9, %v1176_v47  ;;  %v578_v58 = vmul.f32 %v6633_v33, %v6580_v34  ;;  %v579_v59 = vmul.f32 %v6633_v33, %v6586_v48 }
  0xf0   : > { %v580_v61 = vmul.f32 %v6633_v33, %v530_v50  ;;  %v704_v11 = vmul.f32 %v6651_v42, %v6580_v34  ;;  %v705_v2 = vmul.f32 %v6651_v42, %v6586_v48  ;;  %v706_v16 = vmul.f32 %v6651_v42, %v530_v50 }
  0xf1   : > { %v1425_v10 = vadd.f32 %v1389_v51, %v1300_v5  ;;  %v1426_v29 = vadd.f32 %v1391_v15, %v1301_v60  ;;  %v641_v41 = vrot.slane %v578_v58, 1  ;;  %v642_v36 = vrot.slane %v579_v59, 1  ;;  %v1140_v5 = vld [vmem:[#allocation2 + $0xe8] sm:$0x3] }
  0xf2   : > { %v644_v22 = vrot.slane %v580_v61, 1  ;;  %v767_v23 = vrot.slane %v704_v11, 2  ;;  %v768_v25 = vrot.slane %v705_v2, 2  ;;  %v770_v14 = vrot.slane %v706_v16, 2 }
  0xf3   : > { %v1435_v32 = vpack.c.bf16 %v1426_v29, %v1425_v10  ;;  %v643_v33 = vsel %vm605_vm3, %v641_v41, %v642_v36  ;;  %v848_v34 = vmul.f32 %v6671_v63, %v6678_v54  ;;  %v849_v48 = vmul.f32 %v6671_v63, %v6709_v6  ;;  %v5791_v29 = vld [vmem:[%s8941_s6 + $0x8] sm:$0xff]   ;;  %v5792_v41 = vld [vmem:[%s8940_s5 + $0x18] sm:$0xff]  }
  0xf4   : > { %v645_v42 = vsel %vm605_vm3, %v642_v36, %v644_v22  ;;  %v676_v27 = vadd.f32 %v643_v33, %v550_v7  ;;  %v769_v28 = vsel %vm731_vm4, %v767_v23, %v768_v25  ;;  %v771_v21 = vsel %vm731_vm4, %v768_v25, %v770_v14  ;;  %v433_v25 = vld [vmem:[%s6090_s23 + $0xb0] sm:$0xff]  ;;  %v434_v33 = vld [vmem:[%s6090_s23 + $0xb8] sm:$0xff]  ;;  %5648 = vmatprep.subr.bf16.mxu0 %v5791_v29 }
  0xf5   : > { %5624 = vmatprep.mubr.msk.bf16.mxu0 %vm325_vm0, %v1435_v32  ;;  %v677_v35 = vadd.f32 %v645_v42, %v551_v56  ;;  %v892_v40 = vmul.f32 %v6687_v57, %v6678_v54  ;;  %v893_v44 = vmul.f32 %v6687_v57, %v6709_v6  ;;  %v894_v31 = vmul.f32 %v6687_v57, %v827_v18 }
  0xf6   : > { %v802_v4 = vadd.f32 %v769_v28, %v676_v27  ;;  %v1017_v63 = vmul.f32 %v6875_v8, %v6678_v54  ;;  %v1018_v53 = vmul.f32 %v6875_v8, %v6709_v6  ;;  %v1019_v46 = vmul.f32 %v6875_v8, %v827_v18  ;;  %5668 = vmatprep.subr.bf16.mxu1 %v5792_v41 }
  0xf7   : > { %v803_v47 = vadd.f32 %v771_v21, %v677_v35  ;;  %v954_v38 = vrot.slane %v892_v40, 1  ;;  %v955_v50 = vrot.slane %v893_v44, 1  ;;  %v957_v7 = vrot.slane %v894_v31, 1  ;;  %5649 = vmatpush3.bf16.msra.mxu0 %v5791_v29  ;;  %5669 = vmatpush3.bf16.msra.mxu1 %v5792_v41  ;;  %v1622_v21 = vld [vmem:[#allocation2 + $0x100] sm:$0x3] }
  0xf8   : > { %v864_v9 = vadd.f32 %v848_v34, %v802_v4  ;;  %v1079_v51 = vrot.slane %v1017_v63, 2  ;;  %v1080_v15 = vrot.slane %v1018_v53, 2  ;;  %v1082_v56 = vrot.slane %v1019_v46, 2 }
  0xf9   : > { %v865_v60 = vadd.f32 %v849_v48, %v803_v47  ;;  %v956_v57 = vsel %vm605_vm3, %v954_v38, %v955_v50  ;;  %v958_v58 = vsel %vm605_vm3, %v955_v50, %v957_v7  ;;  %v1161_v54 = vmul.f32 %v6885_v1, %v6732_v45 }
  0xfa   : > { %v989_v6 = vadd.f32 %v956_v57, %v864_v9  ;;  %v1081_v8 = vsel %vm731_vm4, %v1079_v51, %v1080_v15  ;;  %v1083_v59 = vsel %vm731_vm4, %v1080_v15, %v1082_v56  ;;  %v1162_v61 = vmul.f32 %v6885_v1, %v6737_v43 }
  0xfb   : > { %v990_v11 = vadd.f32 %v958_v58, %v865_v60  ;;  %v1205_v2 = vmul.f32 %v6897_v19, %v6732_v45  ;;  %v1206_v16 = vmul.f32 %v6897_v19, %v6737_v43  ;;  %v1207_v10 = vmul.f32 %v6897_v19, %v1140_v5 }
  0xfc   : > { %v1114_v36 = vadd.f32 %v1081_v8, %v989_v6  ;;  %v1330_v1 = vmul.f32 %v6907_v24, %v6732_v45  ;;  %v1331_v22 = vmul.f32 %v6907_v24, %v6737_v43  ;;  %v1332_v23 = vmul.f32 %v6907_v24, %v1140_v5  ;;  %v5793_v5 = vld [vmem:[%s8940_s5 + $0x10] sm:$0xff]  }
  0xfd   : > { %v1115_v14 = vadd.f32 %v1083_v59, %v990_v11  ;;  %v1267_v19 = vrot.slane %v1205_v2, 1  ;;  %v1268_v18 = vrot.slane %v1206_v16, 1  ;;  %v1270_v32 = vrot.slane %v1207_v10, 1  ;;  %v1918_v59 = vld [vmem:[#allocation2 + $0x118] sm:$0x3]  ;;  %5670 = vmatprep.subr.bf16.mxu1 %v5793_v5 }
  0xfe   : > { %v1177_v34 = vadd.f32 %v1161_v54, %v1114_v36  ;;  %v1392_v48 = vrot.slane %v1330_v1, 2  ;;  %v1393_v42 = vrot.slane %v1331_v22, 2  ;;  %v1395_v27 = vrot.slane %v1332_v23, 2  ;;  %5671 = vmatpush3.bf16.msra.mxu1 %v5793_v5 }
  0xff   : > { %v1178_v45 = vadd.f32 %v1162_v61, %v1115_v14  ;;  %v1269_v28 = vsel %vm605_vm3, %v1267_v19, %v1268_v18  ;;  %v1271_v43 = vsel %vm605_vm3, %v1268_v18, %v1270_v32  ;;  %v465_v24 = vmax.f32 %v433_v25, 0.0 }
 0x100   : > { %v1302_v35 = vadd.f32 %v1269_v28, %v1177_v34  ;;  %v1394_v40 = vsel %vm731_vm4, %v1392_v48, %v1393_v42  ;;  %v1396_v44 = vsel %vm731_vm4, %v1393_v42, %v1395_v27  ;;  %v466_v31 = vmax.f32 %v434_v33, 0.0 }
 0x101   : > { %v1303_v4 = vadd.f32 %v1271_v43, %v1178_v45  ;;  %497 = vst.msk [vmem:[#allocation2 + $0x121] sm:$0xff] %vm325_vm0, %v465_v24  ;;  %v1647_v63 = vmul.f32 %v6641_v39, %v6767_v13  ;;  %v1648_v53 = vmul.f32 %v6641_v39, %v6778_v17  ;;  %v1670_v46 = vmul.f32 %v6660_v12, %v6767_v13 }
 0x102   : > { %v1427_v47 = vadd.f32 %v1394_v40, %v1302_v35  ;;  %498 = vst.msk [vmem:[#allocation2 + $0x129] sm:$0xff] %vm325_vm0, %v466_v31  ;;  %v1671_v38 = vmul.f32 %v6660_v12, %v6778_v17  ;;  %v1672_v50 = vmul.f32 %v6660_v12, %v1622_v21  ;;  %v1795_v7 = vmul.f32 %v6665_v49, %v6767_v13 }
 0x103   : > { %v1428_v9 = vadd.f32 %v1396_v44, %v1303_v4  ;;  %v1722_v51 = vrot.slane %v1670_v46, 1  ;;  %v1796_v15 = vmul.f32 %v6665_v49, %v6778_v17  ;;  %v1797_v56 = vmul.f32 %v6665_v49, %v1622_v21 }
 0x104   : > { %v1723_v60 = vrot.slane %v1671_v38, 1  ;;  %v1725_v57 = vrot.slane %v1672_v50, 1  ;;  %v1847_v58 = vrot.slane %v1795_v7, 2  ;;  %v1943_v54 = vmul.f32 %v6706_v62, %v6836_v26  ;;  %v435_v38 = vld [vmem:[%s6090_s23 + $0xc0] sm:$0xff] }
 0x105   : > { %v1436_v6 = vpack.c.bf16 %v1428_v9, %v1427_v47  ;;  %v1848_v8 = vrot.slane %v1796_v15, 2  ;;  %v1850_v13 = vrot.slane %v1797_v56, 2  ;;  %v1944_v61 = vmul.f32 %v6706_v62, %v6839_v30 }
 0x106   : > { %v1724_v17 = vsel %vm605_vm3, %v1722_v51, %v1723_v60  ;;  %v1726_v11 = vsel %vm605_vm3, %v1723_v60, %v1725_v57  ;;  %v1982_v2 = vmul.f32 %v6714_v3, %v6836_v26  ;;  %v1983_v16 = vmul.f32 %v6714_v3, %v6839_v30  ;;  %v436_v57 = vld [vmem:[%s6090_s23 + $0xc8] sm:$0xff] }
 0x107   : > { %5625 = vmatmul.mubr.msk.bf16.gmra.mxu0 %vm325_vm0, %v1436_v6  ;;  %v1772_v10 = vadd.f32 %v1724_v17, %v1647_v63  ;;  %v1773_v29 = vadd.f32 %v1726_v11, %v1648_v53  ;;  %v1849_v41 = vsel %vm731_vm4, %v1847_v58, %v1848_v8  ;;  %v1851_v36 = vsel %vm731_vm4, %v1848_v8, %v1850_v13  ;;  %v1625_v11 = vld [vmem:[#allocation2 + $0x118] sm:$0x3] }
 0x108   : > { %v1984_v1 = vmul.f32 %v6714_v3, %v1918_v59  ;;  %v2034_v22 = vrot.slane %v1982_v2, 1  ;;  %v2035_v23 = vrot.slane %v1983_v16, 1  ;;  %v2107_v25 = vmul.f32 %v6744_v52, %v6836_v26  ;;  %v7021_v33 = vld [vmem:[#allocation2 + $0x120] sm:$0xff] }
 0x109   : > { %v1897_v14 = vadd.f32 %v1849_v41, %v1772_v10  ;;  %v1898_v19 = vadd.f32 %v1851_v36, %v1773_v29  ;;  %v2108_v18 = vmul.f32 %v6744_v52, %v6839_v30  ;;  %v2109_v32 = vmul.f32 %v6744_v52, %v1918_v59  ;;  %v7026_v21 = vld [vmem:[#allocation2 + $0x128] sm:$0xff]  ;;  %v2230_v35 = vld [vmem:[#allocation2 + $0x130] sm:$0x3] }
 0x10a   : > { %v2036_v34 = vsel %vm605_vm3, %v2034_v22, %v2035_v23  ;;  %v2037_v48 = vrot.slane %v1984_v1, 1  ;;  %v2159_v42 = vrot.slane %v2107_v25, 2  ;;  %v2255_v27 = vmul.f32 %v6760_v37, %v7021_v33 }
 0x10b   : > { %v1959_v45 = vadd.f32 %v1943_v54, %v1897_v14  ;;  %v1960_v28 = vadd.f32 %v1944_v61, %v1898_v19  ;;  %v2160_v43 = vrot.slane %v2108_v18, 2  ;;  %v2162_v24 = vrot.slane %v2109_v32, 2 }
 0x10c   : > { %v2038_v40 = vsel %vm605_vm3, %v2035_v23, %v2037_v48  ;;  %v2256_v44 = vmul.f32 %v6760_v37, %v7026_v21  ;;  %v2294_v31 = vmul.f32 %v6772_v55, %v7021_v33  ;;  %v2295_v4 = vmul.f32 %v6772_v55, %v7026_v21 }
 0x10d   : > { %v2084_v63 = vadd.f32 %v2036_v34, %v1959_v45  ;;  %v2085_v53 = vadd.f32 %v2038_v40, %v1960_v28  ;;  %v2161_v46 = vsel %vm731_vm4, %v2159_v42, %v2160_v43  ;;  %v2163_v47 = vsel %vm731_vm4, %v2160_v43, %v2162_v24  ;;  %v1921_v40 = vld [vmem:[#allocation2 + $0x130] sm:$0x3] }
 0x10e   : > { %v2296_v50 = vmul.f32 %v6772_v55, %v2230_v35  ;;  %v2346_v7 = vrot.slane %v2294_v31, 1  ;;  %v2347_v9 = vrot.slane %v2295_v4, 1  ;;  %v2419_v51 = vmul.f32 %v6783_v20, %v7021_v33 }
 0x10f   : > { %v2209_v15 = vadd.f32 %v2161_v46, %v2084_v63  ;;  %v2210_v56 = vadd.f32 %v2163_v47, %v2085_v53  ;;  %v2420_v5 = vmul.f32 %v6783_v20, %v7026_v21  ;;  %v2421_v60 = vmul.f32 %v6783_v20, %v2230_v35 }
 0x110   : > { %v2348_v58 = vsel %vm605_vm3, %v2346_v7, %v2347_v9  ;;  %v2349_v54 = vrot.slane %v2296_v50, 1  ;;  %v2471_v6 = vrot.slane %v2419_v51, 2  ;;  %v467_v8 = vmax.f32 %v435_v38, 0.0 }
 0x111   : > { %v2271_v13 = vadd.f32 %v2255_v27, %v2209_v15  ;;  %v2272_v59 = vadd.f32 %v2256_v44, %v2210_v56  ;;  %v2472_v61 = vrot.slane %v2420_v5, 2  ;;  %v2474_v17 = vrot.slane %v2421_v60, 2 }
 0x112   : > { %v2350_v2 = vsel %vm605_vm3, %v2347_v9, %v2349_v54  ;;  %v468_v16 = vmax.f32 %v436_v57, 0.0  ;;  %499 = vst.msk [vmem:[#allocation2 + $0x139] sm:$0xff] %vm325_vm0, %v467_v8  ;;  %v1649_v10 = vmul.f32 %v6641_v39, %v6836_v26  ;;  %v1650_v29 = vmul.f32 %v6641_v39, %v6839_v30 }
 0x113   : > { %v2396_v41 = vadd.f32 %v2348_v58, %v2271_v13  ;;  %v2397_v36 = vadd.f32 %v2350_v2, %v2272_v59  ;;  %v2473_v1 = vsel %vm731_vm4, %v2471_v6, %v2472_v61  ;;  %v2475_v22 = vsel %vm731_vm4, %v2472_v61, %v2474_v17 }
 0x114   : > { %500 = vst.msk [vmem:[#allocation2 + $0x141] sm:$0xff] %vm325_vm0, %v468_v16  ;;  %v1673_v23 = vmul.f32 %v6660_v12, %v6836_v26  ;;  %v1674_v25 = vmul.f32 %v6660_v12, %v6839_v30  ;;  %v1675_v14 = vmul.f32 %v6660_v12, %v1625_v11  ;;  %v1798_v19 = vmul.f32 %v6665_v49, %v6836_v26 }
 0x115   : > { %v2521_v18 = vadd.f32 %v2473_v1, %v2396_v41  ;;  %v2522_v32 = vadd.f32 %v2475_v22, %v2397_v36  ;;  %v1799_v34 = vmul.f32 %v6665_v49, %v6839_v30  ;;  %v1800_v48 = vmul.f32 %v6665_v49, %v1625_v11 }
 0x116   : > { %v1727_v42 = vrot.slane %v1673_v23, 1  ;;  %v1728_v27 = vrot.slane %v1674_v25, 1  ;;  %v1730_v45 = vrot.slane %v1675_v14, 1  ;;  %v1852_v28 = vrot.slane %v1798_v19, 2  ;;  %v437_v23 = vld [vmem:[%s6090_s23 + $0xd0] sm:$0xff] }
 0x117   : > { %v2535_v43 = vpack.c.bf16 %v2522_v32, %v2521_v18  ;;  %v1853_v24 = vrot.slane %v1799_v34, 2  ;;  %v1855_v35 = vrot.slane %v1800_v48, 2  ;;  %v1945_v44 = vmul.f32 %v6706_v62, %v7021_v33 }
 0x118   : > { %v1729_v26 = vsel %vm605_vm3, %v1727_v42, %v1728_v27  ;;  %v1731_v31 = vsel %vm605_vm3, %v1728_v27, %v1730_v45  ;;  %v1946_v30 = vmul.f32 %v6706_v62, %v7026_v21  ;;  %v1985_v4 = vmul.f32 %v6714_v3, %v7021_v33  ;;  %v438_v27 = vld [vmem:[%s6090_s23 + $0xd8] sm:$0xff] }
 0x119   : > { %5636 = vmatprep.mubr.msk.bf16.mxu1 %vm325_vm0, %v2535_v43  ;;  %v1774_v63 = vadd.f32 %v1729_v26, %v1649_v10  ;;  %v1775_v53 = vadd.f32 %v1731_v31, %v1650_v29  ;;  %v1854_v46 = vsel %vm731_vm4, %v1852_v28, %v1853_v24  ;;  %v1856_v47 = vsel %vm731_vm4, %v1853_v24, %v1855_v35  ;;  %v7084_v60 = vld [vmem:[#allocation2 + $0x138] sm:$0xff]  ;;  %v1628_v31 = vld [vmem:[#allocation2 + $0x130] sm:$0x3] }
 0x11a   : > { %v1986_v38 = vmul.f32 %v6714_v3, %v7026_v21  ;;  %v1987_v50 = vmul.f32 %v6714_v3, %v1921_v40  ;;  %v2039_v7 = vrot.slane %v1985_v4, 1  ;;  %v2110_v9 = vmul.f32 %v6744_v52, %v7021_v33 }
 0x11b   : > { %v1899_v51 = vadd.f32 %v1854_v46, %v1774_v63  ;;  %v1900_v15 = vadd.f32 %v1856_v47, %v1775_v53  ;;  %v2111_v56 = vmul.f32 %v6744_v52, %v7026_v21  ;;  %v2112_v5 = vmul.f32 %v6744_v52, %v1921_v40  ;;  %v7088_v17 = vld [vmem:[#allocation2 + $0x140] sm:$0xff]  ;;  %v2233_v11 = vld [vmem:[#allocation2 + $0x148] sm:$0x3] }
 0x11c   : > { %v2040_v57 = vrot.slane %v1986_v38, 1  ;;  %v2042_v58 = vrot.slane %v1987_v50, 1  ;;  %v2164_v54 = vrot.slane %v2110_v9, 2  ;;  %v2257_v6 = vmul.f32 %v6760_v37, %v7084_v60 }
 0x11d   : > { %v1961_v8 = vadd.f32 %v1945_v44, %v1899_v51  ;;  %v1962_v13 = vadd.f32 %v1946_v30, %v1900_v15  ;;  %v2165_v59 = vrot.slane %v2111_v56, 2  ;;  %v2167_v61 = vrot.slane %v2112_v5, 2 }
 0x11e   : > { %v2041_v2 = vsel %vm605_vm3, %v2039_v7, %v2040_v57  ;;  %v2043_v16 = vsel %vm605_vm3, %v2040_v57, %v2042_v58  ;;  %v2258_v10 = vmul.f32 %v6760_v37, %v7088_v17  ;;  %v2297_v29 = vmul.f32 %v6772_v55, %v7084_v60 }
 0x11f   : > { %v2086_v41 = vadd.f32 %v2041_v2, %v1961_v8  ;;  %v2087_v36 = vadd.f32 %v2043_v16, %v1962_v13  ;;  %v2166_v1 = vsel %vm731_vm4, %v2164_v54, %v2165_v59  ;;  %v2168_v22 = vsel %vm731_vm4, %v2165_v59, %v2167_v61 }
 0x120   : > { %v2298_v25 = vmul.f32 %v6772_v55, %v7088_v17  ;;  %v2299_v14 = vmul.f32 %v6772_v55, %v2233_v11  ;;  %v2351_v19 = vrot.slane %v2297_v29, 1  ;;  %v2422_v18 = vmul.f32 %v6783_v20, %v7084_v60 }
 0x121   : > { %v2211_v32 = vadd.f32 %v2166_v1, %v2086_v41  ;;  %v2212_v34 = vadd.f32 %v2168_v22, %v2087_v36  ;;  %v2423_v48 = vmul.f32 %v6783_v20, %v7088_v17  ;;  %v2424_v42 = vmul.f32 %v6783_v20, %v2233_v11  ;;  %v1924_v11 = vld [vmem:[#allocation2 + $0x148] sm:$0x3] }
 0x122   : > { %v2352_v45 = vrot.slane %v2298_v25, 1  ;;  %v2354_v28 = vrot.slane %v2299_v14, 1  ;;  %v2476_v43 = vrot.slane %v2422_v18, 2  ;;  %v469_v24 = vmax.f32 %v437_v23, 0.0 }
 0x123   : > { %v2273_v35 = vadd.f32 %v2257_v6, %v2211_v32  ;;  %v2274_v40 = vadd.f32 %v2258_v10, %v2212_v34  ;;  %v2477_v44 = vrot.slane %v2423_v48, 2  ;;  %v2479_v26 = vrot.slane %v2424_v42, 2 }
 0x124   : > { %v2353_v30 = vsel %vm605_vm3, %v2351_v19, %v2352_v45  ;;  %v2355_v4 = vsel %vm605_vm3, %v2352_v45, %v2354_v28  ;;  %v470_v63 = vmax.f32 %v438_v27, 0.0  ;;  %501 = vst.msk [vmem:[#allocation2 + $0x151] sm:$0xff] %vm325_vm0, %v469_v24  ;;  %v1651_v53 = vmul.f32 %v6641_v39, %v7021_v33 }
 0x125   : > { %v2398_v46 = vadd.f32 %v2353_v30, %v2273_v35  ;;  %v2399_v47 = vadd.f32 %v2355_v4, %v2274_v40  ;;  %v2478_v38 = vsel %vm731_vm4, %v2476_v43, %v2477_v44  ;;  %v2480_v50 = vsel %vm731_vm4, %v2477_v44, %v2479_v26 }
 0x126   : > { %502 = vst.msk [vmem:[#allocation2 + $0x159] sm:$0xff] %vm325_vm0, %v470_v63  ;;  %v1652_v7 = vmul.f32 %v6641_v39, %v7026_v21  ;;  %v1676_v9 = vmul.f32 %v6660_v12, %v7021_v33  ;;  %v1677_v51 = vmul.f32 %v6660_v12, %v7026_v21  ;;  %v1678_v15 = vmul.f32 %v6660_v12, %v1628_v31 }
 0x127   : > { %v2523_v56 = vadd.f32 %v2478_v38, %v2398_v46  ;;  %v2524_v5 = vadd.f32 %v2480_v50, %v2399_v47  ;;  %v1801_v57 = vmul.f32 %v6665_v49, %v7021_v33  ;;  %v1802_v58 = vmul.f32 %v6665_v49, %v7026_v21  ;;  %v439_v38 = vld [vmem:[%s6090_s23 + $0xe0] sm:$0xff] }
 0x128   : > { %v1732_v54 = vrot.slane %v1676_v9, 1  ;;  %v1733_v6 = vrot.slane %v1677_v51, 1  ;;  %v1735_v8 = vrot.slane %v1678_v15, 1  ;;  %v1803_v39 = vmul.f32 %v6665_v49, %v1628_v31  ;;  %v440_v51 = vld [vmem:[%s6090_s23 + $0xe8] sm:$0xff] }
 0x129   : > { %v2536_v13 = vpack.c.bf16 %v2524_v5, %v2523_v56  ;;  %v1857_v59 = vrot.slane %v1801_v57, 2  ;;  %v1858_v61 = vrot.slane %v1802_v58, 2  ;;  %v1947_v12 = vmul.f32 %v6706_v62, %v7084_v60 }
 0x12a   : > { %v1734_v2 = vsel %vm605_vm3, %v1732_v54, %v1733_v6  ;;  %v1736_v16 = vsel %vm605_vm3, %v1733_v6, %v1735_v8  ;;  %v1860_v33 = vrot.slane %v1803_v39, 2  ;;  %v1948_v21 = vmul.f32 %v6706_v62, %v7088_v17 }
 0x12b   : > { %5637 = vmatmul.mubr.msk.bf16.gmra.mxu1 %vm325_vm0, %v2536_v13  ;;  %v1776_v10 = vadd.f32 %v1734_v2, %v1651_v53  ;;  %v1777_v29 = vadd.f32 %v1736_v16, %v1652_v7  ;;  %v1859_v49 = vsel %vm731_vm4, %v1857_v59, %v1858_v61  ;;  %v1988_v41 = vmul.f32 %v6714_v3, %v7084_v60  ;;  %v7147_v42 = vld [vmem:[#allocation2 + $0x150] sm:$0xff] }
 0x12c   : > { %v1861_v36 = vsel %vm731_vm4, %v1858_v61, %v1860_v33  ;;  %v1989_v1 = vmul.f32 %v6714_v3, %v7088_v17  ;;  %v1990_v22 = vmul.f32 %v6714_v3, %v1924_v11  ;;  %v2113_v23 = vmul.f32 %v6744_v52, %v7084_v60  ;;  %v1631_v61 = vld [vmem:[#allocation2 + $0x148] sm:$0x3] }
 0x12d   : > { %v1901_v62 = vadd.f32 %v1859_v49, %v1776_v10  ;;  %v1902_v25 = vadd.f32 %v1861_v36, %v1777_v29  ;;  %v2044_v14 = vrot.slane %v1988_v41, 1  ;;  %v2114_v19 = vmul.f32 %v6744_v52, %v7088_v17  ;;  %v7149_v3 = vld [vmem:[#allocation2 + $0x158] sm:$0xff]  ;;  %v2236_v43 = vld [vmem:[#allocation2 + $0x160] sm:$0x3] }
 0x12e   : > { %v2045_v18 = vrot.slane %v1989_v1, 1  ;;  %v2047_v32 = vrot.slane %v1990_v22, 1  ;;  %v2115_v34 = vmul.f32 %v6744_v52, %v1924_v11  ;;  %v2169_v48 = vrot.slane %v2113_v23, 2  ;;  %v7189_v10 = vld [vmem:[%s8936_s1 + $0x1] ss:$0 sm:$0xff] }
 0x12f   : > { %v1963_v27 = vadd.f32 %v1947_v12, %v1901_v62  ;;  %v1964_v45 = vadd.f32 %v1948_v21, %v1902_v25  ;;  %v2170_v28 = vrot.slane %v2114_v19, 2  ;;  %v2259_v24 = vmul.f32 %v6760_v37, %v7147_v42  ;;  %v7199_v22 = vld [vmem:[%s8936_s1 + $0x2] ss:$0 sm:$0xff] }
 0x130   : > { %v2046_v35 = vsel %vm605_vm3, %v2044_v14, %v2045_v18  ;;  %v2048_v40 = vsel %vm605_vm3, %v2045_v18, %v2047_v32  ;;  %v2172_v44 = vrot.slane %v2115_v34, 2  ;;  %v2260_v52 = vmul.f32 %v6760_v37, %v7149_v3 }
 0x131   : > { %v2088_v26 = vadd.f32 %v2046_v35, %v1963_v27  ;;  %v2089_v31 = vadd.f32 %v2048_v40, %v1964_v45  ;;  %v2171_v30 = vsel %vm731_vm4, %v2169_v48, %v2170_v28  ;;  %v2300_v4 = vmul.f32 %v6772_v55, %v7147_v42  ;;  %v1927_v48 = vld [vmem:[#allocation2 + $0x160] sm:$0x3]  ;;  %v7209_v27 = vld [vmem:[%s8936_s1 + $0x4] ss:$0 sm:$0xff]  ;;  %v7221_v40 = vld [vmem:[%s8936_s1 + $0x5] ss:$0 sm:$0xff] }
 0x132   : > { %v2173_v63 = vsel %vm731_vm4, %v2170_v28, %v2172_v44  ;;  %v2301_v53 = vmul.f32 %v6772_v55, %v7149_v3  ;;  %v2302_v46 = vmul.f32 %v6772_v55, %v2236_v43  ;;  %v2425_v47 = vmul.f32 %v6783_v20, %v7147_v42 }
 0x133   : > { %v2213_v50 = vadd.f32 %v2171_v30, %v2088_v26  ;;  %v2214_v37 = vadd.f32 %v2173_v63, %v2089_v31  ;;  %v2356_v7 = vrot.slane %v2300_v4, 1  ;;  %v2426_v9 = vmul.f32 %v6783_v20, %v7149_v3 }
 0x134   : > { %v2357_v15 = vrot.slane %v2301_v53, 1  ;;  %v2359_v56 = vrot.slane %v2302_v46, 1  ;;  %v2427_v5 = vmul.f32 %v6783_v20, %v2236_v43  ;;  %v2481_v57 = vrot.slane %v2425_v47, 2  ;;  %v7178_v20 = vld [vmem:[%s8936_s1] ss:$0 sm:$0xff] }
 0x135   : > { %v2275_v58 = vadd.f32 %v2259_v24, %v2213_v50  ;;  %v2276_v54 = vadd.f32 %v2260_v52, %v2214_v37  ;;  %v2482_v6 = vrot.slane %v2426_v9, 2  ;;  %v471_v55 = vmax.f32 %v439_v38, 0.0  ;;  %v7233_v47 = vld [vmem:[%s8936_s1 + $0x6] ss:$0 sm:$0xff] }
 0x136   : > { %v2358_v8 = vsel %vm605_vm3, %v2356_v7, %v2357_v15  ;;  %v2360_v39 = vsel %vm605_vm3, %v2357_v15, %v2359_v56  ;;  %v2484_v13 = vrot.slane %v2427_v5, 2  ;;  %v472_v59 = vmax.f32 %v440_v51, 0.0 }
 0x137   : > { %v2400_v11 = vadd.f32 %v2358_v8, %v2275_v58  ;;  %v2401_v12 = vadd.f32 %v2360_v39, %v2276_v54  ;;  %v2483_v2 = vsel %vm731_vm4, %v2481_v57, %v2482_v6  ;;  %503 = vst.msk [vmem:[#allocation2 + $0x169] sm:$0xff] %vm325_vm0, %v471_v55  ;;  %v1653_v16 = vmul.f32 %v7178_v20, %v7084_v60  ;;  %v7246_v58 = vld [vmem:[%s8936_s1 + $0x8] ss:$0 sm:$0xff] }
 0x138   : > { %v2485_v33 = vsel %vm731_vm4, %v2482_v6, %v2484_v13  ;;  %504 = vst.msk [vmem:[#allocation2 + $0x171] sm:$0xff] %vm325_vm0, %v472_v59  ;;  %v1654_v21 = vmul.f32 %v7178_v20, %v7088_v17  ;;  %v1679_v29 = vmul.f32 %v7189_v10, %v7084_v60  ;;  %v1680_v49 = vmul.f32 %v7189_v10, %v7088_v17 }
 0x139   : > { %v2525_v41 = vadd.f32 %v2483_v2, %v2400_v11  ;;  %v2526_v36 = vadd.f32 %v2485_v33, %v2401_v12  ;;  %v1681_v1 = vmul.f32 %v7189_v10, %v1631_v61  ;;  %v1804_v23 = vmul.f32 %v7199_v22, %v7084_v60  ;;  %v7258_v11 = vld [vmem:[%s8936_s1 + $0x9] ss:$0 sm:$0xff] }
 0x13a   : > { %v1737_v62 = vrot.slane %v1679_v29, 1  ;;  %v1738_v25 = vrot.slane %v1680_v49, 1  ;;  %v1805_v14 = vmul.f32 %v7199_v22, %v7088_v17  ;;  %v1806_v19 = vmul.f32 %v7199_v22, %v1631_v61  ;;  %v441_v49 = vld [vmem:[%s6090_s23 + $0xf0] sm:$0xff] }
 0x13b   : > { %v2537_v18 = vpack.c.bf16 %v2526_v36, %v2525_v41  ;;  %v1740_v32 = vrot.slane %v1681_v1, 1  ;;  %v1862_v34 = vrot.slane %v1804_v23, 2  ;;  %v1949_v45 = vmul.f32 %v7209_v27, %v7147_v42  ;;  %v7271_v23 = vld [vmem:[%s8936_s1 + $0xa] ss:$0 sm:$0xff] }
 0x13c   : > { %v1739_v60 = vsel %vm605_vm3, %v1737_v62, %v1738_v25  ;;  %v1863_v28 = vrot.slane %v1805_v14, 2  ;;  %v1865_v43 = vrot.slane %v1806_v19, 2  ;;  %v1950_v17 = vmul.f32 %v7209_v27, %v7149_v3 }
 0x13d   : > { %5640 = vmatprep.mubr.msk.bf16.mxu1 %vm325_vm0, %v2537_v18  ;;  %v1741_v24 = vsel %vm605_vm3, %v1738_v25, %v1740_v32  ;;  %v1778_v35 = vadd.f32 %v1739_v60, %v1653_v16  ;;  %v1991_v44 = vmul.f32 %v7221_v40, %v7147_v42  ;;  %v1992_v52 = vmul.f32 %v7221_v40, %v7149_v3  ;;  %v442_v32 = vld [vmem:[%s6090_s23 + $0xf8] sm:$0xff] }
 0x13e   : > { %v1779_v26 = vadd.f32 %v1741_v24, %v1654_v21  ;;  %v1864_v31 = vsel %vm731_vm4, %v1862_v34, %v1863_v28  ;;  %v1866_v30 = vsel %vm731_vm4, %v1863_v28, %v1865_v43  ;;  %v1993_v4 = vmul.f32 %v7221_v40, %v1927_v48  ;;  %v7240_v51 = vld [vmem:[#allocation2 + $0x168] sm:$0xff] }
 0x13f   : > { %v1903_v63 = vadd.f32 %v1864_v31, %v1778_v35  ;;  %v2049_v53 = vrot.slane %v1991_v44, 1  ;;  %v2050_v46 = vrot.slane %v1992_v52, 1  ;;  %v2116_v38 = vmul.f32 %v7233_v47, %v7147_v42  ;;  %v2239_v57 = vld [vmem:[#allocation2 + $0x178] sm:$0x3]  ;;  %v7251_v13 = vld [vmem:[#allocation2 + $0x170] sm:$0xff] }
 0x140   : > { %v1904_v50 = vadd.f32 %v1866_v30, %v1779_v26  ;;  %v2052_v37 = vrot.slane %v1993_v4, 1  ;;  %v2117_v7 = vmul.f32 %v7233_v47, %v7149_v3  ;;  %v2118_v9 = vmul.f32 %v7233_v47, %v1927_v48  ;;  %v1634_v35 = vld [vmem:[#allocation2 + $0x160] sm:$0x3] }
 0x141   : > { %v1965_v15 = vadd.f32 %v1949_v45, %v1903_v63  ;;  %v2051_v56 = vsel %vm605_vm3, %v2049_v53, %v2050_v46  ;;  %v2174_v5 = vrot.slane %v2116_v38, 2  ;;  %v2261_v54 = vmul.f32 %v7246_v58, %v7240_v51 }
 0x142   : > { %v1966_v6 = vadd.f32 %v1950_v17, %v1904_v50  ;;  %v2053_v55 = vsel %vm605_vm3, %v2050_v46, %v2052_v37  ;;  %v2175_v8 = vrot.slane %v2117_v7, 2  ;;  %v2177_v39 = vrot.slane %v2118_v9, 2 }
 0x143   : > { %v2090_v59 = vadd.f32 %v2051_v56, %v1965_v15  ;;  %v2262_v61 = vmul.f32 %v7246_v58, %v7251_v13  ;;  %v2303_v12 = vmul.f32 %v7258_v11, %v7240_v51  ;;  %v2304_v2 = vmul.f32 %v7258_v11, %v7251_v13 }
 0x144   : > { %v2091_v16 = vadd.f32 %v2053_v55, %v1966_v6  ;;  %v2176_v33 = vsel %vm731_vm4, %v2174_v5, %v2175_v8  ;;  %v2178_v21 = vsel %vm731_vm4, %v2175_v8, %v2177_v39  ;;  %v2305_v29 = vmul.f32 %v7258_v11, %v2239_v57  ;;  %v5794_v5 = vld [vmem:[%s8941_s6] sm:$0xff]  }
 0x145   : > { %v2215_v41 = vadd.f32 %v2176_v33, %v2090_v59  ;;  %v2361_v36 = vrot.slane %v2303_v12, 1  ;;  %v2362_v1 = vrot.slane %v2304_v2, 1  ;;  %v2428_v62 = vmul.f32 %v7271_v23, %v7240_v51  ;;  %5650 = vmatprep.subr.bf16.mxu0 %v5794_v5 }
 0x146   : > { %v2216_v25 = vadd.f32 %v2178_v21, %v2091_v16  ;;  %v2364_v14 = vrot.slane %v2305_v29, 1  ;;  %v2429_v19 = vmul.f32 %v7271_v23, %v7251_v13  ;;  %v2430_v18 = vmul.f32 %v7271_v23, %v2239_v57  ;;  %v5795_v57 = vld [vmem:[%s8940_s5 + $0x8] sm:$0xff]   ;;  %5651 = vmatpush3.bf16.msra.mxu0 %v5794_v5 }
 0x147   : > { %v2277_v34 = vadd.f32 %v2261_v54, %v2215_v41  ;;  %v2363_v48 = vsel %vm605_vm3, %v2361_v36, %v2362_v1  ;;  %v2486_v45 = vrot.slane %v2428_v62, 2  ;;  %v473_v60 = vmax.f32 %v441_v49, 0.0  ;;  %5672 = vmatprep.subr.bf16.mxu1 %v5795_v57 }
 0x148   : > { %v2278_v28 = vadd.f32 %v2262_v61, %v2216_v25  ;;  %v2365_v43 = vsel %vm605_vm3, %v2362_v1, %v2364_v14  ;;  %v2487_v17 = vrot.slane %v2429_v19, 2  ;;  %v2489_v24 = vrot.slane %v2430_v18, 2  ;;  %5673 = vmatpush3.bf16.msra.mxu1 %v5795_v57 }
 0x149   : > { %v2402_v44 = vadd.f32 %v2363_v48, %v2277_v34  ;;  %v474_v52 = vmax.f32 %v442_v32, 0.0  ;;  %505 = vst.msk [vmem:[#allocation2 + $0x181] sm:$0xff] %vm325_vm0, %v473_v60  ;;  %v1655_v26 = vmul.f32 %v7178_v20, %v7147_v42  ;;  %v1656_v31 = vmul.f32 %v7178_v20, %v7149_v3  ;;  %v7326_v48 = vpop.f32.mrf.mxu0 }
 0x14a   : > { %v2403_v30 = vadd.f32 %v2365_v43, %v2278_v28  ;;  %v2488_v4 = vsel %vm731_vm4, %v2486_v45, %v2487_v17  ;;  %v2490_v63 = vsel %vm731_vm4, %v2487_v17, %v2489_v24  ;;  %v1682_v53 = vmul.f32 %v7189_v10, %v7147_v42 }
 0x14b   : > { %v2527_v46 = vadd.f32 %v2488_v4, %v2402_v44  ;;  %506 = vst.msk [vmem:[#allocation2 + $0x189] sm:$0xff] %vm325_vm0, %v474_v52  ;;  %v1683_v38 = vmul.f32 %v7189_v10, %v7149_v3  ;;  %v1684_v50 = vmul.f32 %v7189_v10, %v1634_v35  ;;  %v1807_v37 = vmul.f32 %v7199_v22, %v7147_v42 }
 0x14c   : > { %v2528_v7 = vadd.f32 %v2490_v63, %v2403_v30  ;;  %v1742_v9 = vrot.slane %v1682_v53, 1  ;;  %v1808_v15 = vmul.f32 %v7199_v22, %v7149_v3  ;;  %v1809_v56 = vmul.f32 %v7199_v22, %v1634_v35  ;;  %v1930_v3 = vld [vmem:[#allocation2 + $0x178] sm:$0x3] }
 0x14d   : > { %v1743_v54 = vrot.slane %v1683_v38, 1  ;;  %v1745_v6 = vrot.slane %v1684_v50, 1  ;;  %v1867_v55 = vrot.slane %v1807_v37, 2  ;;  %v1951_v42 = vmul.f32 %v7209_v27, %v7240_v51  ;;  %v7342_v37 = vpop.f32.mrf.mxu0 }
 0x14e   : > { %v2538_v8 = vpack.c.bf16 %v2528_v7, %v2527_v46  ;;  %v1868_v39 = vrot.slane %v1808_v15, 2  ;;  %v1870_v59 = vrot.slane %v1809_v56, 2  ;;  %v1952_v61 = vmul.f32 %v7209_v27, %v7251_v13 }
 0x14f   : > { %v1744_v12 = vsel %vm605_vm3, %v1742_v9, %v1743_v54  ;;  %v1746_v2 = vsel %vm605_vm3, %v1743_v54, %v1745_v6  ;;  %v1994_v16 = vmul.f32 %v7221_v40, %v7240_v51  ;;  %v1995_v33 = vmul.f32 %v7221_v40, %v7251_v13 }
 0x150   : > { %5641 = vmatmul.mubr.msk.bf16.gmra.mxu1 %vm325_vm0, %v2538_v8  ;;  %v1780_v21 = vadd.f32 %v1744_v12, %v1655_v26  ;;  %v1781_v29 = vadd.f32 %v1746_v2, %v1656_v31  ;;  %v1869_v49 = vsel %vm731_vm4, %v1867_v55, %v1868_v39  ;;  %v1871_v41 = vsel %vm731_vm4, %v1868_v39, %v1870_v59  ;;  %v7324_v34 = vld [vmem:[#allocation2 + $0x180] sm:$0xff]  ;;  %v1637_v2 = vld [vmem:[#allocation2 + $0x178] sm:$0x3] }
 0x151   : > { %v1996_v36 = vmul.f32 %v7221_v40, %v1930_v3  ;;  %v2054_v1 = vrot.slane %v1994_v16, 1  ;;  %v2055_v62 = vrot.slane %v1995_v33, 1  ;;  %v2119_v25 = vmul.f32 %v7233_v47, %v7240_v51  ;;  %v7353_v16 = vpop.f32.mrf.mxu0 }
 0x152   : > { %v1905_v14 = vadd.f32 %v1869_v49, %v1780_v21  ;;  %v1906_v19 = vadd.f32 %v1871_v41, %v1781_v29  ;;  %v2120_v18 = vmul.f32 %v7233_v47, %v7251_v13  ;;  %v2121_v32 = vmul.f32 %v7233_v47, %v1930_v3  ;;  %v7331_v52 = vld [vmem:[#allocation2 + $0x188] sm:$0xff]  ;;  %v2242_v26 = vld [vmem:[#allocation2 + $0x190] sm:$0x3] }
 0x153   : > { %v2056_v45 = vsel %vm605_vm3, %v2054_v1, %v2055_v62  ;;  %v2057_v60 = vrot.slane %v1996_v36, 1  ;;  %v2179_v28 = vrot.slane %v2119_v25, 2  ;;  %v2263_v43 = vmul.f32 %v7246_v58, %v7324_v34 }
 0x154   : > { %v1967_v17 = vadd.f32 %v1951_v42, %v1905_v14  ;;  %v1968_v24 = vadd.f32 %v1952_v61, %v1906_v19  ;;  %v2180_v35 = vrot.slane %v2120_v18, 2  ;;  %v2182_v44 = vrot.slane %v2121_v32, 2 }
 0x155   : > { %v2058_v31 = vsel %vm605_vm3, %v2055_v62, %v2057_v60  ;;  %v2264_v30 = vmul.f32 %v7246_v58, %v7331_v52  ;;  %v2306_v4 = vmul.f32 %v7258_v11, %v7324_v34  ;;  %v2307_v63 = vmul.f32 %v7258_v11, %v7331_v52 }
 0x156   : > { %v2092_v53 = vadd.f32 %v2056_v45, %v1967_v17  ;;  %v2093_v46 = vadd.f32 %v2058_v31, %v1968_v24  ;;  %v2181_v38 = vsel %vm731_vm4, %v2179_v28, %v2180_v35  ;;  %v2183_v50 = vsel %vm731_vm4, %v2180_v35, %v2182_v44  ;;  %v7370_v28 = vpop.f32.mrf.mxu0  ;;  %v1933_v35 = vld [vmem:[#allocation2 + $0x190] sm:$0x3] }
 0x157   : > { %v2308_v7 = vmul.f32 %v7258_v11, %v2242_v26  ;;  %v2366_v9 = vrot.slane %v2306_v4, 1  ;;  %v2367_v15 = vrot.slane %v2307_v63, 1  ;;  %v2431_v56 = vmul.f32 %v7271_v23, %v7324_v34 }
 0x158   : > { %v2217_v5 = vadd.f32 %v2181_v38, %v2092_v53  ;;  %v2218_v57 = vadd.f32 %v2183_v50, %v2093_v46  ;;  %v2432_v54 = vmul.f32 %v7271_v23, %v7331_v52  ;;  %v2433_v6 = vmul.f32 %v7271_v23, %v2242_v26  ;;  %v2243_v50 = vld [vmem:[#allocation2 + $0x198] sm:$0xff] }
 0x159   : > { %v2368_v55 = vsel %vm605_vm3, %v2366_v9, %v2367_v15  ;;  %v2369_v42 = vrot.slane %v2308_v7, 1  ;;  %v2491_v8 = vrot.slane %v2431_v56, 2  ;;  %v1657_v39 = vmul.f32 %v7178_v20, %v7240_v51  ;;  %v7386_v7 = vpop.f32.mrf.mxu0 }
 0x15a   : > { %v2279_v59 = vadd.f32 %v2263_v43, %v2217_v5  ;;  %v2280_v3 = vadd.f32 %v2264_v30, %v2218_v57  ;;  %v2492_v61 = vrot.slane %v2432_v54, 2  ;;  %v2494_v12 = vrot.slane %v2433_v6, 2 }
 0x15b   : > { %v2370_v33 = vsel %vm605_vm3, %v2367_v15, %v2369_v42  ;;  %v1658_v21 = vmul.f32 %v7178_v20, %v7251_v13  ;;  %v1685_v29 = vmul.f32 %v7189_v10, %v7240_v51  ;;  %v1686_v49 = vmul.f32 %v7189_v10, %v7251_v13 }
 0x15c   : > { %v2404_v41 = vadd.f32 %v2368_v55, %v2279_v59  ;;  %v2405_v36 = vadd.f32 %v2370_v33, %v2280_v3  ;;  %v2493_v1 = vsel %vm731_vm4, %v2491_v8, %v2492_v61  ;;  %v2495_v62 = vsel %vm731_vm4, %v2492_v61, %v2494_v12  ;;  %v2244_v55 = vld [vmem:[#allocation2 + $0x1a0] sm:$0xff] }
 0x15d   : > { %v1687_v25 = vmul.f32 %v7189_v10, %v1637_v2  ;;  %v1747_v14 = vrot.slane %v1685_v29, 1  ;;  %v1748_v19 = vrot.slane %v1686_v49, 1  ;;  %v1810_v18 = vmul.f32 %v7199_v22, %v7240_v51 }
 0x15e   : > { %v2529_v20 = vadd.f32 %v2493_v1, %v2404_v41  ;;  %v2530_v32 = vadd.f32 %v2495_v62, %v2405_v36  ;;  %v1811_v45 = vmul.f32 %v7199_v22, %v7251_v13  ;;  %v1812_v60 = vmul.f32 %v7199_v22, %v1637_v2  ;;  %v7396_v2 = vpop.f32.mrf.mxu0 }
 0x15f   : > { %v1749_v43 = vsel %vm605_vm3, %v1747_v14, %v1748_v19  ;;  %v1750_v17 = vrot.slane %v1687_v25, 1  ;;  %v1872_v24 = vrot.slane %v1810_v18, 2  ;;  %v1953_v10 = vmul.f32 %v7209_v27, %v7324_v34 }
 0x160   : > { %v2539_v44 = vpack.c.bf16 %v2530_v32, %v2529_v20  ;;  %v1782_v26 = vadd.f32 %v1749_v43, %v1657_v39  ;;  %v1873_v51 = vrot.slane %v1811_v45, 2  ;;  %v1875_v31 = vrot.slane %v1812_v60, 2  ;;  %v2245_v39 = vld [vmem:[#allocation2 + $0x1a8] sm:$0x3]  ;;  %v7410_v32 = vld [vmem:[%s8938_s3] ss:$0 sm:$0xff]  ;;  %v7412_v45 = vpop.f32.mrf.mxu0 }
 0x161   : > { %v1751_v30 = vsel %vm605_vm3, %v1748_v19, %v1750_v17  ;;  %v1954_v13 = vmul.f32 %v7209_v27, %v7331_v52  ;;  %v1997_v22 = vmul.f32 %v7221_v40, %v7324_v34  ;;  %v1998_v4 = vmul.f32 %v7221_v40, %v7331_v52 }
 0x162   : > { %5644 = vmatprep.mubr.msk.bf16.mxu1 %vm325_vm0, %v2539_v44  ;;  %v1783_v63 = vadd.f32 %v1751_v30, %v1658_v21  ;;  %v1874_v53 = vsel %vm731_vm4, %v1872_v24, %v1873_v51  ;;  %v1876_v46 = vsel %vm731_vm4, %v1873_v51, %v1875_v31  ;;  %v1999_v38 = vmul.f32 %v7221_v40, %v1933_v35 }
 0x163   : > { %v1907_v9 = vadd.f32 %v1874_v53, %v1782_v26  ;;  %v2059_v27 = vrot.slane %v1997_v22, 1  ;;  %v2060_v15 = vrot.slane %v1998_v4, 1  ;;  %v2122_v56 = vmul.f32 %v7233_v47, %v7324_v34 }
 0x164   : > { %v1908_v5 = vadd.f32 %v1876_v46, %v1783_v63  ;;  %v2062_v57 = vrot.slane %v1999_v38, 1  ;;  %v2123_v54 = vmul.f32 %v7233_v47, %v7331_v52  ;;  %v2124_v6 = vmul.f32 %v7233_v47, %v1933_v35 }
 0x165   : > { %v1969_v42 = vadd.f32 %v1953_v10, %v1907_v9  ;;  %v2061_v40 = vsel %vm605_vm3, %v2059_v27, %v2060_v15  ;;  %v2184_v8 = vrot.slane %v2122_v56, 2  ;;  %v2265_v59 = vmul.f32 %v7246_v58, %v2243_v50 }
 0x166   : > { %v1970_v3 = vadd.f32 %v1954_v13, %v1908_v5  ;;  %v2063_v61 = vsel %vm605_vm3, %v2060_v15, %v2062_v57  ;;  %v2185_v12 = vrot.slane %v2123_v54, 2  ;;  %v2187_v34 = vrot.slane %v2124_v6, 2  ;;  %v5796_v57 = vld [vmem:[%s8940_s5] sm:$0xff]  }
 0x167   : > { %v2094_v33 = vadd.f32 %v2061_v40, %v1969_v42  ;;  %v2266_v52 = vmul.f32 %v7246_v58, %v2244_v55  ;;  %v2309_v47 = vmul.f32 %v7258_v11, %v2243_v50  ;;  %v2310_v21 = vmul.f32 %v7258_v11, %v2244_v55  ;;  %5674 = vmatprep.subr.bf16.mxu1 %v5796_v57 }
 0x168   : > { %v2095_v29 = vadd.f32 %v2063_v61, %v1970_v3  ;;  %v2186_v49 = vsel %vm731_vm4, %v2184_v8, %v2185_v12  ;;  %v2188_v41 = vsel %vm731_vm4, %v2185_v12, %v2187_v34  ;;  %v2311_v36 = vmul.f32 %v7258_v11, %v2245_v39  ;;  %5675 = vmatpush3.bf16.msra.mxu1 %v5796_v57 }
 0x169   : > { %v2219_v1 = vadd.f32 %v2186_v49, %v2094_v33  ;;  %v2371_v62 = vrot.slane %v2309_v47, 1  ;;  %v2372_v25 = vrot.slane %v2310_v21, 1  ;;  %v2434_v14 = vmul.f32 %v7271_v23, %v2243_v50  ;;  %v2718_v33 = vld [vmem:[#allocation3] sm:$0xff]  ;;  %v7539_v49 = vld [vmem:[%s8939_s4 + $0x2] ss:$0 sm:$0xff] }
 0x16a   : > { %v2220_v19 = vadd.f32 %v2188_v41, %v2095_v29  ;;  %v2374_v18 = vrot.slane %v2311_v36, 1  ;;  %v2435_v58 = vmul.f32 %v7271_v23, %v2244_v55  ;;  %v2436_v20 = vmul.f32 %v7271_v23, %v2245_v39  ;;  %v7548_v36 = vld [vmem:[%s8939_s4] ss:$0 sm:$0xff] }
 0x16b   : > { %v2281_v60 = vadd.f32 %v2265_v59, %v2219_v1  ;;  %v2373_v11 = vsel %vm605_vm3, %v2371_v62, %v2372_v25  ;;  %v2496_v43 = vrot.slane %v2434_v14, 2  ;;  %v1527_v44 = vadd.f32 %v7326_v48, %v7410_v32 }
 0x16c   : > { %v2282_v17 = vadd.f32 %v2266_v52, %v2220_v19  ;;  %v2375_v24 = vsel %vm605_vm3, %v2372_v25, %v2374_v18  ;;  %v2497_v35 = vrot.slane %v2435_v58, 2  ;;  %v2499_v10 = vrot.slane %v2436_v20, 2  ;;  %v2719_v52 = vld [vmem:[#allocation3 + $0x8] sm:$0xff]  ;;  %v3654_v18 = vld [vmem:[%s6090_s23] sm:$0xff]  ;;  %v3655_v58 = vld [vmem:[%s6090_s23 + $0x8] sm:$0xff] }
 0x16d   : > { %v2406_v23 = vadd.f32 %v2373_v11, %v2281_v60  ;;  %v1519_v26 = vadd.f32 %v7410_v32, %v7342_v37  ;;  %v1530_v48 = vadd.f32 %v7353_v16, %v7410_v32  ;;  %v1537_v37 = vpop.f32.mrf.mxu0  ;;  %v1583_v22 = vmax.f32 %v1527_v44, 0.0  ;;  %v2720_v20 = vld [vmem:[#allocation3 + $0x10] sm:$0x3] }
 0x16e   : > { %v2407_v51 = vadd.f32 %v2375_v24, %v2282_v17  ;;  %v2498_v31 = vsel %vm731_vm4, %v2496_v43, %v2497_v35  ;;  %v2500_v30 = vsel %vm731_vm4, %v2497_v35, %v2499_v10  ;;  %v1522_v63 = vadd.f32 %v7410_v32, %v7370_v28  ;;  %v7564_v24 = vld [vmem:[%s8939_s4 + $0x4] ss:$0 sm:$0xff]  ;;  %v3656_v35 = vld [vmem:[%s6090_s23 + $0x10] sm:$0xff]  ;;  %v3657_v10 = vld [vmem:[%s6090_s23 + $0x18] sm:$0xff] }
 0x16f   : > { %v2531_v13 = vadd.f32 %v2498_v31, %v2406_v23  ;;  %v1581_v4 = vmax.f32 %v1519_v26, 0.0  ;;  %v1584_v46 = vmax.f32 %v1530_v48, 0.0  ;;  %v1543_v38 = vadd.f32 %v7386_v7, %v7410_v32  ;;  %1599 = vst.msk [vmem:[#allocation3 + $0x31] sm:$0xff] %vm368_vm5, %v1583_v22  ;;  %v7578_v22 = vld [vmem:[%s8939_s4 + $0x5] ss:$0 sm:$0xff] }
 0x170   : > { %v2532_v53 = vadd.f32 %v2500_v30, %v2407_v51  ;;  %v1535_v50 = vadd.f32 %v7410_v32, %v7396_v2  ;;  %v1582_v16 = vmax.f32 %v1522_v63, 0.0  ;;  %v1546_v9 = vadd.f32 %v7412_v45, %v7410_v32  ;;  %v7530_v2 = vld [vmem:[%s8939_s4 + $0x1] ss:$0 sm:$0xff] }
 0x171   : > { %1597 = vst.msk [vmem:[#allocation3 + $0x19] sm:$0xff] %vm368_vm5, %v1581_v4  ;;  %v1538_v27 = vadd.f32 %v7410_v32, %v1537_v37  ;;  %1600 = vst.msk [vmem:[#allocation3 + $0x39] sm:$0xff] %vm368_vm5, %v1584_v46  ;;  %v1587_v28 = vmax.f32 %v1543_v38, 0.0  ;;  %v2768_v21 = vmul.f32 %v7530_v2, %v2718_v33  ;;  %v2769_v29 = vmul.f32 %v7530_v2, %v2719_v52  ;;  %v7588_v38 = vld [vmem:[%s8939_s4 + $0x6] ss:$0 sm:$0xff] }
 0x172   : > { %v2540_v15 = vpack.c.bf16 %v2532_v53, %v2531_v13  ;;  %v1585_v56 = vmax.f32 %v1535_v50, 0.0  ;;  %1598 = vst.msk [vmem:[#allocation3 + $0x21] sm:$0xff] %vm368_vm5, %v1582_v16  ;;  %v1588_v7 = vmax.f32 %v1546_v9, 0.0  ;;  %v2893_v25 = vmul.f32 %v7539_v49, %v2718_v33 }
 0x173   : > { %v1586_v5 = vmax.f32 %v1538_v27, 0.0  ;;  %1603 = vst.msk [vmem:[#allocation3 + $0x61] sm:$0xff] %vm368_vm5, %v1587_v28  ;;  %v2816_v1 = vrot.slane %v2768_v21, 1  ;;  %v2817_v62 = vrot.slane %v2769_v29, 1  ;;  %v2894_v14 = vmul.f32 %v7539_v49, %v2719_v52  ;;  %v7600_v28 = vld [vmem:[%s8939_s4 + $0x8] ss:$0 sm:$0xff] }
 0x174   : > { %5645 = vmatmul.mubr.msk.bf16.gmra.mxu1 %vm325_vm0, %v2540_v15  ;;  %1601 = vst.msk [vmem:[#allocation3 + $0x49] sm:$0xff] %vm368_vm5, %v1585_v56  ;;  %1604 = vst.msk [vmem:[#allocation3 + $0x69] sm:$0xff] %vm368_vm5, %v1588_v7  ;;  %v2747_v45 = vmul.f32 %v7548_v36, %v2718_v33  ;;  %v3670_v60 = vpack.c.bf16 %v3655_v58, %v3654_v18  ;;  %v2770_v11 = vmul.f32 %v7530_v2, %v2720_v20 }
 0x175   : > { %1602 = vst.msk [vmem:[#allocation3 + $0x51] sm:$0xff] %vm368_vm5, %v1586_v5  ;;  %v2818_v43 = vsel %vm605_vm3, %v2816_v1, %v2817_v62  ;;  %v2941_v17 = vrot.slane %v2893_v25, 2  ;;  %v2748_v23 = vmul.f32 %v7548_v36, %v2719_v52  ;;  %v2895_v26 = vmul.f32 %v7539_v49, %v2720_v20  ;;  %v7627_v52 = vld [vmem:[%s8939_s4 + $0xa] ss:$0 sm:$0xff] }
 0x176   : > { %v2872_v44 = vadd.f32 %v2818_v43, %v2747_v45  ;;  %v2942_v51 = vrot.slane %v2894_v14, 2  ;;  %5652 = vmatprep.mubr.msk.bf16.mxu0 %vm325_vm0, %v3670_v60  ;;  %v3671_v30 = vpack.c.bf16 %v3657_v10, %v3656_v35  ;;  %v2819_v48 = vrot.slane %v2770_v11, 1  ;;  %v7595_v15 = vld [vmem:[#allocation3 + $0x30] sm:$0xff] }
 0x177   : > { %v2944_v63 = vrot.slane %v2895_v26, 2  ;;  %v3356_v33 = vmul.f32 %v7600_v28, %v7595_v15  ;;  %v3518_v11 = vmul.f32 %v7627_v52, %v7595_v15 }
 0x178   : > { %v7541_v0 = vld [vmem:[#allocation3 + $0x18] sm:$0xff]  ;;  %v2943_v4 = vsel %vm731_vm4, %v2941_v17, %v2942_v51  ;;  %5653 = vmatmul.mubr.msk.bf16.vlgmr.msra.gmra.mxu0 %vm325_vm0, %v3671_v30  ;;  %v2820_v50 = vsel %vm605_vm3, %v2817_v62, %v2819_v48 }
 0x179   : > { %v7532_v47 = vld [vmem:[#allocation3 + $0x28] sm:$0x3]  ;;  %v7543_v41 = vld [vmem:[#allocation3 + $0x20] sm:$0xff]  ;;  %v3043_v37 = vmul.f32 %v7564_v24, %v7541_v0  ;;  %v3080_v53 = vmul.f32 %v7578_v22, %v7541_v0  ;;  %v2997_v16 = vadd.f32 %v2943_v4, %v2872_v44  ;;  %v3205_v27 = vmul.f32 %v7588_v38, %v7541_v0 }
 0x17a   : > { %v7554_v19 = vmul.f32 %v7530_v2, %v7532_v47  ;;  %v3015_v31 = vld [vmem:[#allocation3 + $0x28] sm:$0x3]  ;;  %v3044_v13 = vmul.f32 %v7564_v24, %v7543_v41  ;;  %v3081_v46 = vmul.f32 %v7578_v22, %v7543_v41  ;;  %v2873_v56 = vadd.f32 %v2820_v50, %v2748_v23 }
 0x17b   : > { %v3082_v9 = vmul.f32 %v7578_v22, %v3015_v31  ;;  %v2945_v7 = vsel %vm731_vm4, %v2942_v51, %v2944_v63  ;;  %v3128_v5 = vrot.slane %v3080_v53, 1  ;;  %v3566_v51 = vrot.slane %v3518_v11, 2 }
 0x17c   : > { %v3129_v57 = vrot.slane %v3081_v46, 1  ;;  %v2750_v53 = vmul.f32 %v7548_v36, %v7543_v41 }
 0x17e   : > { %v5622_v54 = vpop.f32.mrf.mxu0 }
 0x17f   : > { %v1559_v6 = vadd.f32 %v5622_v54, %v7410_v32  ;;  %v5797_v54 = vld [vmem:[%s8941_s6 + $0x8] sm:$0xff]  }
 0x180   : > { %v1550_v55 = vpop.f32.mrf.mxu0  ;;  %5692 = vmatprep.subr.bf16.mxu0 %v5797_v54 }
 0x181   : > { %v1591_v42 = vmax.f32 %v1559_v6, 0.0  ;;  %v1551_v40 = vadd.f32 %v7410_v32, %v1550_v55  ;;  %v7609_v6 = vld [vmem:[%s8940_s5 + $0x18] sm:$0xff]   ;;  %v3059_v55 = vadd.f32 %v3043_v37, %v2997_v16  ;;  %5693 = vmatpush3.bf16.msra.mxu0 %v5797_v54  ;;  %v2749_v37 = vmul.f32 %v7548_v36, %v7541_v0 }
 0x182   : > { %v5623_v8 = vpop.f32.mrf.mxu0  ;;  %5712 = vmatprep.subr.bf16.mxu1 %v7609_v6  ;;  %v2771_v16 = vmul.f32 %v7530_v2, %v7541_v0 }
 0x183   : > { %1607 = vst.msk [vmem:[#allocation3 + $0x91] sm:$0xff] %vm368_vm5, %v1591_v42  ;;  %v1589_v39 = vmax.f32 %v1551_v40, 0.0  ;;  %v1562_v59 = vadd.f32 %v5623_v8, %v7410_v32  ;;  %v3131_v42 = vrot.slane %v3082_v9, 1  ;;  %v3206_v40 = vmul.f32 %v7588_v38, %v7543_v41 }
 0x184   : > { %v1553_v3 = vpop.f32.mrf.mxu0  ;;  %v3207_v8 = vmul.f32 %v7588_v38, %v3015_v31  ;;  %v2772_v9 = vmul.f32 %v7530_v2, %v7543_v41 }
 0x185   : > { %1605 = vst.msk [vmem:[#allocation3 + $0x79] sm:$0xff] %vm368_vm5, %v1589_v39  ;;  %v1592_v61 = vmax.f32 %v1562_v59, 0.0  ;;  %v1554_v12 = vadd.f32 %v7410_v32, %v1553_v3  ;;  %v7614_v39 = vld [vmem:[#allocation3 + $0x38] sm:$0xff]  ;;  %v2998_v3 = vadd.f32 %v2945_v7, %v2873_v56  ;;  %v3132_v21 = vsel %vm605_vm3, %v3129_v57, %v3131_v42 }
 0x186   : > { %v7619_v59 = vld [vmem:[%s8939_s4 + $0x9] ss:$0 sm:$0xff]  ;;  %v3254_v1 = vrot.slane %v3206_v40, 2  ;;  %v3256_v62 = vrot.slane %v3207_v8, 2  ;;  %v3357_v14 = vmul.f32 %v7600_v28, %v7614_v39  ;;  %v3519_v44 = vmul.f32 %v7627_v52, %v7614_v39 }
 0x187   : > { %1608 = vst.msk [vmem:[#allocation3 + $0x99] sm:$0xff] %vm368_vm5, %v1592_v61  ;;  %v1590_v34 = vmax.f32 %v1554_v12, 0.0  ;;  %v3130_v61 = vsel %vm605_vm3, %v3128_v5, %v3129_v57  ;;  %v3253_v12 = vrot.slane %v3205_v27, 2  ;;  %v3060_v25 = vadd.f32 %v3044_v13, %v2998_v3 }
 0x188   : > { %v3184_v29 = vadd.f32 %v3130_v61, %v3059_v55  ;;  %v3393_v18 = vmul.f32 %v7619_v59, %v7595_v15  ;;  %v3394_v58 = vmul.f32 %v7619_v59, %v7614_v39  ;;  %v3257_v45 = vsel %vm731_vm4, %v3254_v1, %v3256_v62 }
 0x189   : > { %1606 = vst.msk [vmem:[#allocation3 + $0x81] sm:$0xff] %vm368_vm5, %v1590_v34  ;;  %v3328_v34 = vld [vmem:[#allocation3 + $0x40] sm:$0x3]  ;;  %v3255_v20 = vsel %vm731_vm4, %v3253_v12, %v3254_v1  ;;  %v3185_v43 = vadd.f32 %v3132_v21, %v3060_v25  ;;  %v3567_v4 = vrot.slane %v3519_v44, 2  ;;  %v2824_v7 = vrot.slane %v7554_v19, 1 }
 0x18a   : > { %v3395_v60 = vmul.f32 %v7619_v59, %v3328_v34  ;;  %v3309_v17 = vadd.f32 %v3255_v20, %v3184_v29  ;;  %v3441_v35 = vrot.slane %v3393_v18, 1  ;;  %v3442_v10 = vrot.slane %v3394_v58, 1 }
 0x18b   : > { %v3520_v26 = vmul.f32 %v7627_v52, %v3328_v34  ;;  %v3310_v31 = vadd.f32 %v3257_v45, %v3185_v43  ;;  %v3568_v27 = vsel %vm731_vm4, %v3566_v51, %v3567_v4  ;;  %v2896_v5 = vmul.f32 %v7539_v49, %v7541_v0 }
 0x18c   : > { %v3444_v23 = vrot.slane %v3395_v60, 1  ;;  %v3372_v30 = vadd.f32 %v3356_v33, %v3309_v17  ;;  %v3443_v48 = vsel %vm605_vm3, %v3441_v35, %v3442_v10  ;;  %v2821_v55 = vrot.slane %v2771_v16, 1  ;;  %v3018_v33 = vld [vmem:[#allocation3 + $0x40] sm:$0x3] }
 0x18d   : > { %v3569_v63 = vrot.slane %v3520_v26, 2  ;;  %v3373_v46 = vadd.f32 %v3357_v14, %v3310_v31  ;;  %v2822_v42 = vrot.slane %v2772_v9, 1  ;;  %v2897_v40 = vmul.f32 %v7539_v49, %v7543_v41 }
 0x18e   : > { %v3445_v13 = vsel %vm605_vm3, %v3442_v10, %v3444_v23  ;;  %v3497_v50 = vadd.f32 %v3443_v48, %v3372_v30  ;;  %v2898_v8 = vmul.f32 %v7539_v49, %v7532_v47  ;;  %v2946_v3 = vrot.slane %v2896_v5, 2 }
 0x18f   : > { %v3570_v56 = vsel %vm731_vm4, %v3567_v4, %v3569_v63  ;;  %v3498_v57 = vadd.f32 %v3445_v13, %v3373_v46  ;;  %v3045_v61 = vmul.f32 %v7564_v24, %v7595_v15  ;;  %v2823_v19 = vsel %vm605_vm3, %v2821_v55, %v2822_v42  ;;  %v7687_v63 = vld [vmem:[#allocation3 + $0x48] sm:$0xff] }
 0x190   : > { %v3622_v54 = vadd.f32 %v3568_v27, %v3497_v50  ;;  %v2825_v0 = vsel %vm605_vm3, %v2822_v42, %v2824_v7  ;;  %v3046_v21 = vmul.f32 %v7564_v24, %v7614_v39  ;;  %v2874_v41 = vadd.f32 %v2823_v19, %v2749_v37 }
 0x191   : > { %v3623_v34 = vadd.f32 %v3570_v56, %v3498_v57  ;;  %v2875_v1 = vadd.f32 %v2825_v0, %v2750_v53  ;;  %v2947_v62 = vrot.slane %v2897_v40, 2  ;;  %v2949_v14 = vrot.slane %v2898_v8, 2  ;;  %v7689_v53 = vld [vmem:[#allocation3 + $0x50] sm:$0xff]  ;;  %v3331_v57 = vld [vmem:[#allocation3 + $0x58] sm:$0x3] }
 0x192   : > { %v3083_v18 = vmul.f32 %v7578_v22, %v7595_v15  ;;  %v3084_v58 = vmul.f32 %v7578_v22, %v7614_v39  ;;  %v3085_v11 = vmul.f32 %v7578_v22, %v3018_v33  ;;  %v3208_v13 = vmul.f32 %v7588_v38, %v7595_v15 }
 0x193   : > { %v3638_v25 = vpack.c.bf16 %v3623_v34, %v3622_v54  ;;  %v2948_v60 = vsel %vm731_vm4, %v2946_v3, %v2947_v62  ;;  %v2950_v17 = vsel %vm731_vm4, %v2947_v62, %v2949_v14  ;;  %v3209_v4 = vmul.f32 %v7588_v38, %v7614_v39  ;;  %v3661_v14 = vld [vmem:[%s6090_s23 + $0x38] sm:$0xff] }
 0x194   : > { %v2999_v35 = vadd.f32 %v2948_v60, %v2874_v41  ;;  %v3133_v10 = vrot.slane %v3083_v18, 1  ;;  %v3134_v23 = vrot.slane %v3084_v58, 1  ;;  %v3000_v51 = vadd.f32 %v2950_v17, %v2875_v1 }
 0x195   : > { %5676 = vmatprep.mubr.msk.bf16.mxu1 %vm368_vm5, %v3638_v25  ;;  %v3136_v31 = vrot.slane %v3085_v11, 1  ;;  %v3210_v56 = vmul.f32 %v7588_v38, %v3018_v33  ;;  %v3258_v7 = vrot.slane %v3208_v13, 2  ;;  %v3259_v5 = vrot.slane %v3209_v4, 2  ;;  %v3660_v25 = vld [vmem:[%s6090_s23 + $0x30] sm:$0xff] }
 0x196   : > { %v3061_v48 = vadd.f32 %v3045_v61, %v2999_v35  ;;  %v3135_v37 = vsel %vm605_vm3, %v3133_v10, %v3134_v23  ;;  %v3062_v16 = vadd.f32 %v3046_v21, %v3000_v51  ;;  %v3358_v42 = vmul.f32 %v7600_v28, %v7687_v63  ;;  %v3658_v21 = vld [vmem:[%s6090_s23 + $0x20] sm:$0xff] }
 0x197   : > { %v3137_v9 = vsel %vm605_vm3, %v3134_v23, %v3136_v31  ;;  %v3359_v40 = vmul.f32 %v7600_v28, %v7689_v53  ;;  %v3260_v8 = vsel %vm731_vm4, %v3258_v7, %v3259_v5  ;;  %v3261_v3 = vrot.slane %v3210_v56, 2 }
 0x198   : > { %v3186_v27 = vadd.f32 %v3135_v37, %v3061_v48  ;;  %v3187_v55 = vadd.f32 %v3137_v9, %v3062_v16  ;;  %v3396_v61 = vmul.f32 %v7619_v59, %v7687_v63  ;;  %v3398_v19 = vmul.f32 %v7619_v59, %v3331_v57 }
 0x199   : > { %v3521_v0 = vmul.f32 %v7627_v52, %v7687_v63  ;;  %v3522_v33 = vmul.f32 %v7627_v52, %v7689_v53  ;;  %v3262_v41 = vsel %vm731_vm4, %v3259_v5, %v3261_v3  ;;  %v2752_v48 = vmul.f32 %v7548_v36, %v7614_v39  ;;  %v3021_v3 = vld [vmem:[#allocation3 + $0x58] sm:$0x3] }
 0x19a   : > { %v3311_v34 = vadd.f32 %v3260_v8, %v3186_v27  ;;  %v3446_v1 = vrot.slane %v3396_v61, 1  ;;  %v3312_v18 = vadd.f32 %v3262_v41, %v3187_v55  ;;  %v2774_v4 = vmul.f32 %v7530_v2, %v7595_v15 }
 0x19b   : > { %v3572_v11 = vrot.slane %v3522_v33, 2  ;;  %v2899_v9 = vmul.f32 %v7539_v49, %v7595_v15  ;;  %v2900_v27 = vmul.f32 %v7539_v49, %v7614_v39 }
 0x19c   : > { %v3374_v58 = vadd.f32 %v3358_v42, %v3311_v34  ;;  %v3375_v35 = vadd.f32 %v3359_v40, %v3312_v18  ;;  %v3212_v18 = vmul.f32 %v7588_v38, %v7689_v53 }
 0x19d   : > { %v2951_v42 = vrot.slane %v2899_v9, 2  ;;  %v2952_v40 = vrot.slane %v2900_v27, 2 }
 0x1a9   : > { %v5634_v12 = vpop.f32.mrf.mxu1 }
 0x1aa   : > { %v2631_v29 = vadd.f32 %v5634_v12, %v7410_v32  ;;  %v3397_v12 = vmul.f32 %v7619_v59, %v7689_v53 }
 0x1ab   : > { %v2622_v47 = vpop.f32.mrf.mxu1 }
 0x1ac   : > { %v2687_v20 = vmax.f32 %v2631_v29, 0.0  ;;  %v2623_v45 = vadd.f32 %v7410_v32, %v2622_v47  ;;  %v3659_v29 = vld [vmem:[%s6090_s23 + $0x28] sm:$0xff]  ;;  %v3447_v62 = vrot.slane %v3397_v12, 1  ;;  %v3523_v47 = vmul.f32 %v7627_v52, %v3331_v57 }
 0x1ad   : > { %v5635_v43 = vpop.f32.mrf.mxu1  ;;  %v3672_v17 = vpack.c.bf16 %v3659_v29, %v3658_v21  ;;  %v2826_v57 = vrot.slane %v2774_v4, 1  ;;  %v5799_v21 = vld [vmem:[%s8940_s5 + $0x10] sm:$0xff]   ;;  %v5800_v29 = vld [vmem:[%s8941_s6] sm:$0xff]  }
 0x1ae   : > { %2704 = vst.msk [vmem:[#allocation3 + $0xf1] sm:$0xff] %vm368_vm5, %v2687_v20  ;;  %v2685_v44 = vmax.f32 %v2623_v45, 0.0  ;;  %v2634_v26 = vadd.f32 %v5635_v43, %v7410_v32  ;;  %v3449_v20 = vrot.slane %v3398_v19, 1  ;;  %v3571_v45 = vrot.slane %v3521_v0, 2  ;;  %5694 = vmatprep.subr.bf16.mxu0 %v5800_v29 }
 0x1af   : > { %v2625_v30 = vpop.f32.mrf.mxu1  ;;  %v3448_v60 = vsel %vm605_vm3, %v3446_v1, %v3447_v62  ;;  %v3574_v43 = vrot.slane %v3523_v47, 2  ;;  %5656 = vmatprep.mubr.msk.bf16.mxu0 %vm325_vm0, %v3672_v17  ;;  %v2953_v0 = vsel %vm731_vm4, %v2951_v42, %v2952_v40  ;;  %v3086_v1 = vmul.f32 %v7578_v22, %v7687_v63  ;;  %v7768_v17 = vld [vmem:[#allocation3 + $0x68] sm:$0xff]  ;;  %5695 = vmatpush3.bf16.msra.mxu0 %v5800_v29 }
 0x1b0   : > { %2702 = vst.msk [vmem:[#allocation3 + $0xd9] sm:$0xff] %vm368_vm5, %v2685_v44  ;;  %v2688_v46 = vmax.f32 %v2634_v26, 0.0  ;;  %v2626_v50 = vadd.f32 %v7410_v32, %v2625_v30  ;;  %v3450_v10 = vsel %vm605_vm3, %v3447_v62, %v3449_v20  ;;  %v3499_v23 = vadd.f32 %v3448_v60, %v3374_v58  ;;  %v2726_v26 = vld [vmem:[#allocation3 + $0x40] sm:$0x3] }
 0x1b1   : > { %v3673_v44 = vpack.c.bf16 %v3661_v14, %v3660_v25  ;;  %v3573_v51 = vsel %vm731_vm4, %v3571_v45, %v3572_v11  ;;  %v3575_v31 = vsel %vm731_vm4, %v3572_v11, %v3574_v43  ;;  %v2751_v30 = vmul.f32 %v7548_v36, %v7595_v15  ;;  %v7766_v20 = vld [vmem:[#allocation3 + $0x60] sm:$0xff] }
 0x1b2   : > { %2705 = vst.msk [vmem:[#allocation3 + $0xf9] sm:$0xff] %vm368_vm5, %v2688_v46  ;;  %v2686_v54 = vmax.f32 %v2626_v50, 0.0  ;;  %v3500_v37 = vadd.f32 %v3450_v10, %v3375_v35  ;;  %v3624_v13 = vadd.f32 %v3573_v51, %v3499_v23  ;;  %v2775_v46 = vmul.f32 %v7530_v2, %v7614_v39 }
 0x1b3   : > { %5657 = vmatmul.mubr.msk.bf16.gmra.mxu0 %vm325_vm0, %v3673_v44  ;;  %v2776_v16 = vmul.f32 %v7530_v2, %v2726_v26  ;;  %v2901_v56 = vmul.f32 %v7539_v49, %v2726_v26  ;;  %v3047_v15 = vmul.f32 %v7564_v24, %v7687_v63  ;;  %v3048_v39 = vmul.f32 %v7564_v24, %v7689_v53  ;;  %v3334_v26 = vld [vmem:[#allocation3 + $0x70] sm:$0x3] }
 0x1b4   : > { %2703 = vst.msk [vmem:[#allocation3 + $0xe1] sm:$0xff] %vm368_vm5, %v2686_v54  ;;  %v3625_v5 = vadd.f32 %v3575_v31, %v3500_v37  ;;  %v2827_v54 = vrot.slane %v2775_v46, 1  ;;  %v3087_v62 = vmul.f32 %v7578_v22, %v7689_v53  ;;  %v3088_v47 = vmul.f32 %v7578_v22, %v3021_v3 }
 0x1b5   : > { %v2829_v55 = vrot.slane %v2776_v16, 1  ;;  %v2954_v8 = vrot.slane %v2901_v56, 2  ;;  %v3211_v14 = vmul.f32 %v7588_v38, %v7687_v63  ;;  %v3213_v58 = vmul.f32 %v7588_v38, %v3021_v3  ;;  %v5802_v56 = vld [vmem:[%s8940_s5] sm:$0xff]  }
 0x1b6   : > { %v3639_v61 = vpack.c.bf16 %v3625_v5, %v3624_v13  ;;  %v2828_v12 = vsel %vm605_vm3, %v2826_v57, %v2827_v54  ;;  %v3138_v60 = vrot.slane %v3086_v1, 1  ;;  %v3139_v11 = vrot.slane %v3087_v62, 1 }
 0x1b7   : > { %v2830_v34 = vsel %vm605_vm3, %v2827_v54, %v2829_v55  ;;  %v2876_v19 = vadd.f32 %v2828_v12, %v2751_v30  ;;  %v2955_v33 = vsel %vm731_vm4, %v2952_v40, %v2954_v8  ;;  %v3141_v43 = vrot.slane %v3088_v47, 1 }
 0x1b8   : > { %5677 = vmatmul.mubr.msk.bf16.vlgmr.msra.gmra.mxu1 %vm368_vm5, %v3639_v61  ;;  %v2877_v41 = vadd.f32 %v2830_v34, %v2752_v48  ;;  %v3263_v10 = vrot.slane %v3211_v14, 2  ;;  %v3264_v23 = vrot.slane %v3212_v18, 2  ;;  %v3266_v44 = vrot.slane %v3213_v58, 2 }
 0x1b9   : > { %5713 = vmatpush3.bf16.msra.mxu1 %v7609_v6  ;;  %v3001_v25 = vadd.f32 %v2953_v0, %v2876_v19  ;;  %v5801_v6 = vld [vmem:[%s8940_s5 + $0x8] sm:$0xff]   ;;  %v3140_v31 = vsel %vm605_vm3, %v3138_v60, %v3139_v11  ;;  %v3142_v30 = vsel %vm605_vm3, %v3139_v11, %v3141_v43  ;;  %v3360_v48 = vmul.f32 %v7600_v28, %v7766_v20 }
 0x1ba   : > { %v3002_v45 = vadd.f32 %v2955_v33, %v2877_v41  ;;  %5714 = vmatprep.subr.bf16.mxu1 %v5799_v21  ;;  %v3265_v13 = vsel %vm731_vm4, %v3263_v10, %v3264_v23  ;;  %v3267_v4 = vsel %vm731_vm4, %v3264_v23, %v3266_v44  ;;  %v3361_v46 = vmul.f32 %v7600_v28, %v7768_v17 }
 0x1bb   : > { %v4005_v50 = vld [vmem:[#allocation3 + $0xe8] sm:$0x3]  ;;  %v3063_v35 = vadd.f32 %v3047_v15, %v3001_v25  ;;  %v3399_v16 = vmul.f32 %v7619_v59, %v7766_v20  ;;  %v3400_v9 = vmul.f32 %v7619_v59, %v7768_v17  ;;  %v3401_v27 = vmul.f32 %v7619_v59, %v3334_v26 }
 0x1bc   : > { %v7738_v7 = vmul.f32 %v7530_v2, %v4005_v50  ;;  %v3064_v51 = vadd.f32 %v3048_v39, %v3002_v45  ;;  %v3524_v54 = vmul.f32 %v7627_v52, %v7766_v20  ;;  %v3525_v55 = vmul.f32 %v7627_v52, %v7768_v17  ;;  %v2729_v45 = vld [vmem:[#allocation3 + $0x58] sm:$0x3] }
 0x1bd   : > { %v3188_v37 = vadd.f32 %v3140_v31, %v3063_v35  ;;  %5715 = vmatpush3.bf16.msra.mxu1 %v5799_v21  ;;  %v3526_v42 = vmul.f32 %v7627_v52, %v3334_v26  ;;  %v3451_v3 = vrot.slane %v3399_v16, 1  ;;  %v3452_v61 = vrot.slane %v3400_v9, 1 }
 0x1be   : > { %v3189_v50 = vadd.f32 %v3142_v30, %v3064_v51  ;;  %5716 = vmatprep.subr.bf16.mxu1 %v5801_v6  ;;  %v3454_v39 = vrot.slane %v3401_v27, 1  ;;  %v3576_v34 = vrot.slane %v3524_v54, 2  ;;  %v3577_v19 = vrot.slane %v3525_v55, 2  ;;  %v3024_v27 = vld [vmem:[#allocation3 + $0x70] sm:$0x3] }
 0x1bf   : > { %v3313_v57 = vadd.f32 %v3265_v13, %v3188_v37  ;;  %v3453_v29 = vsel %vm605_vm3, %v3451_v3, %v3452_v61  ;;  %v3579_v25 = vrot.slane %v3526_v42, 2  ;;  %v2753_v60 = vmul.f32 %v7548_v36, %v7687_v63 }
 0x1c0   : > { %v3314_v8 = vadd.f32 %v3267_v4, %v3189_v50  ;;  %v3455_v1 = vsel %vm605_vm3, %v3452_v61, %v3454_v39  ;;  %v3578_v47 = vsel %vm731_vm4, %v3576_v34, %v3577_v19  ;;  %v2754_v35 = vmul.f32 %v7548_v36, %v7689_v53 }
 0x1c1   : > { %v3376_v15 = vadd.f32 %v3360_v48, %v3313_v57  ;;  %5717 = vmatpush3.bf16.msra.mxu1 %v5801_v6  ;;  %v3580_v43 = vsel %vm731_vm4, %v3577_v19, %v3579_v25  ;;  %v2777_v10 = vmul.f32 %v7530_v2, %v7687_v63  ;;  %v2778_v51 = vmul.f32 %v7530_v2, %v7689_v53 }
 0x1c2   : > { %v3377_v21 = vadd.f32 %v3361_v46, %v3314_v8  ;;  %5718 = vmatprep.subr.bf16.mxu1 %v5802_v56  ;;  %v2779_v31 = vmul.f32 %v7530_v2, %v2729_v45  ;;  %v2902_v48 = vmul.f32 %v7539_v49, %v7687_v63  ;;  %v2903_v37 = vmul.f32 %v7539_v49, %v7689_v53  ;;  %v7832_v8 = vld [vmem:[#allocation3 + $0x78] sm:$0xff] }
 0x1c3   : > { %v3501_v62 = vadd.f32 %v3453_v29, %v3376_v15  ;;  %v2831_v30 = vrot.slane %v2777_v10, 1  ;;  %v2832_v46 = vrot.slane %v2778_v51, 1  ;;  %v3089_v57 = vmul.f32 %v7578_v22, %v7766_v20 }
 0x1c4   : > { %v3502_v58 = vadd.f32 %v3455_v1, %v3377_v21  ;;  %v2834_v50 = vrot.slane %v2779_v31, 1  ;;  %v2956_v16 = vrot.slane %v2902_v48, 2  ;;  %v2957_v9 = vrot.slane %v2903_v37, 2  ;;  %v3662_v31 = vld [vmem:[%s6090_s23 + $0x40] sm:$0xff] }
 0x1c5   : > { %v3626_v6 = vadd.f32 %v3578_v47, %v3501_v62  ;;  %5719 = vmatpush3.bf16.msra.mxu1 %v5802_v56  ;;  %v3049_v56 = vmul.f32 %v7564_v24, %v7766_v20  ;;  %v2833_v63 = vsel %vm605_vm3, %v2831_v30, %v2832_v46  ;;  %v3143_v15 = vrot.slane %v3089_v57, 1  ;;  %v3663_v30 = vld [vmem:[%s6090_s23 + $0x48] sm:$0xff] }
 0x1c6   : > { %v3627_v26 = vadd.f32 %v3580_v43, %v3502_v58  ;;  %v2835_v54 = vsel %vm605_vm3, %v2832_v46, %v2834_v50  ;;  %v2878_v55 = vadd.f32 %v2833_v63, %v2753_v60  ;;  %v2958_v42 = vsel %vm731_vm4, %v2956_v16, %v2957_v9  ;;  %v3664_v46 = vld [vmem:[%s6090_s23 + $0x50] sm:$0xff] }
 0x1c7   : > { %v5626_v5 = vpop.f32.mrf.mxu0  ;;  %v2879_v3 = vadd.f32 %v2835_v54, %v2754_v35  ;;  %v3214_v19 = vmul.f32 %v7588_v38, %v7766_v20  ;;  %v3362_v1 = vmul.f32 %v7600_v28, %v7832_v8  ;;  %v3402_v35 = vmul.f32 %v7619_v59, %v7832_v8 }
 0x1c8   : > { %v1575_v40 = vadd.f32 %v5626_v5, %v7410_v32  ;;  %v3640_v4 = vpack.c.bf16 %v3627_v26, %v3626_v6  ;;  %v3050_v5 = vmul.f32 %v7564_v24, %v7768_v17  ;;  %v3003_v39 = vadd.f32 %v2958_v42, %v2878_v55 }
 0x1c9   : > { %v1566_v12 = vpop.f32.mrf.mxu0  ;;  %v3268_v25 = vrot.slane %v3214_v19, 2  ;;  %v3527_v51 = vmul.f32 %v7627_v52, %v7832_v8  ;;  %v3456_v37 = vrot.slane %v3402_v35, 1  ;;  %v2780_v19 = vmul.f32 %v7530_v2, %v7766_v20 }
 0x1ca   : > { %v1595_v0 = vmax.f32 %v1575_v40, 0.0  ;;  %v1567_v33 = vadd.f32 %v7410_v32, %v1566_v12  ;;  %5680 = vmatprep.mubr.msk.bf16.mxu1 %vm368_vm5, %v3640_v4  ;;  %v3090_v40 = vmul.f32 %v7578_v22, %v7768_v17  ;;  %v3091_v12 = vmul.f32 %v7578_v22, %v3024_v27 }
 0x1cb   : > { %v5627_v41 = vpop.f32.mrf.mxu0  ;;  %v3065_v62 = vadd.f32 %v3049_v56, %v3003_v39 }
 0x1cc   : > { %1611 = vst.msk [vmem:[#allocation3 + $0xc1] sm:$0xff] %vm368_vm5, %v1595_v0  ;;  %v1593_v14 = vmax.f32 %v1567_v33, 0.0  ;;  %v1578_v18 = vadd.f32 %v5627_v41, %v7410_v32  ;;  %v3144_v34 = vrot.slane %v3090_v40, 1  ;;  %v3215_v0 = vmul.f32 %v7588_v38, %v7768_v17  ;;  %v7840_v33 = vld [vmem:[#allocation3 + $0x80] sm:$0xff]  ;;  %v2732_v40 = vld [vmem:[#allocation3 + $0x70] sm:$0x3] }
 0x1cd   : > { %v1569_v11 = vpop.f32.mrf.mxu0  ;;  %v3146_v29 = vrot.slane %v3091_v12, 1  ;;  %v3216_v41 = vmul.f32 %v7588_v38, %v3024_v27  ;;  %v3403_v10 = vmul.f32 %v7619_v59, %v7840_v33  ;;  %v3528_v4 = vmul.f32 %v7627_v52, %v7840_v33 }
 0x1ce   : > { %1609 = vst.msk [vmem:[#allocation3 + $0xa9] sm:$0xff] %vm368_vm5, %v1593_v14  ;;  %v1596_v23 = vmax.f32 %v1578_v18, 0.0  ;;  %v1570_v44 = vadd.f32 %v7410_v32, %v1569_v11  ;;  %v2904_v32 = vmul.f32 %v7539_v49, %v2729_v45  ;;  %v3145_v47 = vsel %vm605_vm3, %v3143_v15, %v3144_v34  ;;  %v3337_v18 = vld [vmem:[#allocation3 + $0x88] sm:$0x3] }
 0x1cf   : > { %v3269_v14 = vrot.slane %v3215_v0, 2  ;;  %v3147_v45 = vsel %vm605_vm3, %v3144_v34, %v3146_v29  ;;  %v3271_v60 = vrot.slane %v3216_v41, 2  ;;  %v3363_v11 = vmul.f32 %v7600_v28, %v7840_v33 }
 0x1d0   : > { %1612 = vst.msk [vmem:[#allocation3 + $0xc9] sm:$0xff] %vm368_vm5, %v1596_v23  ;;  %v1594_v13 = vmax.f32 %v1570_v44, 0.0  ;;  %v2959_v53 = vrot.slane %v2904_v32, 2  ;;  %v3190_v43 = vadd.f32 %v3145_v47, %v3065_v62  ;;  %v3404_v26 = vmul.f32 %v7619_v59, %v3337_v18  ;;  %v3665_v32 = vld [vmem:[%s6090_s23 + $0x58] sm:$0xff] }
 0x1d1   : > { %v3270_v6 = vsel %vm731_vm4, %v3268_v25, %v3269_v14  ;;  %v3272_v44 = vsel %vm731_vm4, %v3269_v14, %v3271_v60  ;;  %v3581_v27 = vrot.slane %v3527_v51, 2  ;;  %v3675_v42 = vpack.c.bf16 %v3665_v32, %v3664_v46  ;;  %v3027_v60 = vld [vmem:[#allocation3 + $0x88] sm:$0x3] }
 0x1d2   : > { %1610 = vst.msk [vmem:[#allocation3 + $0xb1] sm:$0xff] %vm368_vm5, %v1594_v13  ;;  %v2960_v61 = vsel %vm731_vm4, %v2957_v9, %v2959_v53  ;;  %v3315_v48 = vadd.f32 %v3270_v6, %v3190_v43  ;;  %v3457_v13 = vrot.slane %v3403_v10, 1  ;;  %v3459_v16 = vrot.slane %v3404_v26, 1 }
 0x1d3   : > { %v3004_v21 = vadd.f32 %v2960_v61, %v2879_v3  ;;  %v3529_v9 = vmul.f32 %v7627_v52, %v3337_v18  ;;  %v3582_v53 = vrot.slane %v3528_v4, 2  ;;  %v2755_v12 = vmul.f32 %v7548_v36, %v7766_v20 }
 0x1d4   : > { %v3378_v56 = vadd.f32 %v3362_v1, %v3315_v48  ;;  %v3458_v63 = vsel %vm605_vm3, %v3456_v37, %v3457_v13  ;;  %v3460_v54 = vsel %vm605_vm3, %v3457_v13, %v3459_v16  ;;  %v2756_v15 = vmul.f32 %v7548_v36, %v7768_v17  ;;  %v7899_v48 = vld [vmem:[#allocation3 + $0x90] sm:$0xff] }
 0x1d5   : > { %v3066_v58 = vadd.f32 %v3050_v5, %v3004_v21  ;;  %v3674_v5 = vpack.c.bf16 %v3663_v30, %v3662_v31  ;;  %v3584_v55 = vrot.slane %v3529_v9, 2  ;;  %v3583_v61 = vsel %vm731_vm4, %v3581_v27, %v3582_v53  ;;  %v7906_v27 = vld [vmem:[#allocation3 + $0x98] sm:$0xff] }
 0x1d6   : > { %v3503_v3 = vadd.f32 %v3458_v63, %v3378_v56  ;;  %v2781_v0 = vmul.f32 %v7530_v2, %v7768_v17  ;;  %v2782_v29 = vmul.f32 %v7530_v2, %v2732_v40  ;;  %v2905_v41 = vmul.f32 %v7539_v49, %v7766_v20 }
 0x1d7   : > { %v3191_v23 = vadd.f32 %v3147_v45, %v3066_v58  ;;  %5660 = vmatprep.mubr.msk.bf16.mxu0 %vm325_vm0, %v3674_v5  ;;  %v3585_v34 = vsel %vm731_vm4, %v3582_v53, %v3584_v55  ;;  %v2906_v1 = vmul.f32 %v7539_v49, %v7768_v17  ;;  %v2836_v47 = vrot.slane %v2780_v19, 1 }
 0x1d8   : > { %5661 = vmatmul.mubr.msk.bf16.gmra.mxu0 %vm325_vm0, %v3675_v42  ;;  %v3628_v21 = vadd.f32 %v3583_v61, %v3503_v3  ;;  %v2837_v25 = vrot.slane %v2781_v0, 1  ;;  %v2907_v14 = vmul.f32 %v7539_v49, %v2732_v40  ;;  %v2839_v18 = vrot.slane %v2782_v29, 1  ;;  %v3340_v40 = vld [vmem:[#allocation3 + $0xa0] sm:$0x3] }
 0x1d9   : > { %v3316_v50 = vadd.f32 %v3272_v44, %v3191_v23  ;;  %v2961_v58 = vrot.slane %v2905_v41, 2  ;;  %v2962_v45 = vrot.slane %v2906_v1, 2  ;;  %v3052_v20 = vmul.f32 %v7564_v24, %v7840_v33 }
 0x1da   : > { %v2838_v6 = vsel %vm605_vm3, %v2836_v47, %v2837_v25  ;;  %v2964_v35 = vrot.slane %v2907_v14, 2  ;;  %v2840_v17 = vsel %vm605_vm3, %v2837_v25, %v2839_v18  ;;  %v3092_v44 = vmul.f32 %v7578_v22, %v7832_v8 }
 0x1db   : > { %v3379_v57 = vadd.f32 %v3363_v11, %v3316_v50  ;;  %v3051_v11 = vmul.f32 %v7564_v24, %v7832_v8  ;;  %v2880_v10 = vadd.f32 %v2838_v6, %v2755_v12  ;;  %v2963_v23 = vsel %vm731_vm4, %v2961_v58, %v2962_v45 }
 0x1dc   : > { %v2881_v26 = vadd.f32 %v2840_v17, %v2756_v15  ;;  %v2965_v51 = vsel %vm731_vm4, %v2962_v45, %v2964_v35  ;;  %v3093_v31 = vmul.f32 %v7578_v22, %v7840_v33  ;;  %v3094_v30 = vmul.f32 %v7578_v22, %v3027_v60 }
 0x1dd   : > { %v3504_v39 = vadd.f32 %v3460_v54, %v3379_v57  ;;  %v3005_v37 = vadd.f32 %v2963_v23, %v2880_v10  ;;  %v3148_v13 = vrot.slane %v3092_v44, 1  ;;  %v3217_v4 = vmul.f32 %v7588_v38, %v7832_v8 }
 0x1de   : > { %v3218_v46 = vmul.f32 %v7588_v38, %v7840_v33  ;;  %v3006_v32 = vadd.f32 %v2965_v51, %v2881_v26  ;;  %v3149_v50 = vrot.slane %v3093_v31, 1  ;;  %v3151_v16 = vrot.slane %v3094_v30, 1 }
 0x1df   : > { %v3629_v62 = vadd.f32 %v3585_v34, %v3504_v39  ;;  %v3219_v9 = vmul.f32 %v7588_v38, %v3027_v60  ;;  %v3067_v56 = vadd.f32 %v3051_v11, %v3005_v37  ;;  %v3273_v63 = vrot.slane %v3217_v4, 2  ;;  %v7920_v34 = vld [vmem:[%s8938_s3] ss:$0 sm:$0xff] }
 0x1e0   : > { %v3274_v53 = vrot.slane %v3218_v46, 2  ;;  %v3364_v5 = vmul.f32 %v7600_v28, %v7899_v48  ;;  %v3068_v57 = vadd.f32 %v3052_v20, %v3006_v32  ;;  %v3150_v54 = vsel %vm605_vm3, %v3148_v13, %v3149_v50  ;;  %v2735_v32 = vld [vmem:[#allocation3 + $0x88] sm:$0x3] }
 0x1e1   : > { %v3641_v43 = vpack.c.bf16 %v3629_v62, %v3628_v21  ;;  %v3152_v55 = vsel %vm605_vm3, %v3149_v50, %v3151_v16  ;;  %v3276_v42 = vrot.slane %v3219_v9, 2  ;;  %v3192_v61 = vadd.f32 %v3150_v54, %v3067_v56 }
 0x1e2   : > { %v3275_v12 = vsel %vm731_vm4, %v3273_v63, %v3274_v53  ;;  %v3365_v15 = vmul.f32 %v7600_v28, %v7906_v27  ;;  %v3405_v39 = vmul.f32 %v7619_v59, %v7899_v48  ;;  %v3193_v0 = vadd.f32 %v3152_v55, %v3068_v57 }
 0x1e3   : > { %5681 = vmatmul.mubr.msk.bf16.gmra.mxu1 %vm368_vm5, %v3641_v43  ;;  %v3277_v21 = vsel %vm731_vm4, %v3274_v53, %v3276_v42  ;;  %v3406_v29 = vmul.f32 %v7619_v59, %v7906_v27  ;;  %v3317_v1 = vadd.f32 %v3275_v12, %v3192_v61  ;;  %v3407_v62 = vmul.f32 %v7619_v59, %v3340_v40  ;;  %v3030_v12 = vld [vmem:[#allocation3 + $0xa0] sm:$0x3] }
 0x1e4   : > { %v3461_v47 = vrot.slane %v3405_v39, 1  ;;  %v3530_v25 = vmul.f32 %v7627_v52, %v7899_v48  ;;  %v3318_v58 = vadd.f32 %v3277_v21, %v3193_v0  ;;  %v3531_v6 = vmul.f32 %v7627_v52, %v7906_v27 }
 0x1e5   : > { %v3462_v45 = vrot.slane %v3406_v29, 1  ;;  %v3380_v11 = vadd.f32 %v3364_v5, %v3317_v1  ;;  %v3464_v43 = vrot.slane %v3407_v62, 1  ;;  %v3532_v35 = vmul.f32 %v7627_v52, %v3340_v40 }
 0x1e6   : > { %v3381_v10 = vadd.f32 %v3365_v15, %v3318_v58  ;;  %v3586_v31 = vrot.slane %v3530_v25, 2  ;;  %v3587_v30 = vrot.slane %v3531_v6, 2  ;;  %v2757_v16 = vmul.f32 %v7548_v36, %v7832_v8 }
 0x1e7   : > { %v3463_v23 = vsel %vm605_vm3, %v3461_v47, %v3462_v45  ;;  %v3465_v26 = vsel %vm605_vm3, %v3462_v45, %v3464_v43  ;;  %v3589_v46 = vrot.slane %v3532_v35, 2  ;;  %v2758_v9 = vmul.f32 %v7548_v36, %v7840_v33  ;;  %v7969_v47 = vld [vmem:[#allocation3 + $0xa8] sm:$0xff]  ;;  %v7975_v43 = vld [vmem:[#allocation3 + $0xb0] sm:$0xff] }
 0x1e8   : > { %v3505_v51 = vadd.f32 %v3463_v23, %v3380_v11  ;;  %v3506_v4 = vadd.f32 %v3465_v26, %v3381_v10  ;;  %v3588_v50 = vsel %vm731_vm4, %v3586_v31, %v3587_v30  ;;  %v2783_v56 = vmul.f32 %v7530_v2, %v7832_v8 }
 0x1e9   : > { %v3590_v53 = vsel %vm731_vm4, %v3587_v30, %v3589_v46  ;;  %v2784_v57 = vmul.f32 %v7530_v2, %v7840_v33  ;;  %v2785_v55 = vmul.f32 %v7530_v2, %v2735_v32  ;;  %v2908_v40 = vmul.f32 %v7539_v49, %v7832_v8 }
 0x1ea   : > { %v3630_v5 = vadd.f32 %v3588_v50, %v3505_v51  ;;  %v3631_v54 = vadd.f32 %v3590_v53, %v3506_v4  ;;  %v2841_v42 = vrot.slane %v2783_v56, 1  ;;  %v2910_v61 = vmul.f32 %v7539_v49, %v2735_v32  ;;  %v3666_v56 = vld [vmem:[%s6090_s23 + $0x60] sm:$0xff] }
 0x1eb   : > { %v5638_v3 = vpop.f32.mrf.mxu1  ;;  %v2842_v36 = vrot.slane %v2784_v57, 1  ;;  %v3053_v15 = vmul.f32 %v7564_v24, %v7899_v48  ;;  %v2966_v0 = vrot.slane %v2908_v40, 2  ;;  %v3054_v2 = vmul.f32 %v7564_v24, %v7906_v27 }
 0x1ec   : > { %v2647_v19 = vadd.f32 %v7920_v34, %v5638_v3  ;;  %v2909_v3 = vmul.f32 %v7539_v49, %v7840_v33  ;;  %v3642_v39 = vpack.c.bf16 %v3631_v54, %v3630_v5  ;;  %v2969_v29 = vrot.slane %v2910_v61, 2  ;;  %v3668_v54 = vld [vmem:[%s6090_s23 + $0x70] sm:$0xff] }
 0x1ed   : > { %v2638_v41 = vpop.f32.mrf.mxu1  ;;  %v2843_v8 = vsel %vm605_vm3, %v2841_v42, %v2842_v36  ;;  %v3096_v1 = vmul.f32 %v7578_v22, %v7906_v27  ;;  %v3097_v62 = vmul.f32 %v7578_v22, %v3030_v12  ;;  %v3220_v11 = vmul.f32 %v7588_v38, %v7899_v48 }
 0x1ee   : > { %v2691_v14 = vmax.f32 %v2647_v19, 0.0  ;;  %v2639_v18 = vadd.f32 %v7920_v34, %v2638_v41  ;;  %v2844_v19 = vrot.slane %v2785_v55, 1  ;;  %v2967_v21 = vrot.slane %v2909_v3, 2  ;;  %5684 = vmatprep.mubr.msk.bf16.mxu1 %vm368_vm5, %v3642_v39  ;;  %v3669_v55 = vld [vmem:[%s6090_s23 + $0x78] sm:$0xff] }
 0x1ef   : > { %v5639_v60 = vpop.f32.mrf.mxu1  ;;  %v3095_v41 = vmul.f32 %v7578_v22, %v7899_v48  ;;  %v2882_v33 = vadd.f32 %v2843_v8, %v2757_v16  ;;  %v3154_v45 = vrot.slane %v3096_v1, 1  ;;  %v3221_v22 = vmul.f32 %v7588_v38, %v7906_v27  ;;  %v2738_v8 = vld [vmem:[#allocation3 + $0xa0] sm:$0x3] }
 0x1f0   : > { %2708 = vst.msk [vmem:[#allocation3 + $0x121] sm:$0xff] %vm368_vm5, %v2691_v14  ;;  %v2689_v20 = vmax.f32 %v2639_v18, 0.0  ;;  %v2650_v17 = vadd.f32 %v7920_v34, %v5639_v60  ;;  %v2845_v49 = vsel %vm605_vm3, %v2842_v36, %v2844_v19  ;;  %v2968_v25 = vsel %vm731_vm4, %v2966_v0, %v2967_v21 }
 0x1f1   : > { %v2641_v44 = vpop.f32.mrf.mxu1  ;;  %v2883_v24 = vadd.f32 %v2845_v49, %v2758_v9  ;;  %v2970_v14 = vsel %vm731_vm4, %v2967_v21, %v2969_v29  ;;  %v3153_v18 = vrot.slane %v3095_v41, 1  ;;  %v3007_v58 = vadd.f32 %v2968_v25, %v2882_v33  ;;  %v8008_v29 = vld [vmem:[%s8939_s4] ss:$0 sm:$0xff]  ;;  %v8017_v49 = vld [vmem:[%s8939_s4 + $0x1] ss:$0 sm:$0xff] }
 0x1f2   : > { %2706 = vst.msk [vmem:[#allocation3 + $0x109] sm:$0xff] %vm368_vm5, %v2689_v20  ;;  %v2692_v37 = vmax.f32 %v2650_v17, 0.0  ;;  %v2642_v13 = vadd.f32 %v7920_v34, %v2641_v44  ;;  %v3156_v60 = vrot.slane %v3097_v62, 1  ;;  %v3222_v35 = vmul.f32 %v7588_v38, %v3030_v12  ;;  %v3343_v20 = vld [vmem:[#allocation3 + $0xb8] sm:$0x3] }
 0x1f3   : > { %v3008_v6 = vadd.f32 %v2970_v14, %v2883_v24  ;;  %v3366_v17 = vmul.f32 %v7600_v28, %v7969_v47  ;;  %v3069_v10 = vadd.f32 %v3053_v15, %v3007_v58  ;;  %v3155_v23 = vsel %vm605_vm3, %v3153_v18, %v3154_v45 }
 0x1f4   : > { %2709 = vst.msk [vmem:[#allocation3 + $0x129] sm:$0xff] %vm368_vm5, %v2692_v37  ;;  %v2690_v63 = vmax.f32 %v2642_v13, 0.0  ;;  %v3157_v44 = vsel %vm605_vm3, %v3154_v45, %v3156_v60  ;;  %v3278_v26 = vrot.slane %v3220_v11, 2  ;;  %v3279_v31 = vrot.slane %v3221_v22, 2  ;;  %v8030_v45 = vld [vmem:[%s8939_s4 + $0x2] ss:$0 sm:$0xff] }
 0x1f5   : > { %v3070_v51 = vadd.f32 %v3054_v2, %v3008_v6  ;;  %v3281_v30 = vrot.slane %v3222_v35, 2  ;;  %v3367_v37 = vmul.f32 %v7600_v28, %v7975_v43  ;;  %v3194_v38 = vadd.f32 %v3155_v23, %v3069_v10  ;;  %v3667_v28 = vld [vmem:[%s6090_s23 + $0x68] sm:$0xff]  ;;  %v8040_v23 = vld [vmem:[%s8939_s4 + $0x4] ss:$0 sm:$0xff] }
 0x1f6   : > { %2707 = vst.msk [vmem:[#allocation3 + $0x111] sm:$0xff] %vm368_vm5, %v2690_v63  ;;  %v3408_v13 = vmul.f32 %v7619_v59, %v7969_v47  ;;  %v3409_v4 = vmul.f32 %v7619_v59, %v7975_v43  ;;  %v3410_v46 = vmul.f32 %v7619_v59, %v3343_v20  ;;  %v3280_v50 = vsel %vm731_vm4, %v3278_v26, %v3279_v31  ;;  %v3033_v10 = vld [vmem:[#allocation3 + $0xb8] sm:$0x3] }
 0x1f7   : > { %v3195_v32 = vadd.f32 %v3157_v44, %v3070_v51  ;;  %v3282_v16 = vsel %vm731_vm4, %v3279_v31, %v3281_v30  ;;  %v3533_v9 = vmul.f32 %v7627_v52, %v7969_v47  ;;  %v3319_v63 = vadd.f32 %v3280_v50, %v3194_v38  ;;  %v8051_v38 = vld [vmem:[%s8939_s4 + $0x5] ss:$0 sm:$0xff] }
 0x1f8   : > { %v3466_v53 = vrot.slane %v3408_v13, 1  ;;  %v3467_v5 = vrot.slane %v3409_v4, 1  ;;  %v3469_v57 = vrot.slane %v3410_v46, 1  ;;  %v3534_v59 = vmul.f32 %v7627_v52, %v7975_v43 }
 0x1f9   : > { %v3320_v42 = vadd.f32 %v3282_v16, %v3195_v32  ;;  %v3535_v40 = vmul.f32 %v7627_v52, %v3343_v20  ;;  %v3591_v36 = vrot.slane %v3533_v9, 2  ;;  %v3382_v3 = vadd.f32 %v3366_v17, %v3319_v63  ;;  %v8061_v9 = vld [vmem:[#allocation3 + $0xc0] sm:$0xff] }
 0x1fa   : > { %v3468_v61 = vsel %vm605_vm3, %v3466_v53, %v3467_v5  ;;  %v3470_v12 = vsel %vm605_vm3, %v3467_v5, %v3469_v57  ;;  %v3676_v15 = vpack.c.bf16 %v3667_v28, %v3666_v56  ;;  %v3592_v19 = vrot.slane %v3534_v59, 2  ;;  %v8066_v53 = vld [vmem:[%s8939_s4 + $0x6] ss:$0 sm:$0xff]  ;;  %v8073_v59 = vld [vmem:[#allocation3 + $0xc8] sm:$0xff] }
 0x1fb   : > { %v3383_v39 = vadd.f32 %v3367_v37, %v3320_v42  ;;  %v3594_v0 = vrot.slane %v3535_v40, 2  ;;  %v3677_v2 = vpack.c.bf16 %v3669_v55, %v3668_v54  ;;  %v3507_v21 = vadd.f32 %v3468_v61, %v3382_v3  ;;  %v8079_v61 = vld [vmem:[%s8939_s4 + $0x8] ss:$0 sm:$0xff] }
 0x1fc   : > { %5664 = vmatprep.mubr.msk.bf16.mxu0 %vm325_vm0, %v3676_v15  ;;  %v2759_v52 = vmul.f32 %v8008_v29, %v7899_v48  ;;  %v2760_v41 = vmul.f32 %v8008_v29, %v7906_v27  ;;  %v2786_v33 = vmul.f32 %v8017_v49, %v7899_v48  ;;  %v3593_v62 = vsel %vm731_vm4, %v3591_v36, %v3592_v19 }
 0x1fd   : > { %v3508_v1 = vadd.f32 %v3470_v12, %v3383_v39  ;;  %v3595_v24 = vsel %vm731_vm4, %v3592_v19, %v3594_v0  ;;  %5665 = vmatmul.mubr.msk.bf16.gmra.mxu0 %vm325_vm0, %v3677_v2  ;;  %v2787_v25 = vmul.f32 %v8017_v49, %v7906_v27  ;;  %v3632_v14 = vadd.f32 %v3593_v62, %v3507_v21 }
 0x1fe   : > { %v2788_v18 = vmul.f32 %v8017_v49, %v2738_v8  ;;  %v2846_v58 = vrot.slane %v2786_v33, 1  ;;  %v2911_v60 = vmul.f32 %v8030_v45, %v7899_v48  ;;  %v2912_v22 = vmul.f32 %v8030_v45, %v7906_v27  ;;  %v8090_v33 = vld [vmem:[%s8939_s4 + $0x9] ss:$0 sm:$0xff] }
 0x1ff   : > { %v3633_v11 = vadd.f32 %v3595_v24, %v3508_v1  ;;  %v2847_v6 = vrot.slane %v2787_v25, 1  ;;  %v2913_v35 = vmul.f32 %v8030_v45, %v2738_v8  ;;  %v3055_v44 = vmul.f32 %v8040_v23, %v7969_v47  ;;  %v3346_v8 = vld [vmem:[#allocation3 + $0xd0] sm:$0x3] }
 0x200   : > { %v2849_v20 = vrot.slane %v2788_v18, 1  ;;  %v2971_v17 = vrot.slane %v2911_v60, 2  ;;  %v3056_v48 = vmul.f32 %v8040_v23, %v7975_v43  ;;  %v2972_v27 = vrot.slane %v2912_v22, 2 }
 0x201   : > { %v3643_v26 = vpack.c.bf16 %v3633_v11, %v3632_v14  ;;  %v2848_v51 = vsel %vm605_vm3, %v2846_v58, %v2847_v6  ;;  %v2974_v31 = vrot.slane %v2913_v35, 2  ;;  %v3098_v13 = vmul.f32 %v8051_v38, %v7969_v47 }
 0x202   : > { %v2850_v30 = vsel %vm605_vm3, %v2847_v6, %v2849_v20  ;;  %v2884_v37 = vadd.f32 %v2848_v51, %v2759_v52  ;;  %v3099_v4 = vmul.f32 %v8051_v38, %v7975_v43  ;;  %v2973_v32 = vsel %vm731_vm4, %v2971_v17, %v2972_v27 }
 0x203   : > { %5685 = vmatmul.mubr.msk.bf16.gmra.mxu1 %vm368_vm5, %v3643_v26  ;;  %v2885_v46 = vadd.f32 %v2850_v30, %v2760_v41  ;;  %v2975_v50 = vsel %vm731_vm4, %v2972_v27, %v2974_v31  ;;  %v3100_v16 = vmul.f32 %v8051_v38, %v3033_v10  ;;  %v3158_v28 = vrot.slane %v3098_v13, 1 }
 0x204   : > { %v3009_v56 = vadd.f32 %v2973_v32, %v2884_v37  ;;  %v3159_v63 = vrot.slane %v3099_v4, 1  ;;  %v3223_v5 = vmul.f32 %v8066_v53, %v7969_v47  ;;  %v3224_v55 = vmul.f32 %v8066_v53, %v7975_v43 }
 0x205   : > { %v3010_v57 = vadd.f32 %v2975_v50, %v2885_v46  ;;  %v3161_v54 = vrot.slane %v3100_v16, 1  ;;  %v3225_v42 = vmul.f32 %v8066_v53, %v3033_v10  ;;  %v3368_v12 = vmul.f32 %v8079_v61, %v8061_v9  ;;  %v8103_v10 = vld [vmem:[%s8939_s4 + $0xa] ss:$0 sm:$0xff] }
 0x206   : > { %v3071_v40 = vadd.f32 %v3055_v44, %v3009_v56  ;;  %v3160_v36 = vsel %vm605_vm3, %v3158_v28, %v3159_v63  ;;  %v3283_v3 = vrot.slane %v3223_v5, 2  ;;  %v3284_v0 = vrot.slane %v3224_v55, 2  ;;  %v2741_v56 = vld [vmem:[#allocation3 + $0xb8] sm:$0x3] }
 0x207   : > { %v3072_v39 = vadd.f32 %v3056_v48, %v3010_v57  ;;  %v3162_v19 = vsel %vm605_vm3, %v3159_v63, %v3161_v54  ;;  %v3286_v2 = vrot.slane %v3225_v42, 2  ;;  %v3369_v41 = vmul.f32 %v8079_v61, %v8073_v59 }
 0x208   : > { %v3196_v52 = vadd.f32 %v3160_v36, %v3071_v40  ;;  %v3411_v1 = vmul.f32 %v8090_v33, %v8061_v9  ;;  %v3285_v25 = vsel %vm731_vm4, %v3283_v3, %v3284_v0  ;;  %v3412_v18 = vmul.f32 %v8090_v33, %v8073_v59 }
 0x209   : > { %v3197_v24 = vadd.f32 %v3162_v19, %v3072_v39  ;;  %v3287_v14 = vsel %vm731_vm4, %v3284_v0, %v3286_v2  ;;  %v3413_v6 = vmul.f32 %v8090_v33, %v3346_v8  ;;  %v3536_v44 = vmul.f32 %v8103_v10, %v8061_v9 }
 0x20a   : > { %v3321_v11 = vadd.f32 %v3285_v25, %v3196_v52  ;;  %v3471_v20 = vrot.slane %v3411_v1, 1  ;;  %v3472_v17 = vrot.slane %v3412_v18, 1  ;;  %v3537_v13 = vmul.f32 %v8103_v10, %v8073_v59 }
 0x20b   : > { %v3322_v35 = vadd.f32 %v3287_v14, %v3197_v24  ;;  %v3474_v27 = vrot.slane %v3413_v6, 1  ;;  %v3538_v4 = vmul.f32 %v8103_v10, %v3346_v8  ;;  %v3596_v63 = vrot.slane %v3536_v44, 2 }
 0x20c   : > { %v3384_v51 = vadd.f32 %v3368_v12, %v3321_v11  ;;  %v3473_v37 = vsel %vm605_vm3, %v3471_v20, %v3472_v17  ;;  %v3597_v5 = vrot.slane %v3537_v13, 2  ;;  %v2761_v55 = vmul.f32 %v8008_v29, %v7969_v47  ;;  %v8150_v20 = vld [vmem:[#allocation3 + $0xd8] sm:$0xff] }
 0x20d   : > { %v3385_v30 = vadd.f32 %v3369_v41, %v3322_v35  ;;  %v3475_v50 = vsel %vm605_vm3, %v3472_v17, %v3474_v27  ;;  %v3599_v57 = vrot.slane %v3538_v4, 2  ;;  %v2762_v42 = vmul.f32 %v8008_v29, %v7975_v43 }
 0x20e   : > { %v3509_v16 = vadd.f32 %v3473_v37, %v3384_v51  ;;  %v2789_v40 = vmul.f32 %v8017_v49, %v7969_v47  ;;  %v3598_v36 = vsel %vm731_vm4, %v3596_v63, %v3597_v5  ;;  %v2790_v12 = vmul.f32 %v8017_v49, %v7975_v43  ;;  %v8152_v51 = vld [vmem:[#allocation3 + $0xe0] sm:$0xff] }
 0x20f   : > { %v3510_v28 = vadd.f32 %v3475_v50, %v3385_v30  ;;  %v3600_v3 = vsel %vm731_vm4, %v3597_v5, %v3599_v57  ;;  %v2914_v29 = vmul.f32 %v8030_v45, %v7969_v47  ;;  %v2916_v52 = vmul.f32 %v8030_v45, %v2741_v56 }
 0x210   : > { %v5642_v15 = vpop.f32.mrf.mxu1  ;;  %v3634_v39 = vadd.f32 %v3598_v36, %v3509_v16  ;;  %v2851_v0 = vrot.slane %v2789_v40, 1  ;;  %v2852_v2 = vrot.slane %v2790_v12, 1  ;;  %v3057_v24 = vmul.f32 %v8040_v23, %v8061_v9  ;;  %v5482_v36 = vld [vmem:[%s6090_s23 + $0x80] sm:$0xff] }
 0x211   : > { %v2663_v21 = vadd.f32 %v7920_v34, %v5642_v15  ;;  %v2791_v15 = vmul.f32 %v8017_v49, %v2741_v56  ;;  %v3635_v19 = vadd.f32 %v3600_v3, %v3510_v28  ;;  %v2976_v1 = vrot.slane %v2914_v29, 2  ;;  %v5483_v3 = vld [vmem:[%s6090_s23 + $0x88] sm:$0xff] }
 0x212   : > { %v2654_v62 = vpop.f32.mrf.mxu1  ;;  %v3058_v25 = vmul.f32 %v8040_v23, %v8073_v59  ;;  %v2853_v14 = vsel %vm605_vm3, %v2851_v0, %v2852_v2  ;;  %v3102_v11 = vmul.f32 %v8051_v38, %v8073_v59  ;;  %v3226_v35 = vmul.f32 %v8066_v53, %v8061_v9 }
 0x213   : > { %v2695_v58 = vmax.f32 %v2663_v21, 0.0  ;;  %v2655_v60 = vadd.f32 %v7920_v34, %v2654_v62  ;;  %v2854_v8 = vrot.slane %v2791_v15, 1  ;;  %v2915_v21 = vmul.f32 %v8030_v45, %v7975_v43  ;;  %v3036_v62 = vld [vmem:[#allocation3 + $0xd0] sm:$0x3] }
 0x214   : > { %v5643_v22 = vpop.f32.mrf.mxu1  ;;  %v3644_v41 = vpack.c.bf16 %v3635_v19, %v3634_v39  ;;  %v2886_v43 = vadd.f32 %v2853_v14, %v2761_v55  ;;  %v3101_v45 = vmul.f32 %v8051_v38, %v8061_v9  ;;  %v3228_v30 = vmul.f32 %v8066_v53, %v3036_v62  ;;  %v8177_v19 = vld [vmem:[%s8939_s4] ss:$0 sm:$0xff] }
 0x215   : > { %2712 = vst.msk [vmem:[#allocation3 + $0x151] sm:$0xff] %vm368_vm5, %v2695_v58  ;;  %v2693_v48 = vmax.f32 %v2655_v60, 0.0  ;;  %v2666_v26 = vadd.f32 %v7920_v34, %v5643_v22  ;;  %v2855_v47 = vsel %vm605_vm3, %v2852_v2, %v2854_v8  ;;  %v2977_v18 = vrot.slane %v2915_v21, 2 }
 0x216   : > { %v2657_v31 = vpop.f32.mrf.mxu1  ;;  %v2979_v58 = vrot.slane %v2916_v52, 2  ;;  %5688 = vmatprep.mubr.msk.bf16.mxu1 %vm368_vm5, %v3644_v41  ;;  %v2887_v60 = vadd.f32 %v2855_v47, %v2762_v42  ;;  %v3103_v22 = vmul.f32 %v8051_v38, %v3036_v62  ;;  %v3288_v37 = vrot.slane %v3226_v35, 2  ;;  %v8189_v47 = vld [vmem:[%s8939_s4 + $0x2] ss:$0 sm:$0xff] }
 0x217   : > { %2710 = vst.msk [vmem:[#allocation3 + $0x139] sm:$0xff] %vm368_vm5, %v2693_v48  ;;  %v2696_v46 = vmax.f32 %v2666_v26, 0.0  ;;  %v2658_v32 = vadd.f32 %v7920_v34, %v2657_v31  ;;  %v2978_v6 = vsel %vm731_vm4, %v2976_v1, %v2977_v18  ;;  %v3163_v48 = vrot.slane %v3101_v45, 1  ;;  %v4002_v1 = vld [vmem:[#allocation3 + $0xd0] sm:$0x3] }
 0x218   : > { %v2980_v23 = vsel %vm731_vm4, %v2977_v18, %v2979_v58  ;;  %v3011_v17 = vadd.f32 %v2978_v6, %v2886_v43  ;;  %v3164_v26 = vrot.slane %v3102_v11, 1  ;;  %v3166_v27 = vrot.slane %v3103_v22, 1 }
 0x219   : > { %2713 = vst.msk [vmem:[#allocation3 + $0x159] sm:$0xff] %vm368_vm5, %v2696_v46  ;;  %v2694_v54 = vmax.f32 %v2658_v32, 0.0  ;;  %v3012_v44 = vadd.f32 %v2980_v23, %v2887_v60  ;;  %v3227_v31 = vmul.f32 %v8066_v53, %v8073_v59  ;;  %v3349_v46 = vld [vmem:[#allocation3 + $0xe8] sm:$0x3]  ;;  %v3370_v32 = vmul.f32 %v8079_v61, %v8150_v20  ;;  %v8204_v23 = vld [vmem:[%s8939_s4 + $0x4] ss:$0 sm:$0xff] }
 0x21a   : > { %v3073_v13 = vadd.f32 %v3057_v24, %v3011_v17  ;;  %v3165_v4 = vsel %vm605_vm3, %v3163_v48, %v3164_v26  ;;  %v3167_v50 = vsel %vm605_vm3, %v3164_v26, %v3166_v27  ;;  %v3291_v56 = vrot.slane %v3228_v30, 2 }
 0x21b   : > { %2711 = vst.msk [vmem:[#allocation3 + $0x141] sm:$0xff] %vm368_vm5, %v2694_v54  ;;  %v3074_v38 = vadd.f32 %v3058_v25, %v3012_v44  ;;  %v3289_v16 = vrot.slane %v3227_v31, 2  ;;  %v3371_v28 = vmul.f32 %v8079_v61, %v8152_v51  ;;  %v3414_v5 = vmul.f32 %v8090_v33, %v8150_v20 }
 0x21c   : > { %v3198_v63 = vadd.f32 %v3165_v4, %v3073_v13  ;;  %v3415_v57 = vmul.f32 %v8090_v33, %v8152_v51  ;;  %v3416_v42 = vmul.f32 %v8090_v33, %v3349_v46  ;;  %v3539_v40 = vmul.f32 %v8103_v10, %v8150_v20  ;;  %v4297_v13 = vld [vmem:[#allocation3 + $0xe8] sm:$0x3] }
 0x21d   : > { %v3199_v53 = vadd.f32 %v3167_v50, %v3074_v38  ;;  %v3290_v54 = vsel %vm731_vm4, %v3288_v37, %v3289_v16  ;;  %v3292_v55 = vsel %vm731_vm4, %v3289_v16, %v3291_v56  ;;  %v3476_v15 = vrot.slane %v3414_v5, 1  ;;  %v8225_v16 = vld [vmem:[%s8939_s4 + $0x5] ss:$0 sm:$0xff] }
 0x21e   : > { %v3323_v61 = vadd.f32 %v3290_v54, %v3198_v63  ;;  %v3477_v39 = vrot.slane %v3415_v57, 1  ;;  %v3479_v0 = vrot.slane %v3416_v42, 1  ;;  %v3540_v29 = vmul.f32 %v8103_v10, %v8152_v51 }
 0x21f   : > { %v3324_v12 = vadd.f32 %v3292_v55, %v3199_v53  ;;  %v3541_v33 = vmul.f32 %v8103_v10, %v3349_v46  ;;  %v3601_v2 = vrot.slane %v3539_v40, 2  ;;  %v4951_v41 = vpack.c.bf16 %v5483_v3, %v5482_v36 }
 0x220   : > { %v3386_v8 = vadd.f32 %v3370_v32, %v3323_v61  ;;  %v3478_v52 = vsel %vm605_vm3, %v3476_v15, %v3477_v39  ;;  %v3480_v62 = vsel %vm605_vm3, %v3477_v39, %v3479_v0  ;;  %v3602_v24 = vrot.slane %v3540_v29, 2  ;;  %v8240_v61 = vld [vmem:[%s8939_s4 + $0x8] ss:$0 sm:$0xff] }
 0x221   : > { %v3387_v21 = vadd.f32 %v3371_v28, %v3324_v12  ;;  %v3604_v25 = vrot.slane %v3541_v33, 2  ;;  %v4029_v14 = vmul.f32 %v8177_v19, %v8061_v9  ;;  %5696 = vmatprep.mubr.msk.bf16.mxu0 %vm325_vm0, %v4951_v41  ;;  %v4030_v58 = vmul.f32 %v8177_v19, %v8073_v59 }
 0x222   : > { %v3511_v10 = vadd.f32 %v3478_v52, %v3386_v8  ;;  %v4050_v43 = vmul.f32 %v8017_v49, %v8061_v9  ;;  %v3603_v60 = vsel %vm731_vm4, %v3601_v2, %v3602_v24  ;;  %v4051_v11 = vmul.f32 %v8017_v49, %v8073_v59  ;;  %v8252_v52 = vld [vmem:[%s8939_s4 + $0x9] ss:$0 sm:$0xff] }
 0x223   : > { %v3512_v18 = vadd.f32 %v3480_v62, %v3387_v21  ;;  %v3605_v45 = vsel %vm731_vm4, %v3602_v24, %v3604_v25  ;;  %v4052_v6 = vmul.f32 %v8017_v49, %v4002_v1  ;;  %v4175_v44 = vmul.f32 %v8189_v47, %v8061_v9  ;;  %v8218_v9 = vld [vmem:[%s8939_s4 + $0x6] ss:$0 sm:$0xff] }
 0x224   : > { %v3636_v22 = vadd.f32 %v3603_v60, %v3511_v10  ;;  %v4098_v17 = vrot.slane %v4050_v43, 1  ;;  %v4099_v48 = vrot.slane %v4051_v11, 1  ;;  %v4176_v27 = vmul.f32 %v8189_v47, %v8073_v59  ;;  %v8247_v21 = vld [vmem:[#allocation3 + $0xf0] sm:$0xff]  ;;  %v4609_v43 = vld [vmem:[#allocation3 + $0x100] sm:$0x3] }
 0x225   : > { %v3637_v35 = vadd.f32 %v3605_v45, %v3512_v18  ;;  %v4101_v26 = vrot.slane %v4052_v6, 1  ;;  %v4177_v31 = vmul.f32 %v8189_v47, %v4002_v1  ;;  %v4223_v37 = vrot.slane %v4175_v44, 2  ;;  %v8263_v60 = vld [vmem:[%s8939_s4 + $0xa] ss:$0 sm:$0xff] }
 0x226   : > { %v4324_v38 = vmul.f32 %v8204_v23, %v8150_v20  ;;  %v4325_v4 = vmul.f32 %v8204_v23, %v8152_v51  ;;  %v4100_v46 = vsel %vm605_vm3, %v4098_v17, %v4099_v48  ;;  %v4224_v32 = vrot.slane %v4176_v27, 2 }
 0x227   : > { %v3645_v30 = vpack.c.bf16 %v3637_v35, %v3636_v22  ;;  %v4102_v59 = vsel %vm605_vm3, %v4099_v48, %v4101_v26  ;;  %v4226_v50 = vrot.slane %v4177_v31, 2  ;;  %v4154_v56 = vadd.f32 %v4100_v46, %v4029_v14 }
 0x228   : > { %v4155_v28 = vadd.f32 %v4102_v59, %v4030_v58  ;;  %v4361_v63 = vmul.f32 %v8225_v16, %v8150_v20  ;;  %v4362_v53 = vmul.f32 %v8225_v16, %v8152_v51  ;;  %v4225_v5 = vsel %vm731_vm4, %v4223_v37, %v4224_v32  ;;  %v8258_v58 = vld [vmem:[#allocation3 + $0xf8] sm:$0xff] }
 0x229   : > { %5689 = vmatmul.mubr.msk.bf16.gmra.mxu1 %vm368_vm5, %v3645_v30  ;;  %v4227_v57 = vsel %vm731_vm4, %v4224_v32, %v4226_v50  ;;  %v4363_v54 = vmul.f32 %v8225_v16, %v4297_v13  ;;  %v4486_v55 = vmul.f32 %v8218_v9, %v8150_v20  ;;  %v4279_v42 = vadd.f32 %v4225_v5, %v4154_v56  ;;  %v4003_v56 = vld [vmem:[#allocation3 + $0xd8] sm:$0xff] }
 0x22a   : > { %v4280_v40 = vadd.f32 %v4227_v57, %v4155_v28  ;;  %v4409_v36 = vrot.slane %v4361_v63, 1  ;;  %v4410_v3 = vrot.slane %v4362_v53, 1  ;;  %v4487_v39 = vmul.f32 %v8218_v9, %v8152_v51  ;;  %v4004_v57 = vld [vmem:[#allocation3 + $0xe0] sm:$0xff] }
 0x22b   : > { %v4412_v15 = vrot.slane %v4363_v54, 1  ;;  %v4488_v0 = vmul.f32 %v8218_v9, %v4297_v13  ;;  %v4534_v29 = vrot.slane %v4486_v55, 2  ;;  %v4340_v20 = vadd.f32 %v4324_v38, %v4279_v42  ;;  %v5484_v38 = vld [vmem:[%s6090_s23 + $0x90] sm:$0xff] }
 0x22c   : > { %v4341_v2 = vadd.f32 %v4325_v4, %v4280_v40  ;;  %v4411_v8 = vsel %vm605_vm3, %v4409_v36, %v4410_v3  ;;  %v4535_v51 = vrot.slane %v4487_v39, 2  ;;  %v4636_v24 = vmul.f32 %v8240_v61, %v8247_v21  ;;  %v5485_v4 = vld [vmem:[%s6090_s23 + $0x98] sm:$0xff] }
 0x22d   : > { %v4413_v1 = vsel %vm605_vm3, %v4410_v3, %v4412_v15  ;;  %v4537_v62 = vrot.slane %v4488_v0, 2  ;;  %v4465_v10 = vadd.f32 %v4411_v8, %v4340_v20  ;;  %v4637_v22 = vmul.f32 %v8240_v61, %v8258_v58 }
 0x22e   : > { %v4466_v18 = vadd.f32 %v4413_v1, %v4341_v2  ;;  %v4536_v11 = vsel %vm731_vm4, %v4534_v29, %v4535_v51  ;;  %v4673_v35 = vmul.f32 %v8252_v52, %v8247_v21  ;;  %v4674_v31 = vmul.f32 %v8252_v52, %v8258_v58 }
 0x22f   : > { %v4538_v6 = vsel %vm731_vm4, %v4535_v51, %v4537_v62  ;;  %v4590_v48 = vadd.f32 %v4536_v11, %v4465_v10  ;;  %v4675_v30 = vmul.f32 %v8252_v52, %v4609_v43  ;;  %v4798_v13 = vmul.f32 %v8263_v60, %v8247_v21 }
 0x230   : > { %v4591_v26 = vadd.f32 %v4538_v6, %v4466_v18  ;;  %v4721_v37 = vrot.slane %v4673_v35, 1  ;;  %v4722_v28 = vrot.slane %v4674_v31, 1  ;;  %v4799_v53 = vmul.f32 %v8263_v60, %v8258_v58  ;;  %v4300_v18 = vld [vmem:[#allocation3 + $0x100] sm:$0x3] }
 0x231   : > { %v4652_v32 = vadd.f32 %v4636_v24, %v4590_v48  ;;  %v4724_v63 = vrot.slane %v4675_v30, 1  ;;  %v4800_v5 = vmul.f32 %v8263_v60, %v4609_v43  ;;  %v4846_v55 = vrot.slane %v4798_v13, 2 }
 0x232   : > { %v4653_v50 = vadd.f32 %v4637_v22, %v4591_v26  ;;  %v4952_v42 = vpack.c.bf16 %v5485_v4, %v5484_v38  ;;  %v4031_v40 = vmul.f32 %v8177_v19, %v4003_v56  ;;  %v4847_v3 = vrot.slane %v4799_v53, 2  ;;  %v4612_v53 = vld [vmem:[#allocation3 + $0x118] sm:$0x3] }
 0x233   : > { %v4725_v36 = vsel %vm605_vm3, %v4722_v28, %v4724_v63  ;;  %v4032_v0 = vmul.f32 %v8177_v19, %v4004_v57  ;;  %v4053_v29 = vmul.f32 %v8017_v49, %v4003_v56  ;;  %v4054_v2 = vmul.f32 %v8017_v49, %v4004_v57 }
 0x234   : > { %v5646_v12 = vpop.f32.mrf.mxu1  ;;  %v4778_v39 = vadd.f32 %v4725_v36, %v4653_v50  ;;  %5697 = vmatmul.mubr.msk.bf16.vlgmr.msra.gmra.mxu0 %vm325_vm0, %v4952_v42  ;;  %v4106_v8 = vrot.slane %v7738_v7, 1  ;;  %v4178_v62 = vmul.f32 %v8189_v47, %v4003_v56  ;;  %v4326_v43 = vmul.f32 %v8204_v23, %v8247_v21  ;;  %v8316_v50 = vld [vmem:[#allocation3 + $0x108] sm:$0xff] }
 0x235   : > { %v2679_v33 = vadd.f32 %v7920_v34, %v5646_v12  ;;  %v4849_v12 = vrot.slane %v4800_v5, 2  ;;  %v4103_v51 = vrot.slane %v4053_v29, 1  ;;  %v4104_v24 = vrot.slane %v4054_v2, 1 }
 0x236   : > { %v2670_v41 = vpop.f32.mrf.mxu1  ;;  %v4228_v11 = vrot.slane %v4178_v62, 2  ;;  %v4327_v7 = vmul.f32 %v8204_v23, %v8258_v58  ;;  %v4364_v6 = vmul.f32 %v8225_v16, %v8247_v21  ;;  %v4366_v31 = vmul.f32 %v8225_v16, %v4300_v18 }
 0x237   : > { %v2699_v25 = vmax.f32 %v2679_v33, 0.0  ;;  %v2671_v14 = vadd.f32 %v7920_v34, %v2670_v41  ;;  %v4848_v33 = vsel %vm731_vm4, %v4846_v55, %v4847_v3  ;;  %v4850_v20 = vsel %vm731_vm4, %v4847_v3, %v4849_v12 }
 0x238   : > { %v5647_v45 = vpop.f32.mrf.mxu1  ;;  %v4903_v1 = vadd.f32 %v4850_v20, %v4778_v39  ;;  %v4105_v22 = vsel %vm605_vm3, %v4103_v51, %v4104_v24  ;;  %v4107_v35 = vsel %vm605_vm3, %v4104_v24, %v4106_v8  ;;  %v4414_v13 = vrot.slane %v4364_v6, 1  ;;  %v5487_v20 = vld [vmem:[%s6090_s23 + $0xa8] sm:$0xff] }
 0x239   : > { %2716 = vst.msk [vmem:[#allocation3 + $0x181] sm:$0xff] %vm368_vm5, %v2699_v25  ;;  %v2697_v17 = vmax.f32 %v2671_v14, 0.0  ;;  %v2682_v44 = vadd.f32 %v7920_v34, %v5647_v45  ;;  %v4179_v25 = vmul.f32 %v8189_v47, %v4004_v57  ;;  %v5831_v14 = vld [vmem:[#allocation3 + $0xe8] sm:$0x3]  ;;  %v4156_v48 = vadd.f32 %v4105_v22, %v4031_v40  ;;  %v8325_v40 = vld [vmem:[#allocation3 + $0x110] sm:$0xff] }
 0x23a   : > { %v2673_v27 = vpop.f32.mrf.mxu1  ;;  %v4180_v10 = vmul.f32 %v5831_v14, %v8189_v47  ;;  %v4157_v26 = vadd.f32 %v4107_v35, %v4032_v0  ;;  %v4489_v38 = vmul.f32 %v8218_v9, %v8247_v21  ;;  %v4490_v56 = vmul.f32 %v8218_v9, %v8258_v58  ;;  %v4008_v22 = vld [vmem:[#allocation3 + $0x100] sm:$0x3] }
 0x23b   : > { %2714 = vst.msk [vmem:[#allocation3 + $0x169] sm:$0xff] %vm368_vm5, %v2697_v17  ;;  %v2700_v46 = vmax.f32 %v2682_v44, 0.0  ;;  %v2674_v59 = vadd.f32 %v7920_v34, %v2673_v27  ;;  %v4723_v34 = vsel %vm605_vm3, %v4721_v37, %v4722_v28  ;;  %v4229_v17 = vrot.slane %v4179_v25, 2 }
 0x23c   : > { %v4777_v15 = vadd.f32 %v4723_v34, %v4652_v32  ;;  %v4231_v44 = vrot.slane %v4180_v10, 2  ;;  %v4365_v27 = vmul.f32 %v8225_v16, %v8258_v58  ;;  %v4417_v32 = vrot.slane %v4366_v31, 1 }
 0x23d   : > { %2717 = vst.msk [vmem:[#allocation3 + $0x189] sm:$0xff] %vm368_vm5, %v2700_v46  ;;  %v2698_v54 = vmax.f32 %v2674_v59, 0.0  ;;  %v4230_v30 = vsel %vm731_vm4, %v4228_v11, %v4229_v17  ;;  %v4491_v28 = vmul.f32 %v8218_v9, %v4300_v18  ;;  %v4539_v63 = vrot.slane %v4489_v38, 2 }
 0x23e   : > { %v4902_v41 = vadd.f32 %v4848_v33, %v4777_v15  ;;  %v4232_v37 = vsel %vm731_vm4, %v4229_v17, %v4231_v44  ;;  %v4281_v4 = vadd.f32 %v4230_v30, %v4156_v48  ;;  %v4415_v59 = vrot.slane %v4365_v27, 1  ;;  %v5486_v33 = vld [vmem:[%s6090_s23 + $0xa0] sm:$0xff] }
 0x23f   : > { %2715 = vst.msk [vmem:[#allocation3 + $0x171] sm:$0xff] %vm368_vm5, %v2698_v54  ;;  %v4282_v46 = vadd.f32 %v4232_v37, %v4157_v26  ;;  %v4638_v5 = vmul.f32 %v8240_v61, %v8316_v50  ;;  %v4540_v34 = vrot.slane %v4490_v56, 2  ;;  %v4542_v36 = vrot.slane %v4491_v28, 2 }
 0x240   : > { %v4918_v45 = vpack.c.bf16 %v4903_v1, %v4902_v41  ;;  %v4342_v57 = vadd.f32 %v4326_v43, %v4281_v4  ;;  %v4416_v55 = vsel %vm605_vm3, %v4414_v13, %v4415_v59  ;;  %v4418_v42 = vsel %vm605_vm3, %v4415_v59, %v4417_v32 }
 0x241   : > { %v4343_v54 = vadd.f32 %v4327_v7, %v4282_v46  ;;  %v4639_v3 = vmul.f32 %v8240_v61, %v8325_v40  ;;  %v4676_v12 = vmul.f32 %v8252_v52, %v8316_v50  ;;  %v4677_v0 = vmul.f32 %v8252_v52, %v8325_v40 }
 0x242   : > { %5720 = vmatprep.mubr.msk.bf16.mxu1 %vm368_vm5, %v4918_v45  ;;  %v4467_v15 = vadd.f32 %v4416_v55, %v4342_v57  ;;  %v4678_v29 = vmul.f32 %v8252_v52, %v4612_v53  ;;  %v4541_v2 = vsel %vm731_vm4, %v4539_v63, %v4540_v34  ;;  %v4543_v8 = vsel %vm731_vm4, %v4540_v34, %v4542_v36  ;;  %v4303_v57 = vld [vmem:[#allocation3 + $0x118] sm:$0x3] }
 0x243   : > { %v4468_v39 = vadd.f32 %v4418_v42, %v4343_v54  ;;  %v4726_v41 = vrot.slane %v4676_v12, 1  ;;  %v4801_v1 = vmul.f32 %v8263_v60, %v8316_v50  ;;  %v4727_v24 = vrot.slane %v4677_v0, 1 }
 0x244   : > { %v4592_v51 = vadd.f32 %v4541_v2, %v4467_v15  ;;  %v4729_v25 = vrot.slane %v4678_v29, 1  ;;  %v4802_v14 = vmul.f32 %v8263_v60, %v8325_v40  ;;  %v4803_v10 = vmul.f32 %v8263_v60, %v4612_v53 }
 0x245   : > { %v4593_v62 = vadd.f32 %v4543_v8, %v4468_v39  ;;  %v4851_v18 = vrot.slane %v4801_v1, 2  ;;  %v4953_v43 = vpack.c.bf16 %v5487_v20, %v5486_v33  ;;  %v4728_v7 = vsel %vm605_vm3, %v4726_v41, %v4727_v24 }
 0x246   : > { %v4654_v45 = vadd.f32 %v4638_v5, %v4592_v51  ;;  %v4730_v6 = vsel %vm605_vm3, %v4727_v24, %v4729_v25  ;;  %v4852_v35 = vrot.slane %v4802_v14, 2  ;;  %v4854_v17 = vrot.slane %v4803_v10, 2  ;;  %v8381_v10 = vld [vmem:[#allocation3 + $0x120] sm:$0xff] }
 0x247   : > { %v4655_v11 = vadd.f32 %v4639_v3, %v4593_v62  ;;  %5700 = vmatprep.mubr.msk.bf16.mxu0 %vm325_vm0, %v4953_v43  ;;  %v4033_v44 = vmul.f32 %v8177_v19, %v8247_v21  ;;  %v4034_v48 = vmul.f32 %v8177_v19, %v8258_v58  ;;  %v4056_v31 = vmul.f32 %v8017_v49, %v8247_v21 }
 0x248   : > { %v4779_v26 = vadd.f32 %v4728_v7, %v4654_v45  ;;  %v4057_v30 = vmul.f32 %v8017_v49, %v8258_v58  ;;  %v4853_v37 = vsel %vm731_vm4, %v4851_v18, %v4852_v35  ;;  %v4855_v13 = vsel %vm731_vm4, %v4852_v35, %v4854_v17  ;;  %v4615_v7 = vld [vmem:[#allocation3 + $0x130] sm:$0x3] }
 0x249   : > { %v4780_v27 = vadd.f32 %v4730_v6, %v4655_v11  ;;  %v4058_v38 = vmul.f32 %v8017_v49, %v4008_v22  ;;  %v4181_v4 = vmul.f32 %v8189_v47, %v8247_v21  ;;  %v4108_v32 = vrot.slane %v4056_v31, 1  ;;  %v8384_v11 = vld [vmem:[#allocation3 + $0x128] sm:$0xff] }
 0x24a   : > { %v4904_v46 = vadd.f32 %v4853_v37, %v4779_v26  ;;  %v4109_v56 = vrot.slane %v4057_v30, 1  ;;  %v4182_v63 = vmul.f32 %v8189_v47, %v8258_v58  ;;  %v4183_v53 = vmul.f32 %v8189_v47, %v4008_v22 }
 0x24b   : > { %v4905_v59 = vadd.f32 %v4855_v13, %v4780_v27  ;;  %v4111_v28 = vrot.slane %v4058_v38, 1  ;;  %v4233_v5 = vrot.slane %v4181_v4, 2  ;;  %v4328_v42 = vmul.f32 %v8204_v23, %v8316_v50  ;;  %v5488_v4 = vld [vmem:[%s6090_s23 + $0xb0] sm:$0xff] }
 0x24c   : > { %v4110_v55 = vsel %vm605_vm3, %v4108_v32, %v4109_v56  ;;  %v4329_v21 = vmul.f32 %v8204_v23, %v8325_v40  ;;  %v4234_v3 = vrot.slane %v4182_v63, 2  ;;  %v4236_v12 = vrot.slane %v4183_v53, 2 }
 0x24d   : > { %v4919_v54 = vpack.c.bf16 %v4905_v59, %v4904_v46  ;;  %v4112_v34 = vsel %vm605_vm3, %v4109_v56, %v4111_v28  ;;  %v4158_v36 = vadd.f32 %v4110_v55, %v4033_v44  ;;  %v4367_v15 = vmul.f32 %v8225_v16, %v8316_v50  ;;  %v5489_v46 = vld [vmem:[%s6090_s23 + $0xb8] sm:$0xff] }
 0x24e   : > { %v4159_v58 = vadd.f32 %v4112_v34, %v4034_v48  ;;  %v4368_v39 = vmul.f32 %v8225_v16, %v8325_v40  ;;  %v4369_v0 = vmul.f32 %v8225_v16, %v4303_v57  ;;  %v4235_v29 = vsel %vm731_vm4, %v4233_v5, %v4234_v3  ;;  %v4011_v34 = vld [vmem:[#allocation3 + $0x118] sm:$0x3] }
 0x24f   : > { %5721 = vmatmul.mubr.msk.bf16.vlgmr.msra.gmra.mxu1 %vm368_vm5, %v4919_v54  ;;  %v4237_v33 = vsel %vm731_vm4, %v4234_v3, %v4236_v12  ;;  %v4492_v20 = vmul.f32 %v8218_v9, %v8316_v50  ;;  %v4493_v2 = vmul.f32 %v8218_v9, %v8325_v40  ;;  %v4283_v8 = vadd.f32 %v4235_v29, %v4158_v36 }
 0x250   : > { %v4284_v41 = vadd.f32 %v4237_v33, %v4159_v58  ;;  %v4419_v1 = vrot.slane %v4367_v15, 1  ;;  %v4420_v51 = vrot.slane %v4368_v39, 1  ;;  %v4422_v62 = vrot.slane %v4369_v0, 1 }
 0x251   : > { %v4494_v24 = vmul.f32 %v8218_v9, %v4303_v57  ;;  %v4544_v25 = vrot.slane %v4492_v20, 2  ;;  %v4545_v14 = vrot.slane %v4493_v2, 2  ;;  %v4344_v18 = vadd.f32 %v4328_v42, %v4283_v8 }
 0x252   : > { %v4345_v43 = vadd.f32 %v4329_v21, %v4284_v41  ;;  %v4421_v45 = vsel %vm605_vm3, %v4419_v1, %v4420_v51  ;;  %v4640_v6 = vmul.f32 %v8240_v61, %v8381_v10  ;;  %v4423_v22 = vsel %vm605_vm3, %v4420_v51, %v4422_v62 }
 0x253   : > { %v4546_v35 = vsel %vm731_vm4, %v4544_v25, %v4545_v14  ;;  %v4547_v17 = vrot.slane %v4494_v24, 2  ;;  %v4641_v44 = vmul.f32 %v8240_v61, %v8384_v11  ;;  %v4469_v48 = vadd.f32 %v4421_v45, %v4344_v18 }
 0x254   : > { %v4470_v26 = vadd.f32 %v4423_v22, %v4345_v43  ;;  %v4679_v27 = vmul.f32 %v8252_v52, %v8381_v10  ;;  %v4680_v31 = vmul.f32 %v8252_v52, %v8384_v11  ;;  %v4681_v37 = vmul.f32 %v8252_v52, %v4615_v7 }
 0x255   : > { %v4548_v30 = vsel %vm731_vm4, %v4545_v14, %v4547_v17  ;;  %v4804_v13 = vmul.f32 %v8263_v60, %v8381_v10  ;;  %v4805_v38 = vmul.f32 %v8263_v60, %v8384_v11  ;;  %v4594_v59 = vadd.f32 %v4546_v35, %v4469_v48 }
 0x256   : > { %v4595_v32 = vadd.f32 %v4548_v30, %v4470_v26  ;;  %v4731_v56 = vrot.slane %v4679_v27, 1  ;;  %v4732_v28 = vrot.slane %v4680_v31, 1  ;;  %v4734_v63 = vrot.slane %v4681_v37, 1 }
 0x257   : > { %v4806_v53 = vmul.f32 %v8263_v60, %v4615_v7  ;;  %v4856_v5 = vrot.slane %v4804_v13, 2  ;;  %v4857_v57 = vrot.slane %v4805_v38, 2  ;;  %v4656_v54 = vadd.f32 %v4640_v6, %v4594_v59  ;;  %v4306_v7 = vld [vmem:[#allocation3 + $0x130] sm:$0x3]  ;;  %v8442_v59 = vld [vmem:[#allocation3 + $0x138] sm:$0xff] }
 0x258   : > { %v4657_v55 = vadd.f32 %v4641_v44, %v4595_v32  ;;  %v4733_v42 = vsel %vm605_vm3, %v4731_v56, %v4732_v28  ;;  %v4954_v21 = vpack.c.bf16 %v5489_v46, %v5488_v4  ;;  %v4735_v36 = vsel %vm605_vm3, %v4732_v28, %v4734_v63 }
 0x259   : > { %v4858_v3 = vsel %vm731_vm4, %v4856_v5, %v4857_v57  ;;  %v4859_v12 = vrot.slane %v4806_v53, 2  ;;  %v4035_v58 = vmul.f32 %v8177_v19, %v8316_v50  ;;  %v4781_v15 = vadd.f32 %v4733_v42, %v4656_v54  ;;  %v4618_v42 = vld [vmem:[#allocation3 + $0x148] sm:$0x3] }
 0x25a   : > { %v4782_v39 = vadd.f32 %v4735_v36, %v4657_v55  ;;  %5701 = vmatmul.mubr.msk.bf16.gmra.mxu0 %vm325_vm0, %v4954_v21  ;;  %v4036_v0 = vmul.f32 %v8177_v19, %v8325_v40  ;;  %v4059_v29 = vmul.f32 %v8017_v49, %v8316_v50  ;;  %v4060_v20 = vmul.f32 %v8017_v49, %v8325_v40  ;;  %v8448_v55 = vld [vmem:[#allocation3 + $0x140] sm:$0xff] }
 0x25b   : > { %v4860_v33 = vsel %vm731_vm4, %v4857_v57, %v4859_v12  ;;  %v4061_v2 = vmul.f32 %v8017_v49, %v4011_v34  ;;  %v4184_v8 = vmul.f32 %v8189_v47, %v8316_v50  ;;  %v4906_v41 = vadd.f32 %v4858_v3, %v4781_v15 }
 0x25c   : > { %v4907_v1 = vadd.f32 %v4860_v33, %v4782_v39  ;;  %v4113_v51 = vrot.slane %v4059_v29, 1  ;;  %v4185_v62 = vmul.f32 %v8189_v47, %v8325_v40  ;;  %v4114_v24 = vrot.slane %v4060_v20, 1  ;;  %v5491_v29 = vld [vmem:[%s6090_s23 + $0xc8] sm:$0xff] }
 0x25d   : > { %v4116_v25 = vrot.slane %v4061_v2, 1  ;;  %v4186_v14 = vmul.f32 %v8189_v47, %v4011_v34  ;;  %v4238_v18 = vrot.slane %v4184_v8, 2  ;;  %v4330_v49 = vmul.f32 %v8204_v23, %v8381_v10 }
 0x25e   : > { %v4920_v43 = vpack.c.bf16 %v4907_v1, %v4906_v41  ;;  %v4239_v45 = vrot.slane %v4185_v62, 2  ;;  %v4331_v50 = vmul.f32 %v8204_v23, %v8384_v11  ;;  %v4115_v6 = vsel %vm605_vm3, %v4113_v51, %v4114_v24 }
 0x25f   : > { %v4117_v22 = vsel %vm605_vm3, %v4114_v24, %v4116_v25  ;;  %v4241_v35 = vrot.slane %v4186_v14, 2  ;;  %v4370_v40 = vmul.f32 %v8225_v16, %v8381_v10  ;;  %v4160_v17 = vadd.f32 %v4115_v6, %v4035_v58 }
 0x260   : > { %5724 = vmatprep.mubr.msk.bf16.mxu1 %vm368_vm5, %v4920_v43  ;;  %v4161_v44 = vadd.f32 %v4117_v22, %v4036_v0  ;;  %v4240_v48 = vsel %vm731_vm4, %v4238_v18, %v4239_v45  ;;  %v4371_v26 = vmul.f32 %v8225_v16, %v8384_v11  ;;  %v4372_v31 = vmul.f32 %v8225_v16, %v4306_v7  ;;  %v5490_v0 = vld [vmem:[%s6090_s23 + $0xc0] sm:$0xff] }
 0x261   : > { %v4242_v27 = vsel %vm731_vm4, %v4239_v45, %v4241_v35  ;;  %v4424_v30 = vrot.slane %v4370_v40, 1  ;;  %v4495_v37 = vmul.f32 %v8218_v9, %v8381_v10  ;;  %v4285_v13 = vadd.f32 %v4240_v48, %v4160_v17 }
 0x262   : > { %v4286_v38 = vadd.f32 %v4242_v27, %v4161_v44  ;;  %v4425_v4 = vrot.slane %v4371_v26, 1  ;;  %v4496_v46 = vmul.f32 %v8218_v9, %v8384_v11  ;;  %v4427_v32 = vrot.slane %v4372_v31, 1  ;;  %v8478_v26 = vld [vmem:[%s8939_s4 + $0x1] ss:$0 sm:$0xff] }
 0x263   : > { %v4497_v56 = vmul.f32 %v8218_v9, %v4306_v7  ;;  %v4549_v28 = vrot.slane %v4495_v37, 2  ;;  %v4642_v63 = vmul.f32 %v8240_v61, %v8442_v59  ;;  %v4346_v53 = vadd.f32 %v4330_v49, %v4285_v13 }
 0x264   : > { %v4347_v5 = vadd.f32 %v4331_v50, %v4286_v38  ;;  %v4426_v57 = vsel %vm605_vm3, %v4424_v30, %v4425_v4  ;;  %v4550_v54 = vrot.slane %v4496_v46, 2  ;;  %v4428_v21 = vsel %vm605_vm3, %v4425_v4, %v4427_v32  ;;  %v4014_v50 = vld [vmem:[#allocation3 + $0x130] sm:$0x3] }
 0x265   : > { %v4552_v34 = vrot.slane %v4497_v56, 2  ;;  %v4643_v36 = vmul.f32 %v8240_v61, %v8448_v55  ;;  %v4682_v3 = vmul.f32 %v8252_v52, %v8442_v59  ;;  %v4471_v12 = vadd.f32 %v4426_v57, %v4346_v53 }
 0x266   : > { %v4472_v58 = vadd.f32 %v4428_v21, %v4347_v5  ;;  %v4551_v15 = vsel %vm731_vm4, %v4549_v28, %v4550_v54  ;;  %v4683_v39 = vmul.f32 %v8252_v52, %v8448_v55  ;;  %v4684_v20 = vmul.f32 %v8252_v52, %v4618_v42 }
 0x267   : > { %v4553_v33 = vsel %vm731_vm4, %v4550_v54, %v4552_v34  ;;  %v4736_v2 = vrot.slane %v4682_v3, 1  ;;  %v4807_v8 = vmul.f32 %v8263_v60, %v8442_v59  ;;  %v4596_v41 = vadd.f32 %v4551_v15, %v4471_v12  ;;  %v4309_v54 = vld [vmem:[#allocation3 + $0x148] sm:$0x3] }
 0x268   : > { %v4597_v1 = vadd.f32 %v4553_v33, %v4472_v58  ;;  %v4737_v51 = vrot.slane %v4683_v39, 1  ;;  %v4808_v62 = vmul.f32 %v8263_v60, %v8448_v55  ;;  %v4739_v24 = vrot.slane %v4684_v20, 1 }
 0x269   : > { %v4809_v25 = vmul.f32 %v8263_v60, %v4618_v42  ;;  %v4861_v14 = vrot.slane %v4807_v8, 2  ;;  %v4955_v18 = vpack.c.bf16 %v5491_v29, %v5490_v0  ;;  %v4658_v43 = vadd.f32 %v4642_v63, %v4596_v41 }
 0x26a   : > { %v4659_v45 = vadd.f32 %v4643_v36, %v4597_v1  ;;  %v4738_v7 = vsel %vm605_vm3, %v4736_v2, %v4737_v51  ;;  %v4862_v49 = vrot.slane %v4808_v62, 2  ;;  %v4740_v6 = vsel %vm605_vm3, %v4737_v51, %v4739_v24  ;;  %v8509_v1 = vld [vmem:[#allocation3 + $0x150] sm:$0xff] }
 0x26b   : > { %v4864_v22 = vrot.slane %v4809_v25, 2  ;;  %5704 = vmatprep.mubr.msk.bf16.mxu0 %vm325_vm0, %v4955_v18  ;;  %v4037_v35 = vmul.f32 %v8177_v19, %v8381_v10  ;;  %v4038_v40 = vmul.f32 %v8177_v19, %v8384_v11  ;;  %v4783_v17 = vadd.f32 %v4738_v7, %v4658_v43  ;;  %v8515_v7 = vld [vmem:[#allocation3 + $0x158] sm:$0xff] }
 0x26c   : > { %v4784_v44 = vadd.f32 %v4740_v6, %v4659_v45  ;;  %v4863_v48 = vsel %vm731_vm4, %v4861_v14, %v4862_v49  ;;  %v4062_v27 = vmul.f32 %v8478_v26, %v8381_v10  ;;  %v4063_v30 = vmul.f32 %v8478_v26, %v8384_v11 }
 0x26d   : > { %v4865_v31 = vsel %vm731_vm4, %v4862_v49, %v4864_v22  ;;  %v4064_v37 = vmul.f32 %v8478_v26, %v4014_v50  ;;  %v4187_v13 = vmul.f32 %v8189_v47, %v8381_v10  ;;  %v4908_v38 = vadd.f32 %v4863_v48, %v4783_v17  ;;  %v4621_v49 = vld [vmem:[#allocation3 + $0x160] sm:$0x3] }
 0x26e   : > { %v4909_v4 = vadd.f32 %v4865_v31, %v4784_v44  ;;  %v4118_v46 = vrot.slane %v4062_v27, 1  ;;  %v4188_v32 = vmul.f32 %v8189_v47, %v8384_v11  ;;  %v4119_v56 = vrot.slane %v4063_v30, 1  ;;  %v5492_v27 = vld [vmem:[%s6090_s23 + $0xd0] sm:$0xff]  ;;  %v5493_v31 = vld [vmem:[%s6090_s23 + $0xd8] sm:$0xff] }
 0x26f   : > { %v4121_v28 = vrot.slane %v4064_v37, 1  ;;  %v4189_v63 = vmul.f32 %v8189_v47, %v4014_v50  ;;  %v4243_v53 = vrot.slane %v4187_v13, 2  ;;  %v4332_v42 = vmul.f32 %v8204_v23, %v8442_v59 }
 0x270   : > { %v4921_v5 = vpack.c.bf16 %v4909_v4, %v4908_v38  ;;  %v4244_v57 = vrot.slane %v4188_v32, 2  ;;  %v4333_v10 = vmul.f32 %v8204_v23, %v8448_v55  ;;  %v4120_v21 = vsel %vm605_vm3, %v4118_v46, %v4119_v56 }
 0x271   : > { %v4122_v34 = vsel %vm605_vm3, %v4119_v56, %v4121_v28  ;;  %v4246_v36 = vrot.slane %v4189_v63, 2  ;;  %v4373_v11 = vmul.f32 %v8225_v16, %v8442_v59  ;;  %v4162_v3 = vadd.f32 %v4120_v21, %v4037_v35  ;;  %v4017_v21 = vld [vmem:[#allocation3 + $0x148] sm:$0x3] }
 0x272   : > { %5725 = vmatmul.mubr.msk.bf16.gmra.mxu1 %vm368_vm5, %v4921_v5  ;;  %v4163_v12 = vadd.f32 %v4122_v34, %v4038_v40  ;;  %v4245_v58 = vsel %vm731_vm4, %v4243_v53, %v4244_v57  ;;  %v4374_v15 = vmul.f32 %v8225_v16, %v8448_v55  ;;  %v4375_v0 = vmul.f32 %v8225_v16, %v4309_v54 }
 0x273   : > { %v4247_v39 = vsel %vm731_vm4, %v4244_v57, %v4246_v36  ;;  %v4429_v29 = vrot.slane %v4373_v11, 1  ;;  %v4498_v33 = vmul.f32 %v8218_v9, %v8442_v59  ;;  %v4287_v20 = vadd.f32 %v4245_v58, %v4162_v3 }
 0x274   : > { %v4288_v2 = vadd.f32 %v4247_v39, %v4163_v12  ;;  %v4430_v8 = vrot.slane %v4374_v15, 1  ;;  %v4499_v41 = vmul.f32 %v8218_v9, %v8448_v55  ;;  %v4432_v51 = vrot.slane %v4375_v0, 1 }
 0x275   : > { %v4500_v62 = vmul.f32 %v8218_v9, %v4309_v54  ;;  %v4554_v24 = vrot.slane %v4498_v33, 2  ;;  %v4644_v25 = vmul.f32 %v8240_v61, %v8509_v1  ;;  %v4348_v14 = vadd.f32 %v4332_v42, %v4287_v20 }
 0x276   : > { %v4349_v18 = vadd.f32 %v4333_v10, %v4288_v2  ;;  %v4431_v43 = vsel %vm605_vm3, %v4429_v29, %v4430_v8  ;;  %v4555_v45 = vrot.slane %v4499_v41, 2  ;;  %v4433_v50 = vsel %vm605_vm3, %v4430_v8, %v4432_v51 }
 0x277   : > { %v4557_v6 = vrot.slane %v4500_v62, 2  ;;  %v4645_v22 = vmul.f32 %v8240_v61, %v8515_v7  ;;  %v4685_v35 = vmul.f32 %v8252_v52, %v8509_v1  ;;  %v4473_v40 = vadd.f32 %v4431_v43, %v4348_v14  ;;  %v4312_v43 = vld [vmem:[#allocation3 + $0x160] sm:$0x3] }
 0x278   : > { %v4474_v17 = vadd.f32 %v4433_v50, %v4349_v18  ;;  %v4556_v44 = vsel %vm731_vm4, %v4554_v24, %v4555_v45  ;;  %v4686_v48 = vmul.f32 %v8252_v52, %v8515_v7  ;;  %v4687_v37 = vmul.f32 %v8252_v52, %v4621_v49 }
 0x279   : > { %v4558_v30 = vsel %vm731_vm4, %v4555_v45, %v4557_v6  ;;  %v4741_v13 = vrot.slane %v4685_v35, 1  ;;  %v4810_v38 = vmul.f32 %v8263_v60, %v8509_v1  ;;  %v4598_v4 = vadd.f32 %v4556_v44, %v4473_v40 }
 0x27a   : > { %v4599_v46 = vadd.f32 %v4558_v30, %v4474_v17  ;;  %v4742_v32 = vrot.slane %v4686_v48, 1  ;;  %v4811_v56 = vmul.f32 %v8263_v60, %v8515_v7  ;;  %v4744_v28 = vrot.slane %v4687_v37, 1 }
 0x27b   : > { %v4812_v63 = vmul.f32 %v8263_v60, %v4621_v49  ;;  %v4866_v53 = vrot.slane %v4810_v38, 2  ;;  %v4956_v5 = vpack.c.bf16 %v5493_v31, %v5492_v27  ;;  %v4660_v57 = vadd.f32 %v4644_v25, %v4598_v4 }
 0x27c   : > { %v4661_v54 = vadd.f32 %v4645_v22, %v4599_v46  ;;  %v4743_v42 = vsel %vm605_vm3, %v4741_v13, %v4742_v32  ;;  %v4867_v10 = vrot.slane %v4811_v56, 2  ;;  %v4745_v34 = vsel %vm605_vm3, %v4742_v32, %v4744_v28  ;;  %v8571_v13 = vld [vmem:[#allocation3 + $0x168] sm:$0xff] }
 0x27d   : > { %v4869_v36 = vrot.slane %v4812_v63, 2  ;;  %5705 = vmatmul.mubr.msk.bf16.gmra.mxu0 %vm325_vm0, %v4956_v5  ;;  %v4039_v11 = vmul.f32 %v8177_v19, %v8442_v59  ;;  %v4040_v3 = vmul.f32 %v8177_v19, %v8448_v55  ;;  %v4785_v12 = vadd.f32 %v4743_v42, %v4660_v57  ;;  %v8577_v5 = vld [vmem:[#allocation3 + $0x170] sm:$0xff]  ;;  %v4624_v57 = vld [vmem:[#allocation3 + $0x178] sm:$0x3] }
 0x27e   : > { %v4786_v58 = vadd.f32 %v4745_v34, %v4661_v54  ;;  %v4868_v15 = vsel %vm731_vm4, %v4866_v53, %v4867_v10  ;;  %v4065_v39 = vmul.f32 %v8478_v26, %v8442_v59  ;;  %v4066_v29 = vmul.f32 %v8478_v26, %v8448_v55 }
 0x27f   : > { %v4870_v0 = vsel %vm731_vm4, %v4867_v10, %v4869_v36  ;;  %v4067_v33 = vmul.f32 %v8478_v26, %v4017_v21  ;;  %v4190_v20 = vmul.f32 %v8189_v47, %v8442_v59  ;;  %v4910_v2 = vadd.f32 %v4868_v15, %v4785_v12  ;;  %v5495_v12 = vld [vmem:[%s6090_s23 + $0xe8] sm:$0xff] }
 0x280   : > { %v4911_v8 = vadd.f32 %v4870_v0, %v4786_v58  ;;  %v4123_v19 = vrot.slane %v4065_v39, 1  ;;  %v4191_v41 = vmul.f32 %v8189_v47, %v8448_v55  ;;  %v4124_v51 = vrot.slane %v4066_v29, 1 }
 0x281   : > { %v4126_v62 = vrot.slane %v4067_v33, 1  ;;  %v4192_v24 = vmul.f32 %v8189_v47, %v4017_v21  ;;  %v4248_v25 = vrot.slane %v4190_v20, 2  ;;  %v4334_v45 = vmul.f32 %v8204_v23, %v8509_v1 }
 0x282   : > { %v4922_v14 = vpack.c.bf16 %v4911_v8, %v4910_v2  ;;  %v4249_v18 = vrot.slane %v4191_v41, 2  ;;  %v4335_v59 = vmul.f32 %v8204_v23, %v8515_v7  ;;  %v4125_v49 = vsel %vm605_vm3, %v4123_v19, %v4124_v51 }
 0x283   : > { %v4127_v50 = vsel %vm605_vm3, %v4124_v51, %v4126_v62  ;;  %v4251_v6 = vrot.slane %v4192_v24, 2  ;;  %v4376_v55 = vmul.f32 %v8225_v16, %v8509_v1  ;;  %v4164_v47 = vadd.f32 %v4125_v49, %v4039_v11 }
 0x284   : > { %5728 = vmatprep.mubr.msk.bf16.mxu1 %vm368_vm5, %v4922_v14  ;;  %v4165_v22 = vadd.f32 %v4127_v50, %v4040_v3  ;;  %v4250_v35 = vsel %vm731_vm4, %v4248_v25, %v4249_v18  ;;  %v4377_v40 = vmul.f32 %v8225_v16, %v8515_v7  ;;  %v4378_v23 = vmul.f32 %v8225_v16, %v4312_v43  ;;  %v5494_v3 = vld [vmem:[%s6090_s23 + $0xe0] sm:$0xff]  ;;  %v4020_v14 = vld [vmem:[#allocation3 + $0x160] sm:$0x3] }
 0x285   : > { %v4252_v17 = vsel %vm731_vm4, %v4249_v18, %v4251_v6  ;;  %v4434_v44 = vrot.slane %v4376_v55, 1  ;;  %v4501_v48 = vmul.f32 %v8218_v9, %v8509_v1  ;;  %v4289_v27 = vadd.f32 %v4250_v35, %v4164_v47 }
 0x286   : > { %v4290_v31 = vadd.f32 %v4252_v17, %v4165_v22  ;;  %v4435_v30 = vrot.slane %v4377_v40, 1  ;;  %v4502_v37 = vmul.f32 %v8218_v9, %v8515_v7  ;;  %v4437_v38 = vrot.slane %v4378_v23, 1  ;;  %v8618_v17 = vld [vmem:[%s8939_s4 + $0x2] ss:$0 sm:$0xff] }
 0x287   : > { %v4503_v4 = vmul.f32 %v8218_v9, %v4312_v43  ;;  %v4559_v46 = vrot.slane %v4501_v48, 2  ;;  %v4646_v32 = vmul.f32 %v8240_v61, %v8571_v13  ;;  %v4350_v56 = vadd.f32 %v4334_v45, %v4289_v27  ;;  %v8602_v45 = vld [vmem:[%s8939_s4] ss:$0 sm:$0xff] }
 0x288   : > { %v4351_v28 = vadd.f32 %v4335_v59, %v4290_v31  ;;  %v4436_v63 = vsel %vm605_vm3, %v4434_v44, %v4435_v30  ;;  %v4560_v53 = vrot.slane %v4502_v37, 2  ;;  %v4438_v54 = vsel %vm605_vm3, %v4435_v30, %v4437_v38 }
 0x289   : > { %v4562_v42 = vrot.slane %v4503_v4, 2  ;;  %v4647_v9 = vmul.f32 %v8240_v61, %v8577_v5  ;;  %v4688_v10 = vmul.f32 %v8252_v52, %v8571_v13  ;;  %v4475_v21 = vadd.f32 %v4436_v63, %v4350_v56  ;;  %v4315_v56 = vld [vmem:[#allocation3 + $0x178] sm:$0x3] }
 0x28a   : > { %v4476_v34 = vadd.f32 %v4438_v54, %v4351_v28  ;;  %v4561_v36 = vsel %vm731_vm4, %v4559_v46, %v4560_v53  ;;  %v4689_v11 = vmul.f32 %v8252_v52, %v8577_v5  ;;  %v4690_v15 = vmul.f32 %v8252_v52, %v4624_v57  ;;  %v8628_v28 = vld [vmem:[%s8939_s4 + $0x4] ss:$0 sm:$0xff] }
 0x28b   : > { %v4563_v58 = vsel %vm731_vm4, %v4560_v53, %v4562_v42  ;;  %v4746_v39 = vrot.slane %v4688_v10, 1  ;;  %v4813_v61 = vmul.f32 %v8263_v60, %v8571_v13  ;;  %v4600_v0 = vadd.f32 %v4561_v36, %v4475_v21 }
 0x28c   : > { %v4601_v29 = vadd.f32 %v4563_v58, %v4476_v34  ;;  %v4747_v33 = vrot.slane %v4689_v11, 1  ;;  %v4814_v20 = vmul.f32 %v8263_v60, %v8577_v5  ;;  %v4749_v2 = vrot.slane %v4690_v15, 1  ;;  %v8642_v34 = vld [vmem:[#allocation3 + $0x180] sm:$0xff]  ;;  %v8648_v11 = vld [vmem:[%s8939_s4 + $0x5] ss:$0 sm:$0xff] }
 0x28d   : > { %v4815_v8 = vmul.f32 %v8263_v60, %v4624_v57  ;;  %v4871_v19 = vrot.slane %v4813_v61, 2  ;;  %v4957_v41 = vpack.c.bf16 %v5495_v12, %v5494_v3  ;;  %v4662_v51 = vadd.f32 %v4646_v32, %v4600_v0  ;;  %v8654_v58 = vld [vmem:[%s8939_s4 + $0x6] ss:$0 sm:$0xff] }
 0x28e   : > { %v4663_v62 = vadd.f32 %v4647_v9, %v4601_v29  ;;  %v4748_v24 = vsel %vm605_vm3, %v4746_v39, %v4747_v33  ;;  %v4872_v25 = vrot.slane %v4814_v20, 2  ;;  %v4750_v18 = vsel %vm605_vm3, %v4747_v33, %v4749_v2  ;;  %v8660_v29 = vld [vmem:[#allocation3 + $0x188] sm:$0xff]  ;;  %v8662_v33 = vpop.f32.mrf.mxu1 }
 0x28f   : > { %v4874_v43 = vrot.slane %v4815_v8, 2  ;;  %5708 = vmatprep.mubr.msk.bf16.mxu0 %vm325_vm0, %v4957_v41  ;;  %v4041_v59 = vmul.f32 %v8602_v45, %v8509_v1  ;;  %v4042_v49 = vmul.f32 %v8602_v45, %v8515_v7  ;;  %v4787_v50 = vadd.f32 %v4748_v24, %v4662_v51 }
 0x290   : > { %v4788_v6 = vadd.f32 %v4750_v18, %v4663_v62  ;;  %v4873_v55 = vsel %vm731_vm4, %v4871_v19, %v4872_v25  ;;  %v4068_v47 = vmul.f32 %v8478_v26, %v8509_v1  ;;  %v4069_v35 = vmul.f32 %v8478_v26, %v8515_v7  ;;  %v8668_v19 = vld [vmem:[%s8939_s4 + $0x8] ss:$0 sm:$0xff]  ;;  %v8673_v18 = vpop.f32.mrf.mxu0 }
 0x291   : > { %v4875_v22 = vsel %vm731_vm4, %v4872_v25, %v4874_v43  ;;  %v4070_v40 = vmul.f32 %v8478_v26, %v4020_v14  ;;  %v4193_v23 = vmul.f32 %v8618_v17, %v8509_v1  ;;  %v4912_v44 = vadd.f32 %v4873_v55, %v4787_v50 }
 0x292   : > { %v4913_v48 = vadd.f32 %v4875_v22, %v4788_v6  ;;  %v4128_v27 = vrot.slane %v4068_v47, 1  ;;  %v4194_v31 = vmul.f32 %v8618_v17, %v8515_v7  ;;  %v4129_v30 = vrot.slane %v4069_v35, 1  ;;  %v8684_v22 = vld [vmem:[%s8939_s4 + $0x9] ss:$0 sm:$0xff] }
 0x293   : > { %v4131_v37 = vrot.slane %v4070_v40, 1  ;;  %v4195_v38 = vmul.f32 %v8618_v17, %v4020_v14  ;;  %v4253_v4 = vrot.slane %v4193_v23, 2  ;;  %v4336_v1 = vmul.f32 %v8628_v28, %v8571_v13  ;;  %v4627_v14 = vld [vmem:[#allocation3 + $0x190] sm:$0x3]  ;;  %v5496_v40 = vld [vmem:[%s6090_s23 + $0xf0] sm:$0xff]  ;;  %v5497_v23 = vld [vmem:[%s6090_s23 + $0xf8] sm:$0xff] }
 0x294   : > { %v4923_v46 = vpack.c.bf16 %v4913_v48, %v4912_v44  ;;  %v4254_v32 = vrot.slane %v4194_v31, 2  ;;  %v4337_v63 = vmul.f32 %v8628_v28, %v8577_v5  ;;  %v4130_v7 = vsel %vm605_vm3, %v4128_v27, %v4129_v30  ;;  %v8690_v44 = vpop.f32.mrf.mxu1 }
 0x295   : > { %v4132_v53 = vsel %vm605_vm3, %v4129_v30, %v4131_v37  ;;  %v4256_v57 = vrot.slane %v4195_v38, 2  ;;  %v4379_v54 = vmul.f32 %v8225_v16, %v8571_v13  ;;  %v4166_v42 = vadd.f32 %v4130_v7, %v4041_v59 }
 0x296   : > { %5729 = vmatmul.mubr.msk.bf16.gmra.mxu1 %vm368_vm5, %v4923_v46  ;;  %v4167_v9 = vadd.f32 %v4132_v53, %v4042_v49  ;;  %v4255_v10 = vsel %vm731_vm4, %v4253_v4, %v4254_v32  ;;  %v4380_v21 = vmul.f32 %v8225_v16, %v8577_v5  ;;  %v4381_v3 = vmul.f32 %v8648_v11, %v4315_v56  ;;  %v8699_v4 = vld [vmem:[%s8939_s4 + $0xa] ss:$0 sm:$0xff] }
 0x297   : > { %v4257_v36 = vsel %vm731_vm4, %v4254_v32, %v4256_v57  ;;  %v4439_v12 = vrot.slane %v4379_v54, 1  ;;  %v4504_v16 = vmul.f32 %v8654_v58, %v8571_v13  ;;  %v4291_v15 = vadd.f32 %v4255_v10, %v4166_v42  ;;  %v8703_v32 = vpop.f32.mrf.mxu0  ;;  %v4023_v42 = vld [vmem:[#allocation3 + $0x178] sm:$0x3] }
 0x298   : > { %v4292_v39 = vadd.f32 %v4257_v36, %v4167_v9  ;;  %v4440_v61 = vrot.slane %v4380_v21, 1  ;;  %v4505_v0 = vmul.f32 %v8654_v58, %v8577_v5  ;;  %v4442_v20 = vrot.slane %v4381_v3, 1  ;;  %v8707_v9 = vpop.f32.mrf.mxu1 }
 0x299   : > { %v4506_v2 = vmul.f32 %v8654_v58, %v4315_v56  ;;  %v4564_v8 = vrot.slane %v4504_v16, 2  ;;  %v4648_v41 = vmul.f32 %v8668_v19, %v8642_v34  ;;  %v4352_v51 = vadd.f32 %v4336_v1, %v4291_v15 }
 0x29a   : > { %v4353_v62 = vadd.f32 %v4337_v63, %v4292_v39  ;;  %v4441_v24 = vsel %vm605_vm3, %v4439_v12, %v4440_v61  ;;  %v4565_v25 = vrot.slane %v4505_v0, 2  ;;  %v4443_v43 = vsel %vm605_vm3, %v4440_v61, %v4442_v20  ;;  %v8718_v61 = vpop.f32.mrf.mxu0 }
 0x29b   : > { %v4567_v59 = vrot.slane %v4506_v2, 2  ;;  %v4649_v49 = vmul.f32 %v8668_v19, %v8660_v29  ;;  %v4691_v50 = vmul.f32 %v8252_v52, %v8642_v34  ;;  %v4477_v6 = vadd.f32 %v4441_v24, %v4352_v51  ;;  %v8728_v24 = vpop.f32.mrf.mxu1 }
 0x29c   : > { %v4478_v55 = vadd.f32 %v4443_v43, %v4353_v62  ;;  %v4566_v47 = vsel %vm731_vm4, %v4564_v8, %v4565_v25  ;;  %v4692_v35 = vmul.f32 %v8684_v22, %v8660_v29  ;;  %v4693_v52 = vmul.f32 %v8684_v22, %v4627_v14 }
 0x29d   : > { %v4568_v48 = vsel %vm731_vm4, %v4565_v25, %v4567_v59  ;;  %v4751_v27 = vrot.slane %v4691_v50, 1  ;;  %v4816_v31 = vmul.f32 %v8263_v60, %v8642_v34  ;;  %v4602_v30 = vadd.f32 %v4566_v47, %v4477_v6  ;;  %v4318_v6 = vld [vmem:[#allocation3 + $0x190] sm:$0x3] }
 0x29e   : > { %v4603_v37 = vadd.f32 %v4568_v48, %v4478_v55  ;;  %v4752_v38 = vrot.slane %v4692_v35, 1  ;;  %v4817_v46 = vmul.f32 %v8699_v4, %v8660_v29  ;;  %v4754_v56 = vrot.slane %v4693_v52, 1  ;;  %v8735_v55 = vpop.f32.mrf.mxu0 }
 0x29f   : > { %v4818_v1 = vmul.f32 %v8699_v4, %v4627_v14  ;;  %v4876_v63 = vrot.slane %v4816_v31, 2  ;;  %v4958_v7 = vpack.c.bf16 %v5497_v23, %v5496_v40  ;;  %v4664_v53 = vadd.f32 %v4648_v41, %v4602_v30 }
 0x2a0   : > { %v4665_v60 = vadd.f32 %v4649_v49, %v4603_v37  ;;  %v4753_v57 = vsel %vm605_vm3, %v4751_v27, %v4752_v38  ;;  %v4877_v54 = vrot.slane %v4817_v46, 2  ;;  %v4755_v10 = vsel %vm605_vm3, %v4752_v38, %v4754_v56 }
 0x2a1   : > { %v4879_v21 = vrot.slane %v4818_v1, 2  ;;  %5709 = vmatmul.mubr.msk.bf16.gmra.mxu0 %vm325_vm0, %v4958_v7  ;;  %v4043_v36 = vmul.f32 %v8602_v45, %v8571_v13  ;;  %v4044_v3 = vmul.f32 %v8602_v45, %v8577_v5  ;;  %v4789_v12 = vadd.f32 %v4753_v57, %v4664_v53  ;;  %v4629_v7 = vld [vmem:[#allocation3 + $0x1a0] sm:$0xff]  ;;  %v5658_v53 = vpop.f32.mrf.mxu0 }
 0x2a2   : > { %v4790_v16 = vadd.f32 %v4755_v10, %v4665_v60  ;;  %v4878_v15 = vsel %vm731_vm4, %v4876_v63, %v4877_v54  ;;  %v4071_v39 = vmul.f32 %v8478_v26, %v8571_v13  ;;  %v4072_v20 = vmul.f32 %v8478_v26, %v8577_v5 }
 0x2a3   : > { %v4880_v0 = vsel %vm731_vm4, %v4877_v54, %v4879_v21  ;;  %v4073_v2 = vmul.f32 %v8478_v26, %v4023_v42  ;;  %v4196_v8 = vmul.f32 %v8618_v17, %v8571_v13  ;;  %v4914_v45 = vadd.f32 %v4878_v15, %v4789_v12  ;;  %v8745_v27 = vpop.f32.mrf.mxu1 }
 0x2a4   : > { %v4915_v41 = vadd.f32 %v4880_v0, %v4790_v16  ;;  %v4133_v51 = vrot.slane %v4071_v39, 1  ;;  %v4197_v62 = vmul.f32 %v8618_v17, %v8577_v5  ;;  %v4134_v25 = vrot.slane %v4072_v20, 1 }
 0x2a5   : > { %v4136_v14 = vrot.slane %v4073_v2, 1  ;;  %v4198_v43 = vmul.f32 %v8618_v17, %v4023_v42  ;;  %v4258_v59 = vrot.slane %v4196_v8, 2  ;;  %v4338_v26 = vmul.f32 %v8628_v28, %v8642_v34  ;;  %v3768_v2 = vpop.f32.mrf.mxu0 }
 0x2a6   : > { %v4924_v49 = vpack.c.bf16 %v4915_v41, %v4914_v45  ;;  %v4259_v50 = vrot.slane %v4197_v62, 2  ;;  %v4339_v13 = vmul.f32 %v8628_v28, %v8660_v29  ;;  %v4135_v5 = vsel %vm605_vm3, %v4133_v51, %v4134_v25  ;;  %v4628_v28 = vld [vmem:[#allocation3 + $0x198] sm:$0xff] }
 0x2a7   : > { %v4137_v47 = vsel %vm605_vm3, %v4134_v25, %v4136_v14  ;;  %v4261_v35 = vrot.slane %v4198_v43, 2  ;;  %v4382_v17 = vmul.f32 %v8648_v11, %v8642_v34  ;;  %v4168_v40 = vadd.f32 %v4135_v5, %v4043_v36  ;;  %v8768_v43 = vld [vmem:[%s8942_s7] ss:$0 sm:$0xff] }
 0x2a8   : > { %5732 = vmatprep.mubr.msk.bf16.mxu1 %vm368_vm5, %v4924_v49  ;;  %v4169_v23 = vadd.f32 %v4137_v47, %v4044_v3  ;;  %v4260_v48 = vsel %vm731_vm4, %v4258_v59, %v4259_v50  ;;  %v4383_v52 = vmul.f32 %v8648_v11, %v8660_v29  ;;  %v4384_v30 = vmul.f32 %v8648_v11, %v4318_v6  ;;  %v3913_v3 = vpop.f32.mrf.mxu1 }
 0x2a9   : > { %v4262_v31 = vsel %vm731_vm4, %v4259_v50, %v4261_v35  ;;  %v4444_v37 = vrot.slane %v4382_v17, 1  ;;  %v4507_v38 = vmul.f32 %v8654_v58, %v8642_v34  ;;  %v4293_v46 = vadd.f32 %v4260_v48, %v4168_v40  ;;  %v4630_v34 = vld [vmem:[#allocation3 + $0x1a8] sm:$0x3]  ;;  %v5659_v35 = vpop.f32.mrf.mxu0 }
 0x2aa   : > { %v4294_v56 = vadd.f32 %v4262_v31, %v4169_v23  ;;  %v4445_v1 = vrot.slane %v4383_v52, 1  ;;  %v4508_v63 = vmul.f32 %v8654_v58, %v8660_v29  ;;  %v4447_v60 = vrot.slane %v4384_v30, 1  ;;  %v5683_v59 = vpop.f32.mrf.mxu1 }
 0x2ab   : > { %v4509_v57 = vmul.f32 %v8654_v58, %v4318_v6  ;;  %v4569_v54 = vrot.slane %v4507_v38, 2  ;;  %v4650_v42 = vmul.f32 %v8668_v19, %v4628_v28  ;;  %v4354_v10 = vadd.f32 %v4338_v26, %v4293_v46  ;;  %v3771_v38 = vpop.f32.mrf.mxu0 }
 0x2ac   : > { %v4355_v11 = vadd.f32 %v4339_v13, %v4294_v56  ;;  %v4446_v21 = vsel %vm605_vm3, %v4444_v37, %v4445_v1  ;;  %v4570_v36 = vrot.slane %v4508_v63, 2  ;;  %v4448_v12 = vsel %vm605_vm3, %v4445_v1, %v4447_v60 }
 0x2ad   : > { %v4572_v16 = vrot.slane %v4509_v57, 2  ;;  %v4651_v29 = vmul.f32 %v8668_v19, %v4629_v7  ;;  %v4694_v15 = vmul.f32 %v8684_v22, %v4628_v28  ;;  %v4479_v39 = vadd.f32 %v4446_v21, %v4354_v10  ;;  %v5662_v60 = vpop.f32.mrf.mxu0 }
 0x2ae   : > { %v4480_v0 = vadd.f32 %v4448_v12, %v4355_v11  ;;  %v4571_v58 = vsel %vm731_vm4, %v4569_v54, %v4570_v36  ;;  %v4695_v20 = vmul.f32 %v8684_v22, %v4629_v7  ;;  %v4696_v45 = vmul.f32 %v8684_v22, %v4630_v34 }
 0x2af   : > { %v4573_v8 = vsel %vm731_vm4, %v4570_v36, %v4572_v16  ;;  %v4756_v41 = vrot.slane %v4694_v15, 1  ;;  %v4819_v51 = vmul.f32 %v8699_v4, %v4628_v28  ;;  %v4604_v62 = vadd.f32 %v4571_v58, %v4479_v39  ;;  %v3784_v57 = vpop.f32.mrf.mxu0 }
 0x2b0   : > { %v4605_v25 = vadd.f32 %v4573_v8, %v4480_v0  ;;  %v4757_v14 = vrot.slane %v4695_v20, 1  ;;  %v4820_v19 = vmul.f32 %v8699_v4, %v4629_v7  ;;  %v4759_v49 = vrot.slane %v4696_v45, 1 }
 0x2b1   : > { %v4821_v50 = vmul.f32 %v8699_v4, %v4630_v34  ;;  %v4881_v6 = vrot.slane %v4819_v51, 2  ;;  %v3906_v22 = vadd.f32 %v8662_v33, %v8673_v18  ;;  %v4666_v26 = vadd.f32 %v4650_v42, %v4604_v62  ;;  %v3916_v18 = vpop.f32.mrf.mxu1  ;;  %v5663_v10 = vpop.f32.mrf.mxu0 }
 0x2b2   : > { %v4667_v13 = vadd.f32 %v4651_v29, %v4605_v25  ;;  %v4758_v5 = vsel %vm605_vm3, %v4756_v41, %v4757_v14  ;;  %v4882_v47 = vrot.slane %v4820_v19, 2  ;;  %v4760_v17 = vsel %vm605_vm3, %v4757_v14, %v4759_v49 }
 0x2b3   : > { %v4884_v40 = vrot.slane %v4821_v50, 2  ;;  %v3969_v23 = vadd.f32 %v8768_v43, %v3906_v22  ;;  %v3898_v48 = vadd.f32 %v8690_v44, %v8703_v32  ;;  %v4791_v4 = vadd.f32 %v4758_v5, %v4666_v26  ;;  %v3787_v16 = vpop.f32.mrf.mxu0 }
 0x2b4   : > { %v4792_v52 = vadd.f32 %v4760_v17, %v4667_v13  ;;  %v4883_v28 = vsel %vm731_vm4, %v4881_v6, %v4882_v47  ;;  %v3909_v33 = vadd.f32 %v8707_v9, %v8718_v61  ;;  %v3901_v32 = vadd.f32 %v8728_v24, %v8735_v55 }
 0x2b5   : > { %v4885_v31 = vsel %vm731_vm4, %v4882_v47, %v4884_v40  ;;  %3985 = vst.msk [vmem:[%s8784_s10 + $0x10] sm:$0xff] %vm368_vm5, %v3969_v23  ;;  %v3967_v44 = vadd.f32 %v8768_v43, %v3898_v48  ;;  %v3922_v9 = vadd.f32 %v8745_v27, %v5658_v53  ;;  %v4916_v61 = vadd.f32 %v4883_v28, %v4791_v4 }
 0x2b6   : > { %v4917_v30 = vadd.f32 %v4885_v31, %v4792_v52  ;;  %v3970_v37 = vadd.f32 %v8768_v43, %v3909_v33  ;;  %v3914_v46 = vadd.f32 %v3913_v3, %v3768_v2  ;;  %v3968_v56 = vadd.f32 %v8768_v43, %v3901_v32 }
 0x2b7   : > { %3983 = vst.msk [vmem:[%s8784_s10] sm:$0xff] %vm368_vm5, %v3967_v44  ;;  %v3973_v1 = vadd.f32 %v8768_v43, %v3922_v9  ;;  %v3925_v63 = vadd.f32 %v5683_v59, %v5659_v35  ;;  %v3917_v24 = vadd.f32 %v3916_v18, %v3771_v38 }
 0x2b8   : > { %v4925_v55 = vpack.c.bf16 %v4917_v30, %v4916_v61  ;;  %3986 = vst.msk [vmem:[%s8784_s10 + $0x18] sm:$0xff] %vm368_vm5, %v3970_v37  ;;  %v3971_v27 = vadd.f32 %v8768_v43, %v3914_v46  ;;  %3984 = vst.msk [vmem:[%s8784_s10 + $0x8] sm:$0xff] %vm368_vm5, %v3968_v56 }
 0x2b9   : > { %3989 = vst.msk [vmem:[%s8784_s10 + $0x30] sm:$0xff] %vm368_vm5, %v3973_v1  ;;  %v3974_v7 = vadd.f32 %v8768_v43, %v3925_v63  ;;  %v3972_v53 = vadd.f32 %v8768_v43, %v3917_v24 }
 0x2ba   : > { %5733 = vmatmul.mubr.msk.bf16.gmra.mxu1 %vm368_vm5, %v4925_v55  ;;  %3987 = vst.msk [vmem:[%s8784_s10 + $0x20] sm:$0xff] %vm368_vm5, %v3971_v27 }
 0x2bb   : > { %3990 = vst.msk [vmem:[%s8784_s10 + $0x38] sm:$0xff] %vm368_vm5, %v3974_v7  ;;  %3988 = vst.msk [vmem:[%s8784_s10 + $0x28] sm:$0xff] %vm368_vm5, %v3972_v53 }
 0x2bd   : > { %v5666_v58 = vpop.f32.mrf.mxu0 }
 0x2bf   : > { %v3800_v20 = vpop.f32.mrf.mxu0 }
 0x2c1   : > { %v5667_v45 = vpop.f32.mrf.mxu0 }
 0x2c3   : > { %v5686_v54 = vpop.f32.mrf.mxu1  ;;  %v3803_v59 = vpop.f32.mrf.mxu0 }
 0x2c4   : > { %v3938_v42 = vadd.f32 %v5686_v54, %v5662_v60 }
 0x2c5   : > { %v3929_v11 = vpop.f32.mrf.mxu1 }
 0x2c6   : > { %v3977_v21 = vadd.f32 %v8768_v43, %v3938_v42  ;;  %v3930_v36 = vadd.f32 %v3929_v11, %v3784_v57 }
 0x2c7   : > { %v5687_v34 = vpop.f32.mrf.mxu1 }
 0x2c8   : > { %3993 = vst.msk [vmem:[%s8784_s10 + $0x50] sm:$0xff] %vm368_vm5, %v3977_v21  ;;  %v3975_v3 = vadd.f32 %v8768_v43, %v3930_v36  ;;  %v3941_v12 = vadd.f32 %v5687_v34, %v5663_v10 }
 0x2c9   : > { %v3932_v29 = vpop.f32.mrf.mxu1 }
 0x2ca   : > { %3991 = vst.msk [vmem:[%s8784_s10 + $0x40] sm:$0xff] %vm368_vm5, %v3975_v3  ;;  %v3978_v15 = vadd.f32 %v8768_v43, %v3941_v12  ;;  %v3933_v39 = vadd.f32 %v3932_v29, %v3787_v16 }
 0x2cc   : > { %3994 = vst.msk [vmem:[%s8784_s10 + $0x58] sm:$0xff] %vm368_vm5, %v3978_v15  ;;  %v3976_v0 = vadd.f32 %v8768_v43, %v3933_v39 }
 0x2ce   : > { %3992 = vst.msk [vmem:[%s8784_s10 + $0x48] sm:$0xff] %vm368_vm5, %v3976_v0 }
 0x2e9   : > { %v5690_v2 = vpop.f32.mrf.mxu1 }
 0x2ea   : > { %v3954_v8 = vadd.f32 %v5690_v2, %v5666_v58 }
 0x2eb   : > { %v3945_v41 = vpop.f32.mrf.mxu1 }
 0x2ec   : > { %v3981_v51 = vadd.f32 %v8768_v43, %v3954_v8  ;;  %v3946_v62 = vadd.f32 %v3945_v41, %v3800_v20 }
 0x2ed   : > { %v5691_v25 = vpop.f32.mrf.mxu1 }
 0x2ee   : > { %3997 = vst.msk [vmem:[%s8784_s10 + $0x70] sm:$0xff] %vm368_vm5, %v3981_v51  ;;  %v3979_v14 = vadd.f32 %v8768_v43, %v3946_v62  ;;  %v3957_v19 = vadd.f32 %v5691_v25, %v5667_v45 }
 0x2ef   : > { %v3948_v49 = vpop.f32.mrf.mxu1 }
 0x2f0   : > { %3995 = vst.msk [vmem:[%s8784_s10 + $0x60] sm:$0xff] %vm368_vm5, %v3979_v14  ;;  %v3982_v50 = vadd.f32 %v8768_v43, %v3957_v19  ;;  %v3949_v6 = vadd.f32 %v3948_v49, %v3803_v59 }
 0x2f2   : > { %3998 = vst.msk [vmem:[%s8784_s10 + $0x78] sm:$0xff] %vm368_vm5, %v3982_v50  ;;  %v3980_v22 = vadd.f32 %v8768_v43, %v3949_v6 }
 0x2f4   : > { %3996 = vst.msk [vmem:[%s8784_s10 + $0x68] sm:$0xff] %vm368_vm5, %v3980_v22  ;;  %v5698_v26 = vpop.f32.mrf.mxu0 }
 0x2f6   : > { %v5033_v13 = vpop.f32.mrf.mxu0 }
 0x2f8   : > { %v5699_v35 = vpop.f32.mrf.mxu0 }
 0x2fa   : > { %v5036_v28 = vpop.f32.mrf.mxu0 }
 0x30f   : > { %v5722_v5 = vpop.f32.mrf.mxu1 }
 0x310   : > { %v5187_v47 = vadd.f32 %v5722_v5, %v5698_v26 }
 0x311   : > { %v5178_v17 = vpop.f32.mrf.mxu1 }
 0x312   : > { %v5250_v40 = vadd.f32 %v8768_v43, %v5187_v47  ;;  %v5179_v23 = vadd.f32 %v5178_v17, %v5033_v13 }
 0x313   : > { %v5723_v48 = vpop.f32.mrf.mxu1 }
 0x314   : > { %5523 = vst.msk [vmem:[%s8784_s10 + $0x90] sm:$0xff] %vm368_vm5, %v5250_v40  ;;  %v5248_v4 = vadd.f32 %v8768_v43, %v5179_v23  ;;  %v5190_v52 = vadd.f32 %v5723_v48, %v5699_v35 }
 0x315   : > { %v5181_v33 = vpop.f32.mrf.mxu1 }
 0x316   : > { %5521 = vst.msk [vmem:[%s8784_s10 + $0x80] sm:$0xff] %vm368_vm5, %v5248_v4  ;;  %v5251_v18 = vadd.f32 %v8768_v43, %v5190_v52  ;;  %v5182_v31 = vadd.f32 %v5181_v33, %v5036_v28 }
 0x318   : > { %5524 = vst.msk [vmem:[%s8784_s10 + $0x98] sm:$0xff] %vm368_vm5, %v5251_v18  ;;  %v5249_v44 = vadd.f32 %v8768_v43, %v5182_v31 }
 0x31a   : > { %5522 = vst.msk [vmem:[%s8784_s10 + $0x88] sm:$0xff] %vm368_vm5, %v5249_v44  ;;  %v5702_v32 = vpop.f32.mrf.mxu0 }
 0x31c   : > { %v5049_v9 = vpop.f32.mrf.mxu0 }
 0x31e   : > { %v5703_v37 = vpop.f32.mrf.mxu0 }
 0x320   : > { %v5052_v55 = vpop.f32.mrf.mxu0 }
 0x332   : > { %v5726_v61 = vpop.f32.mrf.mxu1 }
 0x333   : > { %v5203_v30 = vadd.f32 %v5726_v61, %v5702_v32 }
 0x334   : > { %v5194_v38 = vpop.f32.mrf.mxu1 }
 0x335   : > { %v5254_v46 = vadd.f32 %v8768_v43, %v5203_v30  ;;  %v5195_v56 = vadd.f32 %v5194_v38, %v5049_v9 }
 0x336   : > { %v5727_v1 = vpop.f32.mrf.mxu1 }
 0x337   : > { %5527 = vst.msk [vmem:[%s8784_s10 + $0xb0] sm:$0xff] %vm368_vm5, %v5254_v46  ;;  %v5252_v63 = vadd.f32 %v8768_v43, %v5195_v56  ;;  %v5206_v24 = vadd.f32 %v5727_v1, %v5703_v37 }
 0x338   : > { %v5197_v27 = vpop.f32.mrf.mxu1 }
 0x339   : > { %5525 = vst.msk [vmem:[%s8784_s10 + $0xa0] sm:$0xff] %vm368_vm5, %v5252_v63  ;;  %v5255_v7 = vadd.f32 %v8768_v43, %v5206_v24  ;;  %v5198_v53 = vadd.f32 %v5197_v27, %v5052_v55 }
 0x33b   : > { %5528 = vst.msk [vmem:[%s8784_s10 + $0xb8] sm:$0xff] %vm368_vm5, %v5255_v7  ;;  %v5253_v60 = vadd.f32 %v8768_v43, %v5198_v53 }
 0x33d   : > { %5526 = vst.msk [vmem:[%s8784_s10 + $0xa8] sm:$0xff] %vm368_vm5, %v5253_v60  ;;  %v5706_v57 = vpop.f32.mrf.mxu0 }
 0x33f   : > { %v5065_v54 = vpop.f32.mrf.mxu0 }
 0x341   : > { %v5707_v11 = vpop.f32.mrf.mxu0 }
 0x343   : > { %v5068_v29 = vpop.f32.mrf.mxu0 }
 0x356   : > { %v5730_v42 = vpop.f32.mrf.mxu1 }
 0x357   : > { %v5219_v10 = vadd.f32 %v5730_v42, %v5706_v57 }
 0x358   : > { %v5210_v21 = vpop.f32.mrf.mxu1 }
 0x359   : > { %v5258_v36 = vadd.f32 %v8768_v43, %v5219_v10  ;;  %v5211_v34 = vadd.f32 %v5210_v21, %v5065_v54 }
 0x35a   : > { %v5731_v3 = vpop.f32.mrf.mxu1 }
 0x35b   : > { %5531 = vst.msk [vmem:[%s8784_s10 + $0xd0] sm:$0xff] %vm368_vm5, %v5258_v36  ;;  %v5256_v12 = vadd.f32 %v8768_v43, %v5211_v34  ;;  %v5222_v16 = vadd.f32 %v5731_v3, %v5707_v11 }
 0x35c   : > { %v5213_v15 = vpop.f32.mrf.mxu1 }
 0x35d   : > { %5529 = vst.msk [vmem:[%s8784_s10 + $0xc0] sm:$0xff] %vm368_vm5, %v5256_v12  ;;  %v5259_v39 = vadd.f32 %v8768_v43, %v5222_v16  ;;  %v5214_v0 = vadd.f32 %v5213_v15, %v5068_v29 }
 0x35f   : > { %5532 = vst.msk [vmem:[%s8784_s10 + $0xd8] sm:$0xff] %vm368_vm5, %v5259_v39  ;;  %v5257_v58 = vadd.f32 %v8768_v43, %v5214_v0 }
 0x361   : > { %5530 = vst.msk [vmem:[%s8784_s10 + $0xc8] sm:$0xff] %vm368_vm5, %v5257_v58  ;;  %v5710_v20 = vpop.f32.mrf.mxu0 }
 0x363   : > { %v5081_v2 = vpop.f32.mrf.mxu0 }
 0x365   : > { %v5711_v41 = vpop.f32.mrf.mxu0 }
 0x367   : > { %v5084_v49 = vpop.f32.mrf.mxu0 }
 0x37a   : > { %v5734_v8 = vpop.f32.mrf.mxu1 }
 0x37b   : > { %v5235_v45 = vadd.f32 %v5734_v8, %v5710_v20 }
 0x37c   : > { %v5226_v51 = vpop.f32.mrf.mxu1 }
 0x37d   : > { %v5262_v62 = vadd.f32 %v8768_v43, %v5235_v45  ;;  %v5227_v25 = vadd.f32 %v5226_v51, %v5081_v2 }
 0x37e   : > { %v5735_v14 = vpop.f32.mrf.mxu1 }
 0x37f   : > { %5535 = vst.msk [vmem:[%s8784_s10 + $0xf0] sm:$0xff] %vm368_vm5, %v5262_v62  ;;  %v5260_v19 = vadd.f32 %v8768_v43, %v5227_v25  ;;  %v5238_v59 = vadd.f32 %v5735_v14, %v5711_v41 }
 0x380   : > { %v5229_v50 = vpop.f32.mrf.mxu1 }
 0x381   : > { %5533 = vst.msk [vmem:[%s8784_s10 + $0xe0] sm:$0xff] %vm368_vm5, %v5260_v19  ;;  %v5263_v6 = vadd.f32 %v8768_v43, %v5238_v59  ;;  %v5230_v22 = vadd.f32 %v5229_v50, %v5084_v49 }
 0x383   : > { %5536 = vst.msk [vmem:[%s8784_s10 + $0xf8] sm:$0xff] %vm368_vm5, %v5263_v6  ;;  %v5261_v26 = vadd.f32 %v8768_v43, %v5230_v22 }
 0x385   : > { %5534 = vst.msk [vmem:[%s8784_s10 + $0xe8] sm:$0xff] %vm368_vm5, %v5261_v26 }
 0x386   : > { %5882 = shalt.err (!%p5879_p10)
}
 0x387   : > { %s5883_s24 = scalar_lea.hbm %s8885_s20, 4096  ;;  %s5887_s10 = scalar_lea.hbm %s8943_s8, 8192 }
 0x388   : > { %p5884_p0 = scmp.ne.s32.totalorder %s8885_s20, %s5883_s24  ;;  %p5888_p1 = scmp.lt.s32.totalorder %s8885_s20, %s8943_s8 }
 0x389   : > { %p5889_p3 = scmp.lt.s32.totalorder %s5887_s10, %s5883_s24 }
 0x38a   : > { %p5885_p2 = pnand %p5884_p0, %p8953_p12 }
 0x38b   : > { %p5890_p6 = por %p5889_p3, %p5888_p1 }
 0x38c   : > { %p5886_p9 = pneg %p5885_p2 }
 0x38e   : > { %p5891_p11 = pnand %p5890_p6, %p5886_p9 }
 0x390   : > { %5894 = shalt.err (!%p5891_p11)
}
 0x391   : > { %s5940_s25 = smov 128   ;;  %s5941_s13 = smov 8  }
 0x392   : > { %5738 = dma.vmem_to_hbm [thread:$0]  (%p8953_p12), %s8887_s12, 4096, %s8885_s20, %s5282_s9, %s5940_s25, %s5940_s25, %s5941_s13  }
 0x393 PF: > { %s5310_s22 = sand.u32 1, %s5921_s27   ;;  %p8954_p13 = scmp.ne.s32.totalorder %s8950_s18, 0 }
 0x394   : > { %p8955_p4 = scmp.ge.s32.totalorder %s5933_s30, 2  ;;  %s5311_s15 = scalar_lea.sflag [#allocation6], %s5310_s22 }
 0x396   : > { %p5745_p5 = pnand %p8955_p4, %p8954_p13 }
 0x398   : > { %p5746_p7 = pneg %p5745_p5 }
 0x39a   : > { %5916 = dma.done.wait (%p5746_p7), %s5311_s15, 4096  }
 0x39b   : > { %5918 = vsyncadd (%p5746_p7), %s5311_s15, 4294963200  ;;  %s8956_s16 = sld [smem:[#allocation10_spill]]  ;;  %p21_p8 = scmp.ge.s32.totalorder %s6012_s11, 4  }
 0x39c   : > { %s8957_s27 = smov %s5925_s28  ;;  %s8958_s28 = smov %s5929_s29 }
 0x39d   : > { %s8960_s30 = smov %s6012_s11  ;;  %23 = sbr.rel (!%p21_p8) target bundleno = 5 (0x5), region = 115 }
 0x3a1   : > { %s8959_s29 = smov %s8956_s16 }
 0x3a2   :  { %5316 = vsyncpa [#allocation5], 1 }
 0x3a3   :  { %5318 = vsyncpa [#allocation5 + $0x1], 1 }
 0x3a4   :  { %5319 = vsyncpa [#allocation6], 1 }
 0x3a5   :  { %5321 = vsyncpa [#allocation6 + $0x1], 1 }

</bundles_post_ra>
